<compile_context>
chip_gen: v6e
topology: v6e:2x2x1
jax: 0.10.0
libtpu: 0.0.40
codegen_flags: <defaults>
</compile_context>

<pallas_src>
import functools

import jax
import jax.numpy as jnp
from jax import lax
from jax.experimental import pallas as pl
from jax.experimental.pallas import tpu as pltpu


# ---------------------------------------------------------------------------
# Kernel
# ---------------------------------------------------------------------------
def _hsf_kernel(x_ref,        # [C, TT]      f32  current time tile (NCW slice)
                halo_ref,     # [C, 8]       f32  cols 0:4 left halo, 4:8 right
                w1f_ref,      # [2F, 5*C]    bf16 fused conv1 (im2col layout)
                b1f_ref,      # [2F, 1]      f32
                w2h_ref,      # [C, 3*F]     bf16 harmonic conv2 (im2col layout)
                b2h_ref,      # [C, 1]       f32
                w2n_ref,      # [C, 5*F]     bf16 noise conv2 (im2col layout)
                b2n_ref,      # [C, 1]       f32
                out_ref,      # [C, TT]      f32
                x_ext_ref,    # VMEM [C, 128 + TT + 4] bf16  haloed input tile
                xcol_ref,     # VMEM [5*C, TT + 4]     bf16  conv1 im2col
                h1_ref,       # VMEM [2F, TT + 4]      bf16  ReLU activation
                h1col_ref,    # VMEM [8*F, TT]         bf16  conv2 im2col
                *, t_valid):  # static: true (unpadded) sequence length
    C, TT = out_ref.shape
    F2 = h1_ref.shape[0]
    F = F2 // 2
    ext = TT + 4          # conv1 is evaluated on frames [t0-2, t0+TT+2)
    A = 128               # lane-aligned column where frame t0 lands in x_ext

    # ---- stage the haloed input tile, cast to bf16 once.
    # Columns [0, A-4) of x_ext are never written NOR read (reads start at
    # A-4=124); intentionally left uninitialized.
    x_ext_ref[:, A - 4:A] = halo_ref[:, 0:4].astype(jnp.bfloat16)
    x_ext_ref[:, A:A + TT] = x_ref[...].astype(jnp.bfloat16)
    x_ext_ref[:, A + TT:A + TT + 4] = halo_ref[:, 4:8].astype(jnp.bfloat16)

    # ---- conv1 im2col: row-block k holds tap k.  ext index i = absolute
    # frame t0-2+i; tap k reads x at frame t0+i+k-4 == x_ext column A-4+k+i.
    for k in range(5):
        xcol_ref[k * C:(k + 1) * C, :] = x_ext_ref[:, A - 4 + k:A - 4 + k + ext]

    # Single fused matmul (harmonic + noise -> 2F output rows), f32 accumulate.
    acc = jnp.dot(w1f_ref[...], xcol_ref[...],
                  preferred_element_type=jnp.float32)
    h1_ref[...] = jnp.maximum(acc + b1f_ref[...], 0.0).astype(jnp.bfloat16)

    # ---- reproduce PyTorch's zero padding of the *intermediate* activation:
    # h1 at frames < 0 and >= t_valid must be zero before conv2.
    t = pl.program_id(1)
    t0 = t * TT

    @pl.when(t == 0)
    def _():
        h1_ref[:, 0:2] = jnp.zeros((F2, 2), jnp.bfloat16)

    @pl.when(t0 + TT + 2 > t_valid)   # this tile's ext window touches padding
    def _():
        frame = t0 - 2 + lax.broadcasted_iota(jnp.int32, (1, ext), 1)
        h1_ref[...] = jnp.where(frame >= t_valid, 0,
                                h1_ref[...]).astype(jnp.bfloat16)

    # ---- conv2 im2col (per branch, portable across v5e/v6e/v7x):
    # rows 0:3F = harmonic taps (pad=1), rows 3F:8F = noise taps (pad=2).
    for k in range(3):
        h1col_ref[k * F:(k + 1) * F, :] = h1_ref[0:F, k + 1:k + 1 + TT]
    for k in range(5):
        h1col_ref[(3 + k) * F:(4 + k) * F, :] = h1_ref[F:F2, k:k + TT]

    h = jnp.dot(w2h_ref[...], h1col_ref[0:3 * F, :],
                preferred_element_type=jnp.float32) + b2h_ref[...]
    n = jnp.dot(w2n_ref[...], h1col_ref[3 * F:8 * F, :],
                preferred_element_type=jnp.float32) + b2n_ref[...]

    gate = jax.nn.sigmoid(h)                      # f32 on the EUP
    out_ref[...] = (n + (h - n) * gate).astype(out_ref.dtype)


# ---------------------------------------------------------------------------
# One-time weight packing (hoisted out of the per-call wrapper)
# ---------------------------------------------------------------------------
def prepare_params(params):
    """Pack raw PyTorch-layout conv weights into fused bf16 im2col matrices."""
    (w1h, b1h), (w2h, b2h), (w1n, b1n), (w2n, b2n) = params
    F, C, _ = w1h.shape
    # conv1: pad harmonic taps 3->5, fuse with noise -> [2F, C, 5] -> [2F, 5C]
    w1 = jnp.concatenate([jnp.pad(w1h, ((0, 0), (0, 0), (1, 1))), w1n], axis=0)
    w1f = jnp.transpose(w1, (0, 2, 1)).reshape(2 * F, 5 * C)      # [o, k*C + c]
    b1f = jnp.concatenate([b1h, b1n])[:, None]
    # conv2 per branch: [C, F, K] -> [C, K*F] with index [o, k*F + f]
    w2h_f = jnp.transpose(w2h, (0, 2, 1)).reshape(C, 3 * F)
    w2n_f = jnp.transpose(w2n, (0, 2, 1)).reshape(C, 5 * F)
    return (w1f.astype(jnp.bfloat16), b1f.astype(jnp.float32),
            w2h_f.astype(jnp.bfloat16), b2h[:, None].astype(jnp.float32),
            w2n_f.astype(jnp.bfloat16), b2n[:, None].astype(jnp.float32))


# ---------------------------------------------------------------------------
# Wrapper
# ---------------------------------------------------------------------------
def _pick_time_tile(t_pad):
    for c in (2048, 1024, 512, 256, 128):
        if t_pad % c == 0:
            return c
    return 128   # unreachable: t_pad is always a multiple of 128


def harmonic_source_filter(mel, packed):
    """mel: [B, C, T] float32 (PyTorch NCW layout). Returns [B, C, T] float32."""
    w1f, b1f, w2hf, b2h, w2nf, b2n = packed
    B, C, T = mel.shape
    F2 = w1f.shape[0]
    F = F2 // 2
    assert w1f.shape[1] == 5 * C and T >= 1

    # Pad T to a multiple of 128 (lane-dense stores for any T); the padded
    # frames are masked to zero in-kernel before conv2 and sliced off below.
    t_pad = ((T + 127) // 128) * 128
    x = mel.astype(jnp.float32)
    if t_pad != T:
        x = jnp.pad(x, ((0, 0), (0, 0), (0, t_pad - T)))

    TT = _pick_time_tile(t_pad)
    nT = t_pad // TT
    ext = TT + 4

    # Tiny halo side-array [B, nT, C, 8]: last 4 frames of the previous tile
    # and first 4 frames of the next tile (zeros at the sequence edges).
    xr = x.reshape(B, C, nT, TT)
    zcap = jnp.zeros((B, C, 1, 4), x.dtype)
    left = jnp.concatenate([zcap, xr[:, :, :-1, TT - 4:]], axis=2)
    right = jnp.concatenate([xr[:, :, 1:, :4], zcap], axis=2)
    halo = jnp.transpose(jnp.concatenate([left, right], axis=3), (0, 2, 1, 3))

    grid_spec = pltpu.PrefetchScalarGridSpec(
        num_scalar_prefetch=0,
        grid=(B, nT),
        in_specs=[
            pl.BlockSpec((None, C, TT), lambda b, t: (b, 0, t)),          # x tile
            pl.BlockSpec((None, None, C, 8), lambda b, t: (b, t, 0, 0)),  # halo
            pl.BlockSpec((F2, 5 * C), lambda b, t: (0, 0)),               # w1f
            pl.BlockSpec((F2, 1), lambda b, t: (0, 0)),                   # b1f
            pl.BlockSpec((C, 3 * F), lambda b, t: (0, 0)),                # w2h
            pl.BlockSpec((C, 1), lambda b, t: (0, 0)),                    # b2h
            pl.BlockSpec((C, 5 * F), lambda b, t: (0, 0)),                # w2n
            pl.BlockSpec((C, 1), lambda b, t: (0, 0)),                    # b2n
        ],
        out_specs=pl.BlockSpec((None, C, TT), lambda b, t: (b, 0, t)),
        scratch_shapes=[
            pltpu.VMEM((C, 128 + TT + 4), jnp.bfloat16),   # haloed input tile
            pltpu.VMEM((5 * C, ext), jnp.bfloat16),        # conv1 im2col
            pltpu.VMEM((F2, ext), jnp.bfloat16),           # fused ReLU activation
            pltpu.VMEM((8 * F, TT), jnp.bfloat16),         # conv2 im2col
        ],
    )

    out = pl.pallas_call(
        functools.partial(_hsf_kernel, t_valid=T),
        out_shape=jax.ShapeDtypeStruct((B, C, t_pad), jnp.float32),
        grid_spec=grid_spec,
        compiler_params=pltpu.CompilerParams(
            dimension_semantics=("parallel", "parallel"),
            vmem_limit_bytes=48 * 1024 * 1024),
    )(x, halo, w1f, b1f, w2hf, b2h, w2nf, b2n)

    return out[:, :, :T] if t_pad != T else out


# ---------------------------------------------------------------------------
# Deterministic parameter init (mimics nn.Conv1d default uniform init),
# returned in raw PyTorch layout: ((w1h,b1h),(w2h,b2h),(w1n,b1n),(w2n,b2n)).
# ---------------------------------------------------------------------------
def init_params(key, ch=80, filt_ch=64):
    def conv_init(k, out_ch, in_ch, K):
        kw, kb = jax.random.split(k)
        bound = 1.0 / jnp.sqrt(in_ch * K)
        w = jax.random.uniform(kw, (out_ch, in_ch, K), jnp.float32, -bound, bound)
        b = jax.random.uniform(kb, (out_ch,), jnp.float32, -bound, bound)
        return w, b

    k1, k2, k3, k4 = jax.random.split(key, 4)
    return (conv_init(k1, filt_ch, ch, 3),
            conv_init(k2, ch, filt_ch, 3),
            conv_init(k3, filt_ch, ch, 5),
            conv_init(k4, ch, filt_ch, 5))


# ---------------------------------------------------------------------------
# Pure-JAX f32 reference (mirrors the PyTorch module) for verification
# ---------------------------------------------------------------------------
def _conv1d_ref(x, w, b, pad):
    y = lax.conv_general_dilated(
        x, w, window_strides=(1,), padding=[(pad, pad)],
        dimension_numbers=("NCH", "OIH", "NCH"))
    return y + b[None, :, None]


def reference_forward(mel, params):
    (w1h, b1h), (w2h, b2h), (w1n, b1n), (w2n, b2n) = params
    h = _conv1d_ref(jnp.maximum(_conv1d_ref(mel, w1h, b1h, 1), 0.0), w2h, b2h, 1)
    n = _conv1d_ref(jnp.maximum(_conv1d_ref(mel, w1n, b1n, 2), 0.0), w2n, b2n, 2)
    gate = jax.nn.sigmoid(h)
    return h * gate + n * (1.0 - gate)


# ---------------------------------------------------------------------------
if __name__ == "__main__":
    key = jax.random.PRNGKey(0)
    k_params, k1, k2, k3 = jax.random.split(key, 4)

    B, C, F = 2, 80, 64
    params = init_params(k_params, ch=C, filt_ch=F)
    packed = prepare_params(params)
    hsf = jax.jit(harmonic_source_filter)

    # T=16: single padded tile (rem path); T=384: 3 tiles, no padding;
    # T=300: 3 tiles with 84 padded frames (end-of-sequence masking).
    for k_mel, T in ((k1, 16), (k2, 384), (k3, 300)):
        mel = jax.random.normal(k_mel, (B, C, T), jnp.float32)
        out = jax.block_until_ready(hsf(mel, packed))
        ref = reference_forward(mel, params)
        assert out.shape == (B, C, T), out.shape
        err = float(jnp.max(jnp.abs(out - ref)))
        # bf16 matmul operands (f32 accumulate) vs an all-f32 reference.
        assert err < 5e-2, f"T={T}: max abs err {err}"

    print("KERNEL_OK")
</pallas_src>

<mosaic_0001>
module attributes {stable_mosaic.version = 11 : i64} {
  func.func @_hsf_kernel(%arg0: i32, %arg1: i32, %arg2: memref<1x80x128xf32, #tpu.memory_space<vmem>>, %arg3: memref<1x1x80x8xf32, #tpu.memory_space<vmem>>, %arg4: memref<128x400xbf16, #tpu.memory_space<vmem>>, %arg5: memref<128x1xf32, #tpu.memory_space<vmem>>, %arg6: memref<80x192xbf16, #tpu.memory_space<vmem>>, %arg7: memref<80x1xf32, #tpu.memory_space<vmem>>, %arg8: memref<80x320xbf16, #tpu.memory_space<vmem>>, %arg9: memref<80x1xf32, #tpu.memory_space<vmem>>, %arg10: memref<1x80x128xf32, #tpu.memory_space<vmem>>, %arg11: memref<80x260xbf16, #tpu.memory_space<vmem>>, %arg12: memref<400x132xbf16, #tpu.memory_space<vmem>>, %arg13: memref<128x132xbf16, #tpu.memory_space<vmem>>, %arg14: memref<512x128xbf16, #tpu.memory_space<vmem>>) attributes {dimension_semantics = [#tpu.dimension_semantics<parallel>, #tpu.dimension_semantics<parallel>], iteration_bounds = array<i64: 2, 1>, scalar_prefetch = 0 : i64, scratch_operands = 4 : i64, tpu.core_type = #tpu.core_type<tc>, window_params = [{transform_indices = @transform_0, window_bounds = array<i64: 1, 80, 128>}, {transform_indices = @transform_1, window_bounds = array<i64: 1, 1, 80, 8>}, {pipeline_mode = #tpu.pipeline_mode<synchronous>, transform_indices = @transform_2, window_bounds = array<i64: 128, 400>}, {pipeline_mode = #tpu.pipeline_mode<synchronous>, transform_indices = @transform_3, window_bounds = array<i64: 128, 1>}, {pipeline_mode = #tpu.pipeline_mode<synchronous>, transform_indices = @transform_4, window_bounds = array<i64: 80, 192>}, {pipeline_mode = #tpu.pipeline_mode<synchronous>, transform_indices = @transform_5, window_bounds = array<i64: 80, 1>}, {pipeline_mode = #tpu.pipeline_mode<synchronous>, transform_indices = @transform_6, window_bounds = array<i64: 80, 320>}, {pipeline_mode = #tpu.pipeline_mode<synchronous>, transform_indices = @transform_7, window_bounds = array<i64: 80, 1>}, {transform_indices = @transform_8, window_bounds = array<i64: 1, 80, 128>}]} {
    %c0 = arith.constant 0 : index
    %c0_0 = arith.constant 0 : index
    %c0_1 = arith.constant 0 : index
    %c0_2 = arith.constant 0 : index
    %0 = vector.load %arg3[%c0, %c0_0, %c0_1, %c0_2] : memref<1x1x80x8xf32, #tpu.memory_space<vmem>>, vector<1x1x80x4xf32>
    %1 = vector.shape_cast %0 : vector<1x1x80x4xf32> to vector<80x4xf32>
    %2 = arith.truncf %1 : vector<80x4xf32> to vector<80x4xbf16>
    %c0_3 = arith.constant 0 : index
    %c124 = arith.constant 124 : index
    %3 = vector.load %arg11[%c0_3, %c124] : memref<80x260xbf16, #tpu.memory_space<vmem>>, vector<80x4xbf16>
    tpu.vector_store %arg11[%c0_3, %c124], %2 {strides = array<i32>} : memref<80x260xbf16, #tpu.memory_space<vmem>>, vector<80x4xbf16>,
    %c0_4 = arith.constant 0 : index
    %c0_5 = arith.constant 0 : index
    %c0_6 = arith.constant 0 : index
    %4 = vector.load %arg2[%c0_4, %c0_5, %c0_6] : memref<1x80x128xf32, #tpu.memory_space<vmem>>, vector<1x80x128xf32>
    %5 = vector.shape_cast %4 : vector<1x80x128xf32> to vector<80x128xf32>
    %6 = arith.truncf %5 : vector<80x128xf32> to vector<80x128xbf16>
    %c0_7 = arith.constant 0 : index
    %c128 = arith.constant 128 : index
    %7 = vector.load %arg11[%c0_7, %c128] : memref<80x260xbf16, #tpu.memory_space<vmem>>, vector<80x128xbf16>
    tpu.vector_store %arg11[%c0_7, %c128], %6 {strides = array<i32>} : memref<80x260xbf16, #tpu.memory_space<vmem>>, vector<80x128xbf16>,
    %c0_8 = arith.constant 0 : index
    %c0_9 = arith.constant 0 : index
    %c0_10 = arith.constant 0 : index
    %c4 = arith.constant 4 : index
    %8 = vector.load %arg3[%c0_8, %c0_9, %c0_10, %c4] : memref<1x1x80x8xf32, #tpu.memory_space<vmem>>, vector<1x1x80x4xf32>
    %9 = vector.shape_cast %8 : vector<1x1x80x4xf32> to vector<80x4xf32>
    %10 = arith.truncf %9 : vector<80x4xf32> to vector<80x4xbf16>
    %c0_11 = arith.constant 0 : index
    %c256 = arith.constant 256 : index
    %11 = vector.load %arg11[%c0_11, %c256] : memref<80x260xbf16, #tpu.memory_space<vmem>>, vector<80x4xbf16>
    tpu.vector_store %arg11[%c0_11, %c256], %10 {strides = array<i32>} : memref<80x260xbf16, #tpu.memory_space<vmem>>, vector<80x4xbf16>,
    %c0_12 = arith.constant 0 : index
    %c124_13 = arith.constant 124 : index
    %12 = vector.load %arg11[%c0_12, %c124_13] : memref<80x260xbf16, #tpu.memory_space<vmem>>, vector<80x132xbf16>
    %c0_14 = arith.constant 0 : index
    %c0_15 = arith.constant 0 : index
    %13 = vector.load %arg12[%c0_14, %c0_15] : memref<400x132xbf16, #tpu.memory_space<vmem>>, vector<80x132xbf16>
    tpu.vector_store %arg12[%c0_14, %c0_15], %12 {strides = array<i32>} : memref<400x132xbf16, #tpu.memory_space<vmem>>, vector<80x132xbf16>,
    %c0_16 = arith.constant 0 : index
    %c125 = arith.constant 125 : index
    %14 = vector.load %arg11[%c0_16, %c125] : memref<80x260xbf16, #tpu.memory_space<vmem>>, vector<80x132xbf16>
    %c80 = arith.constant 80 : index
    %c0_17 = arith.constant 0 : index
    %15 = vector.load %arg12[%c80, %c0_17] : memref<400x132xbf16, #tpu.memory_space<vmem>>, vector<80x132xbf16>
    tpu.vector_store %arg12[%c80, %c0_17], %14 {strides = array<i32>} : memref<400x132xbf16, #tpu.memory_space<vmem>>, vector<80x132xbf16>,
    %c0_18 = arith.constant 0 : index
    %c126 = arith.constant 126 : index
    %16 = vector.load %arg11[%c0_18, %c126] : memref<80x260xbf16, #tpu.memory_space<vmem>>, vector<80x132xbf16>
    %c160 = arith.constant 160 : index
    %c0_19 = arith.constant 0 : index
    %17 = vector.load %arg12[%c160, %c0_19] : memref<400x132xbf16, #tpu.memory_space<vmem>>, vector<80x132xbf16>
    tpu.vector_store %arg12[%c160, %c0_19], %16 {strides = array<i32>} : memref<400x132xbf16, #tpu.memory_space<vmem>>, vector<80x132xbf16>,
    %c0_20 = arith.constant 0 : index
    %c127 = arith.constant 127 : index
    %18 = vector.load %arg11[%c0_20, %c127] : memref<80x260xbf16, #tpu.memory_space<vmem>>, vector<80x132xbf16>
    %c240 = arith.constant 240 : index
    %c0_21 = arith.constant 0 : index
    %19 = vector.load %arg12[%c240, %c0_21] : memref<400x132xbf16, #tpu.memory_space<vmem>>, vector<80x132xbf16>
    tpu.vector_store %arg12[%c240, %c0_21], %18 {strides = array<i32>} : memref<400x132xbf16, #tpu.memory_space<vmem>>, vector<80x132xbf16>,
    %c0_22 = arith.constant 0 : index
    %c128_23 = arith.constant 128 : index
    %20 = vector.load %arg11[%c0_22, %c128_23] : memref<80x260xbf16, #tpu.memory_space<vmem>>, vector<80x132xbf16>
    %c320 = arith.constant 320 : index
    %c0_24 = arith.constant 0 : index
    %21 = vector.load %arg12[%c320, %c0_24] : memref<400x132xbf16, #tpu.memory_space<vmem>>, vector<80x132xbf16>
    tpu.vector_store %arg12[%c320, %c0_24], %20 {strides = array<i32>} : memref<400x132xbf16, #tpu.memory_space<vmem>>, vector<80x132xbf16>,
    %c0_25 = arith.constant 0 : index
    %c0_26 = arith.constant 0 : index
    %22 = vector.load %arg4[%c0_25, %c0_26] : memref<128x400xbf16, #tpu.memory_space<vmem>>, vector<128x400xbf16>
    %c0_27 = arith.constant 0 : index
    %c0_28 = arith.constant 0 : index
    %23 = vector.load %arg12[%c0_27, %c0_28] : memref<400x132xbf16, #tpu.memory_space<vmem>>, vector<400x132xbf16>
    %cst = arith.constant dense<0.000000e+00> : vector<128x132xf32>
    %24 = tpu.matmul %22, %23, %cst {dimension_numbers = #tpu.dot_dimension_numbers<[1], [0], [0], [1], [0, 0, 1, 1], [], []>} : vector<128x400xbf16>, vector<400x132xbf16>, vector<128x132xf32> -> vector<128x132xf32>
    %c0_29 = arith.constant 0 : index
    %c0_30 = arith.constant 0 : index
    %25 = vector.load %arg5[%c0_29, %c0_30] : memref<128x1xf32, #tpu.memory_space<vmem>>, vector<128x1xf32>
    %26 = vector.broadcast %25 : vector<128x1xf32> to vector<128x132xf32>
    %27 = arith.addf %24, %26 : vector<128x132xf32>
    %cst_31 = arith.constant 0.000000e+00 : f32
    %28 = vector.broadcast %cst_31 : f32 to vector<128x132xf32>
    %29 = arith.maximumf %27, %28 : vector<128x132xf32>
    %30 = arith.truncf %29 : vector<128x132xf32> to vector<128x132xbf16>
    %c0_32 = arith.constant 0 : index
    %c0_33 = arith.constant 0 : index
    %31 = vector.load %arg13[%c0_32, %c0_33] : memref<128x132xbf16, #tpu.memory_space<vmem>>, vector<128x132xbf16>
    tpu.vector_store %arg13[%c0_32, %c0_33], %30 {strides = array<i32>} : memref<128x132xbf16, #tpu.memory_space<vmem>>, vector<128x132xbf16>,
    %c128_i32 = arith.constant 128 : i32
    %32 = arith.muli %arg1, %c128_i32 : i32
    %c0_i32 = arith.constant 0 : i32
    %33 = arith.cmpi eq, %arg1, %c0_i32 : i32
    %34 = arith.extui %33 : i1 to i32
    %c0_i32_34 = arith.constant 0 : i32
    %35 = arith.cmpi ne, %34, %c0_i32_34 : i32
    scf.if %35 {
      %cst_80 = arith.constant 0.000000e+00 : bf16
      %80 = vector.broadcast %cst_80 : bf16 to vector<128x2xbf16>
      %c0_81 = arith.constant 0 : index
      %c0_82 = arith.constant 0 : index
      %81 = vector.load %arg13[%c0_81, %c0_82] : memref<128x132xbf16, #tpu.memory_space<vmem>>, vector<128x2xbf16>
      tpu.vector_store %arg13[%c0_81, %c0_82], %80 {strides = array<i32>} : memref<128x132xbf16, #tpu.memory_space<vmem>>, vector<128x2xbf16>,
    } else {
    }
    %c128_i32_35 = arith.constant 128 : i32
    %36 = arith.addi %32, %c128_i32_35 : i32
    %c2_i32 = arith.constant 2 : i32
    %37 = arith.addi %36, %c2_i32 : i32
    %c16_i32 = arith.constant 16 : i32
    %38 = arith.cmpi sgt, %37, %c16_i32 : i32
    %39 = arith.extui %38 : i1 to i32
    %c0_i32_36 = arith.constant 0 : i32
    %40 = arith.cmpi ne, %39, %c0_i32_36 : i32
    scf.if %40 {
      %c2_i32_80 = arith.constant 2 : i32
      %80 = arith.subi %32, %c2_i32_80 : i32
      %81 = tpu.iota {dimensions = array<i32: 1>} : vector<1x132xi32>
      %82 = vector.broadcast %80 : i32 to vector<1x132xi32>
      %83 = arith.addi %82, %81 : vector<1x132xi32>
      %c16_i32_81 = arith.constant 16 : i32
      %84 = vector.broadcast %c16_i32_81 : i32 to vector<1x132xi32>
      %85 = arith.cmpi sge, %83, %84 : vector<1x132xi32>
      %c0_82 = arith.constant 0 : index
      %c0_83 = arith.constant 0 : index
      %86 = vector.load %arg13[%c0_82, %c0_83] : memref<128x132xbf16, #tpu.memory_space<vmem>>, vector<128x132xbf16>
      %c0_i32_84 = arith.constant 0 : i32
      %87 = arith.sitofp %c0_i32_84 : i32 to bf16
      %88 = vector.shape_cast %85 : vector<1x132xi1> to vector<1x132xi1>
      %89 = vector.broadcast %88 : vector<1x132xi1> to vector<128x132xi1>
      %90 = vector.broadcast %87 : bf16 to vector<128x132xbf16>
      %91 = arith.select %89, %90, %86 : vector<128x132xi1>, vector<128x132xbf16>
      %c0_85 = arith.constant 0 : index
      %c0_86 = arith.constant 0 : index
      %92 = vector.load %arg13[%c0_85, %c0_86] : memref<128x132xbf16, #tpu.memory_space<vmem>>, vector<128x132xbf16>
      tpu.vector_store %arg13[%c0_85, %c0_86], %91 {strides = array<i32>} : memref<128x132xbf16, #tpu.memory_space<vmem>>, vector<128x132xbf16>,
    } else {
    }
    %c0_37 = arith.constant 0 : index
    %c1 = arith.constant 1 : index
    %41 = vector.load %arg13[%c0_37, %c1] : memref<128x132xbf16, #tpu.memory_space<vmem>>, vector<64x128xbf16>
    %c0_38 = arith.constant 0 : index
    %c0_39 = arith.constant 0 : index
    %42 = vector.load %arg14[%c0_38, %c0_39] : memref<512x128xbf16, #tpu.memory_space<vmem>>, vector<64x128xbf16>
    tpu.vector_store %arg14[%c0_38, %c0_39], %41 {strides = array<i32>} : memref<512x128xbf16, #tpu.memory_space<vmem>>, vector<64x128xbf16>,
    %c0_40 = arith.constant 0 : index
    %c2 = arith.constant 2 : index
    %43 = vector.load %arg13[%c0_40, %c2] : memref<128x132xbf16, #tpu.memory_space<vmem>>, vector<64x128xbf16>
    %c64 = arith.constant 64 : index
    %c0_41 = arith.constant 0 : index
    %44 = vector.load %arg14[%c64, %c0_41] : memref<512x128xbf16, #tpu.memory_space<vmem>>, vector<64x128xbf16>
    tpu.vector_store %arg14[%c64, %c0_41], %43 {strides = array<i32>} : memref<512x128xbf16, #tpu.memory_space<vmem>>, vector<64x128xbf16>,
    %c0_42 = arith.constant 0 : index
    %c3 = arith.constant 3 : index
    %45 = vector.load %arg13[%c0_42, %c3] : memref<128x132xbf16, #tpu.memory_space<vmem>>, vector<64x128xbf16>
    %c128_43 = arith.constant 128 : index
    %c0_44 = arith.constant 0 : index
    %46 = vector.load %arg14[%c128_43, %c0_44] : memref<512x128xbf16, #tpu.memory_space<vmem>>, vector<64x128xbf16>
    tpu.vector_store %arg14[%c128_43, %c0_44], %45 {strides = array<i32>} : memref<512x128xbf16, #tpu.memory_space<vmem>>, vector<64x128xbf16>,
    %c64_45 = arith.constant 64 : index
    %c0_46 = arith.constant 0 : index
    %47 = vector.load %arg13[%c64_45, %c0_46] : memref<128x132xbf16, #tpu.memory_space<vmem>>, vector<64x128xbf16>
    %c192 = arith.constant 192 : index
    %c0_47 = arith.constant 0 : index
    %48 = vector.load %arg14[%c192, %c0_47] : memref<512x128xbf16, #tpu.memory_space<vmem>>, vector<64x128xbf16>
    tpu.vector_store %arg14[%c192, %c0_47], %47 {strides = array<i32>} : memref<512x128xbf16, #tpu.memory_space<vmem>>, vector<64x128xbf16>,
    %c64_48 = arith.constant 64 : index
    %c1_49 = arith.constant 1 : index
    %49 = vector.load %arg13[%c64_48, %c1_49] : memref<128x132xbf16, #tpu.memory_space<vmem>>, vector<64x128xbf16>
    %c256_50 = arith.constant 256 : index
    %c0_51 = arith.constant 0 : index
    %50 = vector.load %arg14[%c256_50, %c0_51] : memref<512x128xbf16, #tpu.memory_space<vmem>>, vector<64x128xbf16>
    tpu.vector_store %arg14[%c256_50, %c0_51], %49 {strides = array<i32>} : memref<512x128xbf16, #tpu.memory_space<vmem>>, vector<64x128xbf16>,
    %c64_52 = arith.constant 64 : index
    %c2_53 = arith.constant 2 : index
    %51 = vector.load %arg13[%c64_52, %c2_53] : memref<128x132xbf16, #tpu.memory_space<vmem>>, vector<64x128xbf16>
    %c320_54 = arith.constant 320 : index
    %c0_55 = arith.constant 0 : index
    %52 = vector.load %arg14[%c320_54, %c0_55] : memref<512x128xbf16, #tpu.memory_space<vmem>>, vector<64x128xbf16>
    tpu.vector_store %arg14[%c320_54, %c0_55], %51 {strides = array<i32>} : memref<512x128xbf16, #tpu.memory_space<vmem>>, vector<64x128xbf16>,
    %c64_56 = arith.constant 64 : index
    %c3_57 = arith.constant 3 : index
    %53 = vector.load %arg13[%c64_56, %c3_57] : memref<128x132xbf16, #tpu.memory_space<vmem>>, vector<64x128xbf16>
    %c384 = arith.constant 384 : index
    %c0_58 = arith.constant 0 : index
    %54 = vector.load %arg14[%c384, %c0_58] : memref<512x128xbf16, #tpu.memory_space<vmem>>, vector<64x128xbf16>
    tpu.vector_store %arg14[%c384, %c0_58], %53 {strides = array<i32>} : memref<512x128xbf16, #tpu.memory_space<vmem>>, vector<64x128xbf16>,
    %c64_59 = arith.constant 64 : index
    %c4_60 = arith.constant 4 : index
    %55 = vector.load %arg13[%c64_59, %c4_60] : memref<128x132xbf16, #tpu.memory_space<vmem>>, vector<64x128xbf16>
    %c448 = arith.constant 448 : index
    %c0_61 = arith.constant 0 : index
    %56 = vector.load %arg14[%c448, %c0_61] : memref<512x128xbf16, #tpu.memory_space<vmem>>, vector<64x128xbf16>
    tpu.vector_store %arg14[%c448, %c0_61], %55 {strides = array<i32>} : memref<512x128xbf16, #tpu.memory_space<vmem>>, vector<64x128xbf16>,
    %c0_62 = arith.constant 0 : index
    %c0_63 = arith.constant 0 : index
    %57 = vector.load %arg6[%c0_62, %c0_63] : memref<80x192xbf16, #tpu.memory_space<vmem>>, vector<80x192xbf16>
    %c0_64 = arith.constant 0 : index
    %c0_65 = arith.constant 0 : index
    %58 = vector.load %arg14[%c0_64, %c0_65] : memref<512x128xbf16, #tpu.memory_space<vmem>>, vector<192x128xbf16>
    %cst_66 = arith.constant dense<0.000000e+00> : vector<80x128xf32>
    %59 = tpu.matmul %57, %58, %cst_66 {dimension_numbers = #tpu.dot_dimension_numbers<[1], [0], [0], [1], [0, 0, 1, 1], [], []>} : vector<80x192xbf16>, vector<192x128xbf16>, vector<80x128xf32> -> vector<80x128xf32>
    %c0_67 = arith.constant 0 : index
    %c0_68 = arith.constant 0 : index
    %60 = vector.load %arg7[%c0_67, %c0_68] : memref<80x1xf32, #tpu.memory_space<vmem>>, vector<80x1xf32>
    %61 = vector.broadcast %60 : vector<80x1xf32> to vector<80x128xf32>
    %62 = arith.addf %59, %61 : vector<80x128xf32>
    %c0_69 = arith.constant 0 : index
    %c0_70 = arith.constant 0 : index
    %63 = vector.load %arg8[%c0_69, %c0_70] : memref<80x320xbf16, #tpu.memory_space<vmem>>, vector<80x320xbf16>
    %c192_71 = arith.constant 192 : index
    %c0_72 = arith.constant 0 : index
    %64 = vector.load %arg14[%c192_71, %c0_72] : memref<512x128xbf16, #tpu.memory_space<vmem>>, vector<320x128xbf16>
    %cst_73 = arith.constant dense<0.000000e+00> : vector<80x128xf32>
    %65 = tpu.matmul %63, %64, %cst_73 {dimension_numbers = #tpu.dot_dimension_numbers<[1], [0], [0], [1], [0, 0, 1, 1], [], []>} : vector<80x320xbf16>, vector<320x128xbf16>, vector<80x128xf32> -> vector<80x128xf32>
    %c0_74 = arith.constant 0 : index
    %c0_75 = arith.constant 0 : index
    %66 = vector.load %arg9[%c0_74, %c0_75] : memref<80x1xf32, #tpu.memory_space<vmem>>, vector<80x1xf32>
    %67 = vector.broadcast %66 : vector<80x1xf32> to vector<80x128xf32>
    %68 = arith.addf %65, %67 : vector<80x128xf32>
    %69 = arith.negf %62 : vector<80x128xf32>
    %70 = math.exp %69 : vector<80x128xf32>
    %cst_76 = arith.constant 1.000000e+00 : f32
    %71 = vector.broadcast %cst_76 : f32 to vector<80x128xf32>
    %72 = arith.addf %71, %70 : vector<80x128xf32>
    %73 = arith.divf %71, %72 : vector<80x128xf32>
    %74 = arith.subf %62, %68 : vector<80x128xf32>
    %75 = arith.mulf %74, %73 : vector<80x128xf32>
    %76 = arith.addf %68, %75 : vector<80x128xf32>
    %c0_77 = arith.constant 0 : index
    %c0_78 = arith.constant 0 : index
    %c0_79 = arith.constant 0 : index
    %77 = vector.load %arg10[%c0_77, %c0_78, %c0_79] : memref<1x80x128xf32, #tpu.memory_space<vmem>>, vector<1x80x128xf32>
    %78 = vector.shape_cast %77 : vector<1x80x128xf32> to vector<80x128xf32>
    %79 = vector.shape_cast %76 : vector<80x128xf32> to vector<1x80x128xf32>
    tpu.vector_store %arg10[%c0_77, %c0_78, %c0_79], %79 {strides = array<i32>} : memref<1x80x128xf32, #tpu.memory_space<vmem>>, vector<1x80x128xf32>,
    return
  }
  func.func @transform_0(%arg0: i32, %arg1: i32) -> (i32, i32, i32) {
    %c0_i32 = arith.constant 0 : i32
    %c0_i32_0 = arith.constant 0 : i32
    return %arg0, %c0_i32, %arg1 : i32, i32, i32
  }
  func.func @transform_1(%arg0: i32, %arg1: i32) -> (i32, i32, i32, i32) {
    %c0_i32 = arith.constant 0 : i32
    %c0_i32_0 = arith.constant 0 : i32
    %c0_i32_1 = arith.constant 0 : i32
    return %arg0, %arg1, %c0_i32, %c0_i32_0 : i32, i32, i32, i32
  }
  func.func @transform_2(%arg0: i32, %arg1: i32) -> (i32, i32) {
    %c0_i32 = arith.constant 0 : i32
    %c0_i32_0 = arith.constant 0 : i32
    %c0_i32_1 = arith.constant 0 : i32
    return %c0_i32, %c0_i32_0 : i32, i32
  }
  func.func @transform_3(%arg0: i32, %arg1: i32) -> (i32, i32) {
    %c0_i32 = arith.constant 0 : i32
    %c0_i32_0 = arith.constant 0 : i32
    %c0_i32_1 = arith.constant 0 : i32
    return %c0_i32, %c0_i32_0 : i32, i32
  }
  func.func @transform_4(%arg0: i32, %arg1: i32) -> (i32, i32) {
    %c0_i32 = arith.constant 0 : i32
    %c0_i32_0 = arith.constant 0 : i32
    %c0_i32_1 = arith.constant 0 : i32
    return %c0_i32, %c0_i32_0 : i32, i32
  }
  func.func @transform_5(%arg0: i32, %arg1: i32) -> (i32, i32) {
    %c0_i32 = arith.constant 0 : i32
    %c0_i32_0 = arith.constant 0 : i32
    %c0_i32_1 = arith.constant 0 : i32
    return %c0_i32, %c0_i32_0 : i32, i32
  }
  func.func @transform_6(%arg0: i32, %arg1: i32) -> (i32, i32) {
    %c0_i32 = arith.constant 0 : i32
    %c0_i32_0 = arith.constant 0 : i32
    %c0_i32_1 = arith.constant 0 : i32
    return %c0_i32, %c0_i32_0 : i32, i32
  }
  func.func @transform_7(%arg0: i32, %arg1: i32) -> (i32, i32) {
    %c0_i32 = arith.constant 0 : i32
    %c0_i32_0 = arith.constant 0 : i32
    %c0_i32_1 = arith.constant 0 : i32
    return %c0_i32, %c0_i32_0 : i32, i32
  }
  func.func @transform_8(%arg0: i32, %arg1: i32) -> (i32, i32, i32) {
    %c0_i32 = arith.constant 0 : i32
    %c0_i32_0 = arith.constant 0 : i32
    return %arg0, %c0_i32, %arg1 : i32, i32, i32
  }
}

</mosaic_0001>

<bundles_post_ra>
// kernel: harmonic_source_filter.1
= control target key start
LH: loop header
LB: loop body
LE: loop exit
PB: predicated region body
PF: predicated region fallthrough
CT: control target
= control target key end

     0   :  { %s4318_s27 = smov 0   ;;  %s4320_s28 = smov 0   ;;  %s5404_s0 = inlined_call_operand.vmem [shape: f32[2,80,128], index: 0, kind: input, shape index: {}]   ;;  %s5405_s1 = inlined_call_operand.vmem [shape: f32[2,1,80,8], index: 1, kind: input, shape index: {}]   ;;  %s5406_s2 = inlined_call_operand.vmem [shape: bf16[128,400], index: 2, kind: input, shape index: {}]   ;;  %s5407_s3 = inlined_call_operand.vmem [shape: f32[128,1], index: 3, kind: input, shape index: {}]   ;;  %s5408_s4 = inlined_call_operand.vmem [shape: bf16[80,192], index: 4, kind: input, shape index: {}]   ;;  %s5409_s5 = inlined_call_operand.vmem [shape: f32[80,1], index: 5, kind: input, shape index: {}]   ;;  %s5410_s6 = inlined_call_operand.vmem [shape: bf16[80,320], index: 6, kind: input, shape index: {}]   ;;  %s5411_s7 = inlined_call_operand.vmem [shape: f32[80,1], index: 7, kind: input, shape index: {}]   ;;  %s5412_s8 = inlined_call_operand.vmem [shape: f32[2,80,128], index: 8, kind: output, shape index: {}]  }
   0x1   :  { %s4322_s29 = smov 0  }
   0x2 LB: > { %s30_s30 = sadd.s32 1, %s4255_s28  ;;  %p3638_p0 = scmp.ge.s32.totalorder %s4259_s29, 1  ;;  %s4259_s29 = sphi %s4322_s29, %s18_s29   ;;  %s4255_s28 = sphi %s4320_s28, %s5418_s28   ;;  %s4251_s27 = sphi %s4318_s27, %s5417_s27  }
   0x3   : > { %p32_p1 = scmp.ge.s32.totalorder %s30_s30, 2  ;;  %p297_p2 = scmp.lt.s32.totalorder %s4259_s29, 3 }
   0x5   : > { %s5420_s30 = smov (%p32_p1, %s30_s30), 0  ;;  %p298_p3 = pnand %p3638_p0, %p297_p2 }
   0x6   : > { %p346_p4 = scmp.lt.s32.totalorder (!%p298_p3), %s4251_s27, 1  ;;  %s4261_s16 = smov (!%p298_p3), 124  }
   0x7   : > { %301 = sbr.rel (%p298_p3) target bundleno = 1116 (0x45c), region = 52  ;;  %s4262_s17 = smov (!%p298_p3), 3  }
   0x8   : > { %s4263_s18 = smov (!%p298_p3), 4   ;;  %s4264_s19 = smov (!%p298_p3), 1  }
   0x9   : > { %s4265_s20 = smov (!%p298_p3), 2   ;;  %s4268_s14 = smov (!%p298_p3), 126  }
   0xc   : > { %s5422_s27 = smov (!%p346_p4, %s4251_s27), 1  ;;  %vm583_vm0 = vcmask 27648   ;;  %vm442_vm1 = vcmask 1044448   ;;  %vm665_vm2 = vcmask 1043456   ;;  %vm666_vm3 = vcmask 31748  }
   0xd   : > { %s4336_s9 = smul.u32 80, %s5422_s27  ;;  %vm4395_vm4 = vmor %vm666_vm3, %vm665_vm2  ;;  %vm780_vm5 = vcmask 23552   ;;  %vm1702_vm6 = vcmask 130048   ;;  %vm644_vm7 = vcmask 31744   ;;  %vm1062_vm8 = vcmask 7168  }
   0xe   : > { %vm921_vm9 = vcmask 15360   ;;  %vm2102_vm10 = vcmask 11264   ;;  %vm4267_vm12 = vmmov 1   ;;  %vm2865_vm14 = vcmask 523264  }
   0xf   : > { %s4342_s12 = scalar_lea.vmem %s5405_s1, %s4336_s9  ;;  %s4350_s15 = scalar_lea.vmem %s5404_s0, %s4336_s9  ;;  %vm2291_vm15 = vcmask 1031168   ;;  %vm4272_vm3 = vmmov 0  }
  0x10   : > { %v517_v0 = vld [vmem:[%s4342_s12 + $0x20] sm:$0xff]  ;;  %v518_v1 = vld [vmem:[%s4342_s12 + $0x28] sm:$0xff]  ;;  %v375_v3 = vld [vmem:[%s4342_s12 + $0x18] sm:$0xff] }
  0x11   : > { %v3881_v2 = vpack.c.bf16 %v517_v0, %v517_v0  ;;  %v3882_v4 = vpack.c.bf16 %v518_v1, %v518_v1  ;;  %v374_v5 = vld [vmem:[%s4342_s12 + $0x10] sm:$0xff]  ;;  %v457_v6 = vld [vmem:[%s4350_s15 + $0x20] sm:$0xff]  ;;  %v458_v8 = vld [vmem:[%s4350_s15 + $0x28] sm:$0xff]  ;;  %v3860_v16 = vpack.c.bf16 %v375_v3, %v375_v3 }
  0x12   : > { %v3871_v7 = vpack.c.bf16 %v457_v6, %v457_v6  ;;  %v456_v9 = vld [vmem:[%s4350_s15 + $0x18] sm:$0xff]  ;;  %v455_v10 = vld [vmem:[%s4350_s15 + $0x10] sm:$0xff]  ;;  %v3872_v11 = vpack.c.bf16 %v458_v8, %v458_v8  ;;  %v453_v14 = vld [vmem:[%s4350_s15] sm:$0xff]  ;;  %v3859_v17 = vpack.c.bf16 %v374_v5, %v374_v5 }
  0x13   : > { %561 = vrot.lane.b32.xlu1 %v3881_v2, %s4261_s16  ;;  %420 = vrot.lane.b32.xlu0 %v3881_v2, %s4261_s16  ;;  %v3870_v12 = vpack.c.bf16 %v456_v9, %v456_v9  ;;  %v3869_v13 = vpack.c.bf16 %v455_v10, %v455_v10  ;;  %v3867_v15 = vpack.c.bf16 %v453_v14, %v453_v14  ;;  %v454_v18 = vld [vmem:[%s4350_s15 + $0x8] sm:$0xff]  ;;  %v372_v21 = vld [vmem:[%s4342_s12] sm:$0xff] }
  0x14   : > { %507 = vst [vmem:[#allocation2 + $0x34] sm:$0xf] %v3871_v7  ;;  %508 = vst [vmem:[#allocation2 + $0x40] sm:$0xf] %v3872_v11  ;;  %v3868_v19 = vpack.c.bf16 %v454_v18, %v454_v18  ;;  %v373_v20 = vld [vmem:[%s4342_s12 + $0x8] sm:$0xff]  ;;  %v461_v22 = vld [vmem:[%s4350_s15 + $0x40] sm:$0xff]  ;;  %v3857_v25 = vpack.c.bf16 %v372_v21, %v372_v21 }
  0x15   : > { %506 = vst [vmem:[#allocation2 + $0x28] sm:$0xf] %v3870_v12  ;;  %505 = vst [vmem:[#allocation2 + $0x1c] sm:$0xf] %v3869_v13  ;;  %v3875_v23 = vpack.c.bf16 %v461_v22, %v461_v22  ;;  %v3858_v24 = vpack.c.bf16 %v373_v20, %v373_v20  ;;  %v462_v26 = vld [vmem:[%s4350_s15 + $0x48] sm:$0xff]  ;;  %v459_v27 = vld [vmem:[%s4350_s15 + $0x30] sm:$0xff] }
  0x16   : > { %503 = vst [vmem:[#allocation2 + $0x4] sm:$0xf] %v3867_v15  ;;  %504 = vst [vmem:[#allocation2 + $0x10] sm:$0xf] %v3868_v19  ;;  %v3876_v28 = vpack.c.bf16 %v462_v26, %v462_v26  ;;  %v3873_v29 = vpack.c.bf16 %v459_v27, %v459_v27  ;;  %v381_v30 = vld [vmem:[%s4342_s12 + $0x48] sm:$0xff]  ;;  %v380_v31 = vld [vmem:[%s4342_s12 + $0x40] sm:$0xff] }
  0x17   : > { %563 = vrot.lane.b32.xlu1 %v3882_v4, %s4261_s16  ;;  %422 = vrot.lane.b32.xlu0 %v3882_v4, %s4261_s16  ;;  %511 = vst [vmem:[#allocation2 + $0x64] sm:$0xf] %v3875_v23  ;;  %v460_v32 = vld [vmem:[%s4350_s15 + $0x38] sm:$0xff]  ;;  %v3866_v34 = vpack.c.bf16 %v381_v30, %v381_v30  ;;  %v3865_v35 = vpack.c.bf16 %v380_v31, %v380_v31  ;;  %v378_v37 = vld [vmem:[%s4342_s12 + $0x30] sm:$0xff]  ;;  %s4269_s15 = smov 127  }
  0x18   : > { %512 = vst [vmem:[#allocation2 + $0x70] sm:$0xf] %v3876_v28  ;;  %509 = vst [vmem:[#allocation2 + $0x4c] sm:$0xf] %v3873_v29  ;;  %v3874_v33 = vpack.c.bf16 %v460_v32, %v460_v32  ;;  %v379_v36 = vld [vmem:[%s4342_s12 + $0x38] sm:$0xff]  ;;  %v3863_v39 = vpack.c.bf16 %v378_v37, %v378_v37 }
  0x19   : > { %v3864_v38 = vpack.c.bf16 %v379_v36, %v379_v36 }
  0x1a   : > { %510 = vst [vmem:[#allocation2 + $0x58] sm:$0xf] %v3874_v33 }
  0x1b   : > { %418 = vrot.lane.b32.xlu1 %v3860_v16, %s4261_s16  ;;  %416 = vrot.lane.b32.xlu0 %v3859_v17, %s4261_s16 }
  0x1f   : > { %559 = vrot.lane.b32.xlu1 %v3860_v16, %s4261_s16  ;;  %557 = vrot.lane.b32.xlu0 %v3859_v17, %s4261_s16 }
  0x23   : > { %414 = vrot.lane.b32.xlu1 %v3858_v24, %s4261_s16  ;;  %412 = vrot.lane.b32.xlu0 %v3857_v25, %s4261_s16 }
  0x27   : > { %555 = vrot.lane.b32.xlu1 %v3858_v24, %s4261_s16  ;;  %553 = vrot.lane.b32.xlu0 %v3857_v25, %s4261_s16 }
  0x2b   : > { %430 = vrot.lane.b32.xlu1 %v3866_v34, %s4261_s16  ;;  %428 = vrot.lane.b32.xlu0 %v3865_v35, %s4261_s16 }
  0x2f   : > { %426 = vrot.lane.b32.xlu1 %v3864_v38, %s4261_s16  ;;  %424 = vrot.lane.b32.xlu0 %v3863_v39, %s4261_s16 }
  0x33   : > { %571 = vrot.lane.b32.xlu1 %v3866_v34, %s4261_s16  ;;  %569 = vrot.lane.b32.xlu0 %v3865_v35, %s4261_s16 }
  0x37   : > { %567 = vrot.lane.b32.xlu1 %v3864_v38, %s4261_s16  ;;  %565 = vrot.lane.b32.xlu0 %v3863_v39, %s4261_s16 }
  0x85   : > { %v562_v40 = vpop.permute.xlu1 %561  ;;  %v421_v41 = vpop.permute.xlu0 %420 }
  0x86   : > { %588 = vst.msk [vmem:[#allocation2 + $0x38] sm:$0xf] %vm583_vm0, %v562_v40 }
  0x87   : > { %447 = vst.msk [vmem:[#allocation2 + $0x30] sm:$0xf] %vm442_vm1, %v421_v41 }
  0x89   : > { %v564_v42 = vpop.permute.xlu1 %563  ;;  %v423_v43 = vpop.permute.xlu0 %422 }
  0x8a   : > { %589 = vst.msk [vmem:[#allocation2 + $0x44] sm:$0xf] %vm583_vm0, %v564_v42 }
  0x8b   : > { %448 = vst.msk [vmem:[#allocation2 + $0x3c] sm:$0xf] %vm442_vm1, %v423_v43 }
  0x8d   : > { %v1106_v45 = vld [vmem:[#allocation2 + $0x34] sm:$0xff]  ;;  %v419_v46 = vpop.permute.xlu1 %418  ;;  %v417_v47 = vpop.permute.xlu0 %416 }
  0x8e   : > { %v687_v48 = vld [vmem:[#allocation2 + $0x38] sm:$0xf]  ;;  %v4399_v49 = vld [vmem:[#allocation2 + $0x30] sm:$0xff]  ;;  %1116 = vst.msk [vmem:[#allocation3 + $0x160] sm:$0xff] %vm4395_vm4, %v1106_v45 }
  0x8f   : > { %446 = vst.msk [vmem:[#allocation2 + $0x24] sm:$0xf] %vm442_vm1, %v419_v46  ;;  %445 = vst.msk [vmem:[#allocation2 + $0x18] sm:$0xf] %vm442_vm1, %v417_v47  ;;  %736 = vrot.lane.b32.xlu1 %v687_v48, %s4262_s17  ;;  %734 = vrot.lane.b32.xlu0 %v4399_v49, %s4262_s17  ;;  %v829_v37 = vld [vmem:[#allocation2 + $0x38] sm:$0xf] }
  0x90   : > { %v970_v48 = vld [vmem:[#allocation2 + $0x38] sm:$0xf] }
  0x91   : > { %v1107_v50 = vld [vmem:[#allocation2 + $0x40] sm:$0xff]  ;;  %v560_v51 = vpop.permute.xlu1 %559  ;;  %v558_v52 = vpop.permute.xlu0 %557 }
  0x92   : > { %v689_v53 = vld [vmem:[#allocation2 + $0x44] sm:$0xf]  ;;  %v4408_v54 = vld [vmem:[#allocation2 + $0x3c] sm:$0xff]  ;;  %1117 = vst.msk [vmem:[#allocation3 + $0x168] sm:$0xff] %vm4395_vm4, %v1107_v50 }
  0x93   : > { %587 = vst.msk [vmem:[#allocation2 + $0x2c] sm:$0xf] %vm583_vm0, %v560_v51  ;;  %586 = vst.msk [vmem:[#allocation2 + $0x20] sm:$0xf] %vm583_vm0, %v558_v52  ;;  %740 = vrot.lane.b32.xlu1 %v689_v53, %s4262_s17  ;;  %738 = vrot.lane.b32.xlu0 %v4408_v54, %s4262_s17  ;;  %v831_v38 = vld [vmem:[#allocation2 + $0x44] sm:$0xf] }
  0x95   : > { %v415_v55 = vpop.permute.xlu1 %414  ;;  %v413_v56 = vpop.permute.xlu0 %412 }
  0x96   : > { %v4417_v57 = vld [vmem:[#allocation2 + $0x18] sm:$0xff]  ;;  %444 = vst.msk [vmem:[#allocation2 + $0xc] sm:$0xf] %vm442_vm1, %v415_v55  ;;  %443 = vst.msk [vmem:[#allocation2] sm:$0xf] %vm442_vm1, %v413_v56  ;;  %v4423_v58 = vld [vmem:[#allocation2 + $0x24] sm:$0xff] }
  0x97   : > { %726 = vrot.lane.b32.xlu0 %v4417_v57, %s4262_s17  ;;  %v972_v55 = vld [vmem:[#allocation2 + $0x44] sm:$0xf] }
  0x99   : > { %v556_v61 = vpop.permute.xlu1 %555  ;;  %v554_v62 = vpop.permute.xlu0 %553  ;;  %v4028_v25 = vld [vmem:[#allocation3 + $0x164] ss:$8 sps:$4 sm:$0xff]   ;;  %v4030_v27 = vld [vmem:[#allocation3 + $0x160] ss:$8 sps:$4 sm:$0xff]  }
  0x9a   : > { %v1105_v59 = vld [vmem:[#allocation2 + $0x28] sm:$0xff]  ;;  %v1104_v60 = vld [vmem:[#allocation2 + $0x1c] sm:$0xff]  ;;  %585 = vst.msk [vmem:[#allocation2 + $0x14] sm:$0xf] %vm583_vm0, %v556_v61  ;;  %584 = vst.msk [vmem:[#allocation2 + $0x8] sm:$0xf] %vm583_vm0, %v554_v62 }
  0x9b   : > { %v683_v63 = vld [vmem:[#allocation2 + $0x20] sm:$0xf]  ;;  %1115 = vst.msk [vmem:[#allocation3 + $0x158] sm:$0xff] %vm4395_vm4, %v1105_v59  ;;  %1114 = vst.msk [vmem:[#allocation3 + $0x150] sm:$0xff] %vm4395_vm4, %v1104_v60  ;;  %730 = vrot.lane.b32.xlu0 %v4423_v58, %s4262_s17  ;;  %v685_v0 = vld [vmem:[#allocation2 + $0x2c] sm:$0xf] }
  0x9c   : > { %728 = vrot.lane.b32.xlu1 %v683_v63, %s4262_s17  ;;  %v825_v41 = vld [vmem:[#allocation2 + $0x20] sm:$0xf]  ;;  %v827_v42 = vld [vmem:[#allocation2 + $0x2c] sm:$0xf] }
  0x9d   : > { %v431_v1 = vpop.permute.xlu1 %430  ;;  %v429_v2 = vpop.permute.xlu0 %428  ;;  %v4434_v3 = vld [vmem:[#allocation2] sm:$0xff]  ;;  %v4441_v4 = vld [vmem:[#allocation2 + $0xc] sm:$0xff] }
  0x9e   : > { %452 = vst.msk [vmem:[#allocation2 + $0x6c] sm:$0xf] %vm442_vm1, %v431_v1  ;;  %451 = vst.msk [vmem:[#allocation2 + $0x60] sm:$0xf] %vm442_vm1, %v429_v2 }
  0x9f   : > { %718 = vrot.lane.b32.xlu0 %v4434_v3, %s4262_s17 }
  0xa0   : > { %732 = vrot.lane.b32.xlu1 %v685_v0, %s4262_s17 }
  0xa1   : > { %v1103_v5 = vld [vmem:[#allocation2 + $0x10] sm:$0xff]  ;;  %v1102_v6 = vld [vmem:[#allocation2 + $0x4] sm:$0xff]  ;;  %v427_v7 = vpop.permute.xlu1 %426  ;;  %v425_v8 = vpop.permute.xlu0 %424 }
  0xa2   : > { %v679_v9 = vld [vmem:[#allocation2 + $0x8] sm:$0xf]  ;;  %1113 = vst.msk [vmem:[#allocation3 + $0x148] sm:$0xff] %vm4395_vm4, %v1103_v5  ;;  %1112 = vst.msk [vmem:[#allocation3 + $0x140] sm:$0xff] %vm4395_vm4, %v1102_v6  ;;  %v681_v10 = vld [vmem:[#allocation2 + $0x14] sm:$0xf] }
  0xa3   : > { %450 = vst.msk [vmem:[#allocation2 + $0x54] sm:$0xf] %vm442_vm1, %v427_v7  ;;  %449 = vst.msk [vmem:[#allocation2 + $0x48] sm:$0xf] %vm442_vm1, %v425_v8  ;;  %722 = vrot.lane.b32.xlu0 %v4441_v4, %s4262_s17  ;;  %v962_v26 = vld [vmem:[#allocation2 + $0x8] sm:$0xf] }
  0xa4   : > { %720 = vrot.lane.b32.xlu1 %v679_v9, %s4262_s17  ;;  %v4031_v28 = vld [vmem:[#allocation3 + $0x154] ss:$8 sps:$4 sm:$0xff]   ;;  %v4033_v30 = vld [vmem:[#allocation3 + $0x150] ss:$8 sps:$4 sm:$0xff]   ;;  %v966_v7 = vld [vmem:[#allocation2 + $0x20] sm:$0xf] }
  0xa5   : > { %v572_v11 = vpop.permute.xlu1 %571  ;;  %v570_v12 = vpop.permute.xlu0 %569  ;;  %v4452_v13 = vld [vmem:[#allocation2 + $0x60] sm:$0xff]  ;;  %v4458_v14 = vld [vmem:[#allocation2 + $0x6c] sm:$0xff]  ;;  %v964_v29 = vld [vmem:[#allocation2 + $0x14] sm:$0xf]  ;;  %vm2356_vm1 = vcmask 1022976  }
  0xa6   : > { %593 = vst.msk [vmem:[#allocation2 + $0x74] sm:$0xf] %vm583_vm0, %v572_v11  ;;  %592 = vst.msk [vmem:[#allocation2 + $0x68] sm:$0xf] %vm583_vm0, %v570_v12  ;;  %v821_v46 = vld [vmem:[#allocation2 + $0x8] sm:$0xf] }
  0xa7   : > { %630 = vrot.lane.b32.xlu0 %v4452_v13, %s4263_s18  ;;  %v823_v47 = vld [vmem:[#allocation2 + $0x14] sm:$0xf] }
  0xa8   : > { %724 = vrot.lane.b32.xlu1 %v681_v10, %s4262_s17 }
  0xa9   : > { %v568_v15 = vpop.permute.xlu1 %567  ;;  %v566_v16 = vpop.permute.xlu0 %565  ;;  %v4034_v32 = vld [vmem:[#allocation3 + $0x144] ss:$8 sps:$4 sm:$0xff]   ;;  %v4036_v33 = vld [vmem:[#allocation3 + $0x140] ss:$8 sps:$4 sm:$0xff]  }
  0xaa   : > { %v4460_v17 = vld [vmem:[#allocation2 + $0x48] sm:$0xff]  ;;  %591 = vst.msk [vmem:[#allocation2 + $0x5c] sm:$0xf] %vm583_vm0, %v568_v15  ;;  %590 = vst.msk [vmem:[#allocation2 + $0x50] sm:$0xf] %vm583_vm0, %v566_v16  ;;  %v4466_v18 = vld [vmem:[#allocation2 + $0x54] sm:$0xff] }
  0xab   : > { %626 = vrot.lane.b32.xlu0 %v4460_v17, %s4263_s18  ;;  %v968_v16 = vld [vmem:[#allocation2 + $0x2c] sm:$0xf]  ;;  %vm2226_vm0 = vcmask 1039360  }
  0xac   : > { %632 = vrot.lane.b32.xlu1 %v4458_v14, %s4263_s18 }
  0xad   : > { %v1111_v19 = vld [vmem:[#allocation2 + $0x70] sm:$0xff]  ;;  %v1110_v20 = vld [vmem:[#allocation2 + $0x64] sm:$0xff] }
  0xae   : > { %1121 = vst.msk [vmem:[#allocation3 + $0x188] sm:$0xff] %vm4395_vm4, %v1111_v19  ;;  %1120 = vst.msk [vmem:[#allocation3 + $0x180] sm:$0xff] %vm4395_vm4, %v1110_v20  ;;  %v837_v31 = vld [vmem:[#allocation2 + $0x68] sm:$0xf]  ;;  %v839_v34 = vld [vmem:[#allocation2 + $0x74] sm:$0xf] }
  0xaf   : > { %622 = vrot.lane.b32.xlu0 %v4399_v49, %s4263_s18  ;;  %v978_v39 = vld [vmem:[#allocation2 + $0x68] sm:$0xf]  ;;  %v980_v40 = vld [vmem:[#allocation2 + $0x74] sm:$0xf] }
  0xb0   : > { %628 = vrot.lane.b32.xlu1 %v4466_v18, %s4263_s18  ;;  %v695_v62 = vld [vmem:[#allocation2 + $0x68] sm:$0xf]  ;;  %v697_v2 = vld [vmem:[#allocation2 + $0x74] sm:$0xf] }
  0xb1   : > { %v1109_v21 = vld [vmem:[#allocation2 + $0x58] sm:$0xff]  ;;  %v1108_v22 = vld [vmem:[#allocation2 + $0x4c] sm:$0xff] }
  0xb2   : > { %1119 = vst.msk [vmem:[#allocation3 + $0x178] sm:$0xff] %vm4395_vm4, %v1109_v21  ;;  %1118 = vst.msk [vmem:[#allocation3 + $0x170] sm:$0xff] %vm4395_vm4, %v1108_v22  ;;  %v833_v35 = vld [vmem:[#allocation2 + $0x50] sm:$0xf]  ;;  %v835_v36 = vld [vmem:[#allocation2 + $0x5c] sm:$0xf] }
  0xb3   : > { %618 = vrot.lane.b32.xlu0 %v4417_v57, %s4263_s18  ;;  %v974_v43 = vld [vmem:[#allocation2 + $0x50] sm:$0xf]  ;;  %v976_v45 = vld [vmem:[#allocation2 + $0x5c] sm:$0xf] }
  0xb4   : > { %624 = vrot.lane.b32.xlu1 %v4408_v54, %s4263_s18 }
  0xb7   : > { %614 = vrot.lane.b32.xlu0 %v4434_v3, %s4263_s18 }
  0xb8   : > { %620 = vrot.lane.b32.xlu1 %v4423_v58, %s4263_s18 }
  0xb9   : > { %v4025_v23 = vld [vmem:[#allocation3 + $0x174] ss:$8 sps:$4 sm:$0xff]   ;;  %v4027_v24 = vld [vmem:[#allocation3 + $0x170] ss:$8 sps:$4 sm:$0xff]  }
  0xba   : > { %1840 = vmatprep.subr.bf16.mxu1 %v4025_v23 }
  0xbb   : > { %1001 = vrot.lane.b32.xlu0 %v4434_v3, %s4264_s19  ;;  %1841 = vmatpush1.bf16.msra.mxu1 %v4027_v24 }
  0xbc   : > { %616 = vrot.lane.b32.xlu1 %v4441_v4, %s4263_s18  ;;  %1842 = vmatprep.subr.bf16.mxu1 %v4028_v25  ;;  %v691_v25 = vld [vmem:[#allocation2 + $0x50] sm:$0xf] }
  0xbf   : > { %1005 = vrot.lane.b32.xlu0 %v4441_v4, %s4264_s19  ;;  %1843 = vmatpush1.bf16.msra.mxu1 %v4030_v27 }
  0xc0   : > { %1003 = vrot.lane.b32.xlu1 %v962_v26, %s4264_s19  ;;  %1844 = vmatprep.subr.bf16.mxu1 %v4031_v28  ;;  %v4081_v26 = vld [vmem:[%s5406_s2 + $0xc] ss:$16 sps:$4 sm:$0xff]  }
  0xc1   : > { %3754 = vmatprep.mubr.msk.bf16.mxu1 %vm1702_vm6, %v4081_v26 }
  0xc3   : > { %892 = vrot.lane.b32.xlu0 %v4452_v13, %s4265_s20  ;;  %1845 = vmatpush1.bf16.msra.mxu1 %v4033_v30 }
  0xc4   : > { %1007 = vrot.lane.b32.xlu1 %v964_v29, %s4264_s19  ;;  %1846 = vmatprep.subr.bf16.mxu1 %v4034_v32 }
  0xc7   : > { %896 = vrot.lane.b32.xlu0 %v4458_v14, %s4265_s20  ;;  %1847 = vmatpush1.bf16.msra.mxu1 %v4036_v33  ;;  %v693_v33 = vld [vmem:[#allocation2 + $0x5c] sm:$0xf] }
  0xc8   : > { %894 = vrot.lane.b32.xlu1 %v837_v31, %s4265_s20 }
  0xcb   : > { %884 = vrot.lane.b32.xlu0 %v4460_v17, %s4265_s20 }
  0xcc   : > { %898 = vrot.lane.b32.xlu1 %v839_v34, %s4265_s20 }
  0xcf   : > { %888 = vrot.lane.b32.xlu0 %v4466_v18, %s4265_s20 }
  0xd0   : > { %886 = vrot.lane.b32.xlu1 %v833_v35, %s4265_s20  ;;  %v4087_v35 = vld [vmem:[%s5406_s2 + $0x4] ss:$16 sps:$4 sm:$0xff]  }
  0xd1   : > { %1759 = vmatprep.mubr.bf16.mxu0 %v4087_v35 }
  0xd3   : > { %876 = vrot.lane.b32.xlu0 %v4399_v49, %s4265_s20 }
  0xd4   : > { %890 = vrot.lane.b32.xlu1 %v835_v36, %s4265_s20 }
  0xd7   : > { %880 = vrot.lane.b32.xlu0 %v4408_v54, %s4265_s20 }
  0xd8   : > { %878 = vrot.lane.b32.xlu1 %v829_v37, %s4265_s20 }
  0xdb   : > { %1033 = vrot.lane.b32.xlu0 %v4452_v13, %s4264_s19 }
  0xdc   : > { %882 = vrot.lane.b32.xlu1 %v831_v38, %s4265_s20 }
  0xdf   : > { %1037 = vrot.lane.b32.xlu0 %v4458_v14, %s4264_s19 }
  0xe0   : > { %1035 = vrot.lane.b32.xlu1 %v978_v39, %s4264_s19 }
  0xe3   : > { %868 = vrot.lane.b32.xlu0 %v4417_v57, %s4265_s20 }
  0xe4   : > { %1039 = vrot.lane.b32.xlu1 %v980_v40, %s4264_s19 }
  0xe7   : > { %872 = vrot.lane.b32.xlu0 %v4423_v58, %s4265_s20 }
  0xe8   : > { %870 = vrot.lane.b32.xlu1 %v825_v41, %s4265_s20 }
  0xeb   : > { %1025 = vrot.lane.b32.xlu0 %v4460_v17, %s4264_s19 }
  0xec   : > { %874 = vrot.lane.b32.xlu1 %v827_v42, %s4265_s20 }
  0xef   : > { %1029 = vrot.lane.b32.xlu0 %v4466_v18, %s4264_s19 }
  0xf0   : > { %1027 = vrot.lane.b32.xlu1 %v974_v43, %s4264_s19 }
  0xf3   : > { %860 = vrot.lane.b32.xlu0 %v4434_v3, %s4265_s20 }
  0xf4   : > { %1031 = vrot.lane.b32.xlu1 %v976_v45, %s4264_s19 }
  0xf7   : > { %864 = vrot.lane.b32.xlu0 %v4441_v4, %s4265_s20 }
  0xf8   : > { %862 = vrot.lane.b32.xlu1 %v821_v46, %s4265_s20 }
  0xfb   : > { %1017 = vrot.lane.b32.xlu0 %v4399_v49, %s4264_s19 }
  0xfc   : > { %866 = vrot.lane.b32.xlu1 %v823_v47, %s4265_s20  ;;  %s5374_s20 = scalar_lea.vmem %s5412_s8, %s4336_s9 }
  0xff   : > { %1021 = vrot.lane.b32.xlu0 %v4408_v54, %s4264_s19 }
 0x100   : > { %1019 = vrot.lane.b32.xlu1 %v970_v48, %s4264_s19 }
 0x101   : > { %v737_v50 = vpop.permute.xlu1 %736  ;;  %v735_v51 = vpop.permute.xlu0 %734 }
 0x102   : > { %v767_v52 = vrot.slane %v737_v50, 4  ;;  %v766_v53 = vrot.slane %v735_v51, 4 }
 0x103   : > { %750 = vrot.lane.b32.xlu0 %v4452_v13, %s4262_s17 }
 0x104   : > { %1023 = vrot.lane.b32.xlu1 %v972_v55, %s4264_s19  ;;  %v788_v56 = vsel %vm665_vm2, %v766_v53, %v767_v52 }
 0x105   : > { %v789_v49 = vsel %vm780_vm5, %v735_v51, %v788_v56  ;;  %v741_v59 = vpop.permute.xlu1 %740  ;;  %v739_v60 = vpop.permute.xlu0 %738 }
 0x106   : > { %814 = vst.msk [vmem:[#allocation3 + $0x70] sm:$0xff] %vm4395_vm4, %v789_v49  ;;  %v769_v54 = vrot.slane %v741_v59, 4  ;;  %v768_v61 = vrot.slane %v739_v60, 4 }
 0x107   : > { %754 = vrot.lane.b32.xlu0 %v4458_v14, %s4262_s17 }
 0x108   : > { %752 = vrot.lane.b32.xlu1 %v695_v62, %s4262_s17  ;;  %v790_v63 = vsel %vm665_vm2, %v768_v61, %v769_v54 }
 0x109   : > { %v791_v0 = vsel %vm780_vm5, %v739_v60, %v790_v63  ;;  %v727_v1 = vpop.permute.xlu0 %726 }
 0x10a   : > { %815 = vst.msk [vmem:[#allocation3 + $0x78] sm:$0xff] %vm4395_vm4, %v791_v0  ;;  %v762_v5 = vrot.slane %v727_v1, 4 }
 0x10b   : > { %1009 = vrot.lane.b32.xlu0 %v4417_v57, %s4264_s19 }
 0x10c   : > { %756 = vrot.lane.b32.xlu1 %v697_v2, %s4262_s17 }
 0x10d   : > { %v731_v4 = vpop.permute.xlu0 %730  ;;  %v1168_v12 = vld [vmem:[#allocation3 + $0x70] sm:$0xff] }
 0x10e   : > { %v729_v3 = vpop.permute.xlu1 %728  ;;  %v764_v57 = vrot.slane %v731_v4, 4 }
 0x10f   : > { %v763_v6 = vrot.slane %v729_v3, 4  ;;  %1013 = vrot.lane.b32.xlu0 %v4423_v58, %s4264_s19 }
 0x110   : > { %1011 = vrot.lane.b32.xlu1 %v966_v7, %s4264_s19 }
 0x111   : > { %v784_v8 = vsel %vm665_vm2, %v762_v5, %v763_v6  ;;  %v719_v11 = vpop.permute.xlu0 %718  ;;  %v1169_v13 = vld [vmem:[#allocation3 + $0x78] sm:$0xff] }
 0x112   : > { %v785_v9 = vsel %vm780_vm5, %v727_v1, %v784_v8  ;;  %v733_v10 = vpop.permute.xlu1 %732  ;;  %v4037_v14 = vld [vmem:[#allocation3 + $0x74] ss:$8 sps:$4 sm:$0xff]   ;;  %v3718_v19 = vcombine.low %v1168_v12, %v1169_v13  ;;  %v758_v23 = vrot.slane %v719_v11, 4 }
 0x113   : > { %812 = vst.msk [vmem:[#allocation3 + $0x60] sm:$0xff] %vm4395_vm4, %v785_v9  ;;  %v765_v15 = vrot.slane %v733_v10, 4  ;;  %742 = vrot.lane.b32.xlu0 %v4460_v17, %s4262_s17  ;;  %1727 = vmatprep.subr.bf16.mxu0 %v4037_v14 }
 0x114   : > { %1015 = vrot.lane.b32.xlu1 %v968_v16, %s4264_s19  ;;  %1728 = vmatpush1.bf16.msra.mxu0 %v3718_v19 }
 0x115   : > { %v786_v58 = vsel %vm665_vm2, %v764_v57, %v765_v15  ;;  %v723_v22 = vpop.permute.xlu0 %722 }
 0x116   : > { %v787_v20 = vsel %vm780_vm5, %v731_v4, %v786_v58  ;;  %v721_v21 = vpop.permute.xlu1 %720  ;;  %v760_v30 = vrot.slane %v723_v22, 4 }
 0x117   : > { %813 = vst.msk [vmem:[#allocation3 + $0x68] sm:$0xff] %vm4395_vm4, %v787_v20  ;;  %v759_v24 = vrot.slane %v721_v21, 4  ;;  %746 = vrot.lane.b32.xlu0 %v4466_v18, %s4262_s17 }
 0x118   : > { %744 = vrot.lane.b32.xlu1 %v691_v25, %s4262_s17 }
 0x119   : > { %v779_v17 = vsel %vm665_vm2, %v758_v23, %v759_v24  ;;  %v631_v29 = vpop.permute.xlu0 %630 }
 0x11a   : > { %v781_v27 = vsel %vm780_vm5, %v719_v11, %v779_v17  ;;  %v725_v28 = vpop.permute.xlu1 %724  ;;  %v642_v32 = vrot.slane %v631_v29, 4  ;;  %v1166_v39 = vld [vmem:[#allocation3 + $0x60] sm:$0xff] }
 0x11b   : > { %810 = vst.msk [vmem:[#allocation3 + $0x50] sm:$0xff] %vm4395_vm4, %v781_v27  ;;  %v761_v31 = vrot.slane %v725_v28, 4 }
 0x11c   : > { %748 = vrot.lane.b32.xlu1 %v693_v33, %s4262_s17  ;;  %v653_v34 = vsel %vm644_vm7, %v631_v29, %v642_v32  ;;  %s4270_s17 = smov 125  }
 0x11d   : > { %v782_v18 = vsel %vm665_vm2, %v760_v30, %v761_v31  ;;  %676 = vst.msk [vmem:[#allocation3 + $0x40] sm:$0xff] %vm4395_vm4, %v653_v34  ;;  %v627_v38 = vpop.permute.xlu0 %626 }
 0x11e   : > { %v783_v36 = vsel %vm780_vm5, %v723_v22, %v782_v18  ;;  %v633_v37 = vpop.permute.xlu1 %632  ;;  %v1167_v40 = vld [vmem:[#allocation3 + $0x68] sm:$0xff]  ;;  %v640_v43 = vrot.slane %v627_v38, 4 }
 0x11f   : > { %v4039_v41 = vld [vmem:[#allocation3 + $0x64] ss:$8 sps:$4 sm:$0xff]   ;;  %811 = vst.msk [vmem:[#allocation3 + $0x58] sm:$0xff] %vm4395_vm4, %v783_v36  ;;  %v643_v42 = vrot.slane %v633_v37, 4  ;;  %v3716_v45 = vcombine.low %v1166_v39, %v1167_v40 }
 0x120   : > { %1729 = vmatprep.subr.bf16.mxu0 %v4039_v41  ;;  %v651_v47 = vsel %vm644_vm7, %v627_v38, %v640_v43 }
 0x121   : > { %v654_v46 = vsel %vm644_vm7, %v633_v37, %v643_v42  ;;  %1730 = vmatpush1.bf16.msra.mxu0 %v3716_v45  ;;  %674 = vst.msk [vmem:[#allocation3 + $0x30] sm:$0xff] %vm4395_vm4, %v651_v47  ;;  %v623_v50 = vpop.permute.xlu0 %622 }
 0x122   : > { %677 = vst.msk [vmem:[#allocation3 + $0x48] sm:$0xff] %vm4395_vm4, %v654_v46  ;;  %v629_v48 = vpop.permute.xlu1 %628  ;;  %v638_v52 = vrot.slane %v623_v50, 4  ;;  %v1164_v59 = vld [vmem:[#allocation3 + $0x50] sm:$0xff] }
 0x123   : > { %v641_v51 = vrot.slane %v629_v48, 4 }
 0x124   : > { %v649_v55 = vsel %vm644_vm7, %v623_v50, %v638_v52  ;;  %v1162_v2 = vld [vmem:[#allocation3 + $0x40] sm:$0xff] }
 0x125   : > { %v652_v53 = vsel %vm644_vm7, %v629_v48, %v641_v51  ;;  %672 = vst.msk [vmem:[#allocation3 + $0x20] sm:$0xff] %vm4395_vm4, %v649_v55  ;;  %v619_v49 = vpop.permute.xlu0 %618  ;;  %v1211_v55 = vld [vmem:[%s5407_s3 + $0x38] sm:$0xff] }
 0x126   : > { %675 = vst.msk [vmem:[#allocation3 + $0x38] sm:$0xff] %vm4395_vm4, %v652_v53  ;;  %v625_v56 = vpop.permute.xlu1 %624  ;;  %v1165_v60 = vld [vmem:[#allocation3 + $0x58] sm:$0xff]  ;;  %v636_v62 = vrot.slane %v619_v49, 4 }
 0x127   : > { %v4041_v54 = vld [vmem:[#allocation3 + $0x54] ss:$8 sps:$4 sm:$0xff]   ;;  %v639_v61 = vrot.slane %v625_v56, 4  ;;  %v3714_v63 = vcombine.low %v1164_v59, %v1165_v60 }
 0x128   : > { %1731 = vmatprep.subr.bf16.mxu0 %v4041_v54  ;;  %v647_v1 = vsel %vm644_vm7, %v619_v49, %v636_v62  ;;  %v1160_v12 = vld [vmem:[#allocation3 + $0x30] sm:$0xff]  ;;  %v4266_v49 = vmov 0   ;;  %v1210_v59 = vld [vmem:[%s5407_s3 + $0x30] sm:$0xff] }
 0x129   : > { %v650_v0 = vsel %vm644_vm7, %v625_v56, %v639_v61  ;;  %1732 = vmatpush1.bf16.msra.mxu0 %v3714_v63  ;;  %v1163_v3 = vld [vmem:[#allocation3 + $0x48] sm:$0xff]  ;;  %670 = vst.msk [vmem:[#allocation3 + $0x10] sm:$0xff] %vm4395_vm4, %v647_v1  ;;  %v615_v6 = vpop.permute.xlu0 %614  ;;  %4024 = vset.pattern.permute.xlu1 %v4266_v49 }
 0x12a   : > { %v4043_v4 = vld [vmem:[#allocation3 + $0x44] ss:$8 sps:$4 sm:$0xff]   ;;  %673 = vst.msk [vmem:[#allocation3 + $0x28] sm:$0xff] %vm4395_vm4, %v650_v0  ;;  %v621_v5 = vpop.permute.xlu1 %620  ;;  %v3712_v7 = vcombine.low %v1162_v2, %v1163_v3  ;;  %v634_v9 = vrot.slane %v615_v6, 4  ;;  %4023 = vset.pattern.permute.xlu0 %v4266_v49  ;;  %1257 = vperm.xlu1 %4024, %v1211_v55  }
 0x12b   : > { %v637_v8 = vrot.slane %v621_v5, 4  ;;  %1733 = vmatprep.subr.bf16.mxu0 %v4043_v4  ;;  %1252 = vperm.xlu0 %4023, %v1210_v59   ;;  %v1208_v4 = vld [vmem:[%s5407_s3 + $0x20] sm:$0xff]  ;;  %v1215_v55 = vld [vmem:[%s5407_s3 + $0x58] sm:$0xff] }
 0x12c   : > { %v645_v11 = vsel %vm644_vm7, %v615_v6, %v634_v9  ;;  %v1158_v20 = vld [vmem:[#allocation3 + $0x20] sm:$0xff] }
 0x12d   : > { %v648_v10 = vsel %vm644_vm7, %v621_v5, %v637_v8  ;;  %1734 = vmatpush1.bf16.msra.mxu0 %v3712_v7  ;;  %v1161_v13 = vld [vmem:[#allocation3 + $0x38] sm:$0xff]  ;;  %668 = vst.msk [vmem:[#allocation3] sm:$0xff] %vm4395_vm4, %v645_v11  ;;  %v1002_v15 = vpop.permute.xlu0 %1001  ;;  %v1209_v5 = vld [vmem:[%s5407_s3 + $0x28] sm:$0xff] }
 0x12e   : > { %v4045_v14 = vld [vmem:[#allocation3 + $0x34] ss:$8 sps:$4 sm:$0xff]   ;;  %671 = vst.msk [vmem:[#allocation3 + $0x18] sm:$0xff] %vm4395_vm4, %v648_v10  ;;  %v617_v57 = vpop.permute.xlu1 %616  ;;  %v3710_v16 = vcombine.low %v1160_v12, %v1161_v13  ;;  %v1041_v17 = vrot.slane %v1002_v15, 4  ;;  %1242 = vperm.xlu1 %4024, %v1208_v4  }
 0x12f   : > { %v635_v19 = vrot.slane %v617_v57, 4  ;;  %1735 = vmatprep.subr.bf16.mxu0 %v4045_v14  ;;  %1247 = vperm.xlu0 %4023, %v1209_v5   ;;  %v1206_v12 = vld [vmem:[%s5407_s3 + $0x10] sm:$0xff]  ;;  %v1207_v14 = vld [vmem:[%s5407_s3 + $0x18] sm:$0xff] }
 0x130   : > { %v1156_v28 = vld [vmem:[#allocation3 + $0x10] sm:$0xff] }
 0x131   : > { %v646_v58 = vsel %vm644_vm7, %v617_v57, %v635_v19  ;;  %1736 = vmatpush1.bf16.msra.mxu0 %v3710_v16  ;;  %v1159_v21 = vld [vmem:[#allocation3 + $0x28] sm:$0xff]  ;;  %v1006_v24 = vpop.permute.xlu0 %1005 }
 0x132   : > { %v4047_v22 = vld [vmem:[#allocation3 + $0x24] ss:$8 sps:$4 sm:$0xff]   ;;  %669 = vst.msk [vmem:[#allocation3 + $0x8] sm:$0xff] %vm4395_vm4, %v646_v58  ;;  %v1004_v23 = vpop.permute.xlu1 %1003  ;;  %v3708_v25 = vcombine.low %v1158_v20, %v1159_v21  ;;  %v1043_v34 = vrot.slane %v1006_v24, 4  ;;  %1232 = vperm.xlu1 %4024, %v1206_v12  }
 0x133   : > { %v1042_v26 = vrot.slane %v1004_v23, 4  ;;  %1737 = vmatprep.subr.bf16.mxu0 %v4047_v22  ;;  %1237 = vperm.xlu0 %4023, %v1207_v14  }
 0x134   : > { %v1154_v37 = vld [vmem:[#allocation3] sm:$0xff] }
 0x135   : > { %v1061_v27 = vsel %vm665_vm2, %v1041_v17, %v1042_v26  ;;  %1738 = vmatpush1.bf16.msra.mxu0 %v3708_v25  ;;  %v1157_v29 = vld [vmem:[#allocation3 + $0x18] sm:$0xff]  ;;  %v893_v33 = vpop.permute.xlu0 %892  ;;  %v1205_v25 = vld [vmem:[%s5407_s3 + $0x8] sm:$0xff] }
 0x136   : > { %v4049_v30 = vld [vmem:[#allocation3 + $0x14] ss:$8 sps:$4 sm:$0xff]   ;;  %v1063_v31 = vsel %vm1062_vm8, %v1002_v15, %v1061_v27  ;;  %v1008_v32 = vpop.permute.xlu1 %1007  ;;  %v3706_v18 = vcombine.low %v1156_v28, %v1157_v29  ;;  %v916_v45 = vrot.slane %v893_v33, 4 }
 0x137   : > { %1092 = vst.msk [vmem:[#allocation3 + $0xf0] sm:$0xff] %vm4395_vm4, %v1063_v31  ;;  %v1044_v35 = vrot.slane %v1008_v32, 4  ;;  %1739 = vmatprep.subr.bf16.mxu0 %v4049_v30  ;;  %1227 = vperm.xlu0 %4023, %v1205_v25   ;;  %v1218_v31 = vld [vmem:[%s5407_s3 + $0x70] sm:$0xff] }
 0x139   : > { %v1064_v36 = vsel %vm665_vm2, %v1043_v34, %v1044_v35  ;;  %1740 = vmatpush1.bf16.msra.mxu0 %v3706_v18  ;;  %v1155_v38 = vld [vmem:[#allocation3 + $0x8] sm:$0xff]  ;;  %v897_v42 = vpop.permute.xlu0 %896 }
 0x13a   : > { %v4051_v39 = vld [vmem:[#allocation3 + $0x4] ss:$8 sps:$4 sm:$0xff]   ;;  %v1065_v40 = vsel %vm1062_vm8, %v1006_v24, %v1064_v36  ;;  %v895_v41 = vpop.permute.xlu1 %894  ;;  %v3704_v43 = vcombine.low %v1154_v37, %v1155_v38  ;;  %v918_v52 = vrot.slane %v897_v42, 4 }
 0x13b   : > { %1093 = vst.msk [vmem:[#allocation3 + $0xf8] sm:$0xff] %vm4395_vm4, %v1065_v40  ;;  %v917_v46 = vrot.slane %v895_v41, 4  ;;  %1741 = vmatprep.subr.bf16.mxu0 %v4051_v39  ;;  %v1204_v24 = vld [vmem:[%s5407_s3] sm:$0xff] }
 0x13c   : > { %1222 = vperm.xlu1 %4024, %v1204_v24  }
 0x13d   : > { %v937_v47 = vsel %vm665_vm2, %v916_v45, %v917_v46  ;;  %1742 = vmatpush1.bf16.msra.mxu0 %v3704_v43  ;;  %v885_v51 = vpop.permute.xlu0 %884  ;;  %v1217_v43 = vld [vmem:[%s5407_s3 + $0x68] sm:$0xff] }
 0x13e   : > { %v938_v48 = vsel %vm921_vm9, %v893_v33, %v937_v47  ;;  %v899_v50 = vpop.permute.xlu1 %898  ;;  %v1184_v62 = vld [vmem:[#allocation3 + $0xf0] sm:$0xff]  ;;  %v912_v1 = vrot.slane %v885_v51, 4  ;;  %v1219_v33 = vld [vmem:[%s5407_s3 + $0x78] sm:$0xff] }
 0x13f   : > { %959 = vst.msk [vmem:[#allocation3 + $0xe0] sm:$0xff] %vm4395_vm4, %v938_v48  ;;  %v919_v53 = vrot.slane %v899_v50, 4  ;;  %1297 = vperm.xlu0 %4023, %v1219_v33  }
 0x140   : > { %1292 = vperm.xlu1 %4024, %v1218_v31  }
 0x141   : > { %v939_v56 = vsel %vm665_vm2, %v918_v52, %v919_v53  ;;  %v889_v61 = vpop.permute.xlu0 %888  ;;  %v1214_v52 = vld [vmem:[%s5407_s3 + $0x50] sm:$0xff] }
 0x142   : > { %v940_v60 = vsel %vm921_vm9, %v897_v42, %v939_v56  ;;  %v887_v54 = vpop.permute.xlu1 %886  ;;  %v1185_v63 = vld [vmem:[#allocation3 + $0xf8] sm:$0xff]  ;;  %v914_v10 = vrot.slane %v889_v61, 4  ;;  %v1216_v42 = vld [vmem:[%s5407_s3 + $0x60] sm:$0xff] }
 0x143   : > { %v4053_v0 = vld [vmem:[#allocation3 + $0xf4] ss:$8 sps:$4 sm:$0xff]   ;;  %960 = vst.msk [vmem:[#allocation3 + $0xe8] sm:$0xff] %vm4395_vm4, %v940_v60  ;;  %v913_v2 = vrot.slane %v887_v54, 4  ;;  %v3734_v3 = vcombine.low %v1184_v62, %v1185_v63  ;;  %1287 = vperm.xlu0 %4023, %v1217_v43  }
 0x144   : > { %1743 = vmatprep.subr.bf16.mxu0 %v4053_v0  ;;  %1282 = vperm.xlu1 %4024, %v1216_v42  }
 0x145   : > { %v933_v6 = vsel %vm665_vm2, %v912_v1, %v913_v2  ;;  %1744 = vmatpush2.bf16.msra.mxu0 %v3734_v3  ;;  %v877_v9 = vpop.permute.xlu0 %876  ;;  %v1212_v2 = vld [vmem:[%s5407_s3 + $0x40] sm:$0xff]  ;;  %v1213_v3 = vld [vmem:[%s5407_s3 + $0x48] sm:$0xff] }
 0x146   : > { %v934_v7 = vsel %vm921_vm9, %v885_v51, %v933_v6  ;;  %v891_v8 = vpop.permute.xlu1 %890  ;;  %v1182_v19 = vld [vmem:[#allocation3 + $0xe0] sm:$0xff]  ;;  %v908_v21 = vrot.slane %v877_v9, 4 }
 0x147   : > { %957 = vst.msk [vmem:[#allocation3 + $0xd0] sm:$0xff] %vm4395_vm4, %v934_v7  ;;  %v915_v11 = vrot.slane %v891_v8, 4  ;;  %1277 = vperm.xlu0 %4023, %v1215_v55  }
 0x148   : > { %1272 = vperm.xlu1 %4024, %v1214_v52  }
 0x149   : > { %v935_v13 = vsel %vm665_vm2, %v914_v10, %v915_v11  ;;  %v881_v16 = vpop.permute.xlu0 %880 }
 0x14a   : > { %v936_v57 = vsel %vm921_vm9, %v889_v61, %v935_v13  ;;  %v879_v15 = vpop.permute.xlu1 %878  ;;  %v1183_v58 = vld [vmem:[#allocation3 + $0xe8] sm:$0xff]  ;;  %v910_v29 = vrot.slane %v881_v16, 4 }
 0x14b   : > { %v4055_v20 = vld [vmem:[#allocation3 + $0xe4] ss:$8 sps:$4 sm:$0xff]   ;;  %958 = vst.msk [vmem:[#allocation3 + $0xd8] sm:$0xff] %vm4395_vm4, %v936_v57  ;;  %v909_v22 = vrot.slane %v879_v15, 4  ;;  %v3732_v23 = vcombine.low %v1182_v19, %v1183_v58  ;;  %1267 = vperm.xlu0 %4023, %v1213_v3  }
 0x14c   : > { %1745 = vmatprep.subr.bf16.mxu0 %v4055_v20  ;;  %1262 = vperm.xlu1 %4024, %v1212_v2  }
 0x14d   : > { %v929_v17 = vsel %vm665_vm2, %v908_v21, %v909_v22  ;;  %1746 = vmatpush2.bf16.msra.mxu0 %v3732_v23  ;;  %v1034_v28 = vpop.permute.xlu0 %1033 }
 0x14e   : > { %v930_v26 = vsel %vm921_vm9, %v877_v9, %v929_v17  ;;  %v883_v27 = vpop.permute.xlu1 %882  ;;  %v1180_v36 = vld [vmem:[#allocation3 + $0xd0] sm:$0xff]  ;;  %v1057_v39 = vrot.slane %v1034_v28, 4 }
 0x14f   : > { %955 = vst.msk [vmem:[#allocation3 + $0xc0] sm:$0xff] %vm4395_vm4, %v930_v26  ;;  %v911_v30 = vrot.slane %v883_v27, 4 }
 0x151   : > { %v931_v32 = vsel %vm665_vm2, %v910_v29, %v911_v30  ;;  %v1038_v35 = vpop.permute.xlu0 %1037 }
 0x152   : > { %v932_v18 = vsel %vm921_vm9, %v881_v16, %v931_v32  ;;  %v1036_v34 = vpop.permute.xlu1 %1035  ;;  %v1181_v37 = vld [vmem:[#allocation3 + $0xd8] sm:$0xff]  ;;  %v1059_v50 = vrot.slane %v1038_v35, 4 }
 0x153   : > { %v4057_v38 = vld [vmem:[#allocation3 + $0xd4] ss:$8 sps:$4 sm:$0xff]   ;;  %956 = vst.msk [vmem:[#allocation3 + $0xc8] sm:$0xff] %vm4395_vm4, %v932_v18  ;;  %v1058_v40 = vrot.slane %v1036_v34, 4  ;;  %v3730_v41 = vcombine.low %v1180_v36, %v1181_v37 }
 0x154   : > { %1747 = vmatprep.subr.bf16.mxu0 %v4057_v38 }
 0x155   : > { %v1078_v45 = vsel %vm665_vm2, %v1057_v39, %v1058_v40  ;;  %1748 = vmatpush2.bf16.msra.mxu0 %v3730_v41  ;;  %v869_v48 = vpop.permute.xlu0 %868 }
 0x156   : > { %v1079_v46 = vsel %vm1062_vm8, %v1034_v28, %v1078_v45  ;;  %v1040_v47 = vpop.permute.xlu1 %1039  ;;  %v1178_v54 = vld [vmem:[#allocation3 + $0xc0] sm:$0xff]  ;;  %v904_v63 = vrot.slane %v869_v48, 4 }
 0x157   : > { %1100 = vst.msk [vmem:[#allocation3 + $0x130] sm:$0xff] %vm4395_vm4, %v1079_v46  ;;  %v1060_v51 = vrot.slane %v1040_v47, 4 }
 0x159   : > { %v1080_v53 = vsel %vm665_vm2, %v1059_v50, %v1060_v51  ;;  %v873_v60 = vpop.permute.xlu0 %872 }
 0x15a   : > { %v1081_v56 = vsel %vm1062_vm8, %v1038_v35, %v1080_v53  ;;  %v871_v59 = vpop.permute.xlu1 %870  ;;  %v1179_v61 = vld [vmem:[#allocation3 + $0xc8] sm:$0xff]  ;;  %v906_v8 = vrot.slane %v873_v60, 4 }
 0x15b   : > { %v4059_v62 = vld [vmem:[#allocation3 + $0xc4] ss:$8 sps:$4 sm:$0xff]   ;;  %1101 = vst.msk [vmem:[#allocation3 + $0x138] sm:$0xff] %vm4395_vm4, %v1081_v56  ;;  %v905_v0 = vrot.slane %v871_v59, 4  ;;  %v3728_v1 = vcombine.low %v1178_v54, %v1179_v61 }
 0x15c   : > { %1749 = vmatprep.subr.bf16.mxu0 %v4059_v62 }
 0x15d   : > { %v925_v4 = vsel %vm665_vm2, %v904_v63, %v905_v0  ;;  %1750 = vmatpush2.bf16.msra.mxu0 %v3728_v1  ;;  %v1026_v7 = vpop.permute.xlu0 %1025 }
 0x15e   : > { %v926_v5 = vsel %vm921_vm9, %v869_v48, %v925_v4  ;;  %v875_v6 = vpop.permute.xlu1 %874  ;;  %v1192_v14 = vld [vmem:[#allocation3 + $0x130] sm:$0xff]  ;;  %v1053_v16 = vrot.slane %v1026_v7, 4 }
 0x15f   : > { %953 = vst.msk [vmem:[#allocation3 + $0xb0] sm:$0xff] %vm4395_vm4, %v926_v5  ;;  %v907_v9 = vrot.slane %v875_v6, 4 }
 0x161   : > { %v927_v10 = vsel %vm665_vm2, %v906_v8, %v907_v9  ;;  %v1030_v13 = vpop.permute.xlu0 %1029 }
 0x162   : > { %v928_v11 = vsel %vm921_vm9, %v873_v60, %v927_v10  ;;  %v1028_v12 = vpop.permute.xlu1 %1027  ;;  %v1193_v57 = vld [vmem:[#allocation3 + $0x138] sm:$0xff]  ;;  %v1055_v24 = vrot.slane %v1030_v13, 4 }
 0x163   : > { %v4061_v15 = vld [vmem:[#allocation3 + $0x134] ss:$8 sps:$4 sm:$0xff]   ;;  %954 = vst.msk [vmem:[#allocation3 + $0xb8] sm:$0xff] %vm4395_vm4, %v928_v11  ;;  %v1054_v19 = vrot.slane %v1028_v12, 4  ;;  %v3742_v58 = vcombine.low %v1192_v14, %v1193_v57 }
 0x164   : > { %1848 = vmatprep.subr.bf16.mxu1 %v4061_v15 }
 0x165   : > { %v1074_v20 = vsel %vm665_vm2, %v1053_v16, %v1054_v19  ;;  %1849 = vmatpush1.bf16.msra.mxu1 %v3742_v58  ;;  %v861_v23 = vpop.permute.xlu0 %860 }
 0x166   : > { %v1075_v21 = vsel %vm1062_vm8, %v1026_v7, %v1074_v20  ;;  %v1032_v22 = vpop.permute.xlu1 %1031  ;;  %v1176_v29 = vld [vmem:[#allocation3 + $0xb0] sm:$0xff]  ;;  %v900_v32 = vrot.slane %v861_v23, 4 }
 0x167   : > { %1098 = vst.msk [vmem:[#allocation3 + $0x120] sm:$0xff] %vm4395_vm4, %v1075_v21  ;;  %v1056_v25 = vrot.slane %v1032_v22, 4 }
 0x169   : > { %v1076_v17 = vsel %vm665_vm2, %v1055_v24, %v1056_v25  ;;  %v865_v28 = vpop.permute.xlu0 %864 }
 0x16a   : > { %v1077_v26 = vsel %vm1062_vm8, %v1030_v13, %v1076_v17  ;;  %v863_v27 = vpop.permute.xlu1 %862  ;;  %v1177_v30 = vld [vmem:[#allocation3 + $0xb8] sm:$0xff]  ;;  %v902_v38 = vrot.slane %v865_v28, 4 }
 0x16b   : > { %v4063_v31 = vld [vmem:[#allocation3 + $0xb4] ss:$8 sps:$4 sm:$0xff]   ;;  %1099 = vst.msk [vmem:[#allocation3 + $0x128] sm:$0xff] %vm4395_vm4, %v1077_v26  ;;  %v901_v33 = vrot.slane %v863_v27, 4  ;;  %v3726_v18 = vcombine.low %v1176_v29, %v1177_v30 }
 0x16c   : > { %1751 = vmatprep.subr.bf16.mxu0 %v4063_v31 }
 0x16d   : > { %v920_v34 = vsel %vm665_vm2, %v900_v32, %v901_v33  ;;  %1752 = vmatpush2.bf16.msra.mxu0 %v3726_v18  ;;  %v1018_v37 = vpop.permute.xlu0 %1017 }
 0x16e   : > { %v922_v35 = vsel %vm921_vm9, %v861_v23, %v920_v34  ;;  %v867_v36 = vpop.permute.xlu1 %866  ;;  %v1190_v45 = vld [vmem:[#allocation3 + $0x120] sm:$0xff]  ;;  %v1049_v48 = vrot.slane %v1018_v37, 4 }
 0x16f   : > { %951 = vst.msk [vmem:[#allocation3 + $0xa0] sm:$0xff] %vm4395_vm4, %v922_v35  ;;  %v903_v39 = vrot.slane %v867_v36, 4 }
 0x171   : > { %v923_v40 = vsel %vm665_vm2, %v902_v38, %v903_v39  ;;  %v1022_v43 = vpop.permute.xlu0 %1021 }
 0x172   : > { %v924_v41 = vsel %vm921_vm9, %v865_v28, %v923_v40  ;;  %v1020_v42 = vpop.permute.xlu1 %1019  ;;  %v1191_v46 = vld [vmem:[#allocation3 + $0x128] sm:$0xff]  ;;  %v1051_v59 = vrot.slane %v1022_v43, 4 }
 0x173   : > { %v4065_v47 = vld [vmem:[#allocation3 + $0x124] ss:$8 sps:$4 sm:$0xff]   ;;  %952 = vst.msk [vmem:[#allocation3 + $0xa8] sm:$0xff] %vm4395_vm4, %v924_v41  ;;  %v1050_v50 = vrot.slane %v1020_v42, 4  ;;  %v3740_v51 = vcombine.low %v1190_v45, %v1191_v46 }
 0x174   : > { %1850 = vmatprep.subr.bf16.mxu1 %v4065_v47  ;;  %v4076_v46 = vld [vmem:[#allocation3 + $0x184] ss:$8 sps:$4 sm:$0xff]   ;;  %v4078_v47 = vld [vmem:[#allocation3 + $0x180] ss:$8 sps:$4 sm:$0xff]  }
 0x175   : > { %v1070_v52 = vsel %vm665_vm2, %v1049_v48, %v1050_v50  ;;  %1851 = vmatpush1.bf16.msra.mxu1 %v3740_v51  ;;  %v751_v56 = vpop.permute.xlu0 %750  ;;  %v4079_v48 = vld [vmem:[%s5406_s2 + $0x8] ss:$16 sps:$4 sm:$0xff]   ;;  %v4088_v50 = vld [vmem:[%s5406_s2 + $0x2c] ss:$16 sps:$4 sm:$0xff]  }
 0x176   : > { %v1071_v53 = vsel %vm1062_vm8, %v1018_v37, %v1070_v52  ;;  %v1024_v55 = vpop.permute.xlu1 %1023  ;;  %v1174_v0 = vld [vmem:[#allocation3 + $0xa0] sm:$0xff]  ;;  %v774_v3 = vrot.slane %v751_v56, 4 }
 0x177   : > { %1096 = vst.msk [vmem:[#allocation3 + $0x110] sm:$0xff] %vm4395_vm4, %v1071_v53  ;;  %v1052_v60 = vrot.slane %v1024_v55, 4  ;;  %v4085_v53 = vld [vmem:[%s5406_s2] ss:$16 sps:$4 sm:$0xff]   ;;  %v4091_v55 = vld [vmem:[%s5406_s2 + $0x24] ss:$16 sps:$4 sm:$0xff]  }
 0x179   : > { %v1072_v54 = vsel %vm665_vm2, %v1051_v59, %v1052_v60  ;;  %v755_v63 = vpop.permute.xlu0 %754  ;;  %v4094_v59 = vld [vmem:[%s5406_s2 + $0x4c] ss:$16 sps:$4 sm:$0xff]   ;;  %v4093_v60 = vld [vmem:[%s5406_s2 + $0x20] ss:$16 sps:$4 sm:$0xff]  }
 0x17a   : > { %v1073_v61 = vsel %vm1062_vm8, %v1022_v43, %v1072_v54  ;;  %v753_v62 = vpop.permute.xlu1 %752  ;;  %v1175_v1 = vld [vmem:[#allocation3 + $0xa8] sm:$0xff]  ;;  %v776_v10 = vrot.slane %v755_v63, 4 }
 0x17b   : > { %v4067_v2 = vld [vmem:[#allocation3 + $0xa4] ss:$8 sps:$4 sm:$0xff]   ;;  %1097 = vst.msk [vmem:[#allocation3 + $0x118] sm:$0xff] %vm4395_vm4, %v1073_v61  ;;  %v775_v4 = vrot.slane %v753_v62, 4  ;;  %v3724_v5 = vcombine.low %v1174_v0, %v1175_v1  ;;  %v4096_v61 = vld [vmem:[%s5406_s2 + $0x48] ss:$16 sps:$4 sm:$0xff]  }
 0x17c   : > { %1753 = vmatprep.subr.bf16.mxu0 %v4067_v2  ;;  %v4097_v54 = vld [vmem:[%s5406_s2 + $0x44] ss:$16 sps:$4 sm:$0xff]   ;;  %v4100_v62 = vld [vmem:[%s5406_s2 + $0x6c] ss:$16 sps:$4 sm:$0xff]   ;;  %v4102_v1 = vld [vmem:[%s5406_s2 + $0x68] ss:$16 sps:$4 sm:$0xff]  }
 0x17d   : > { %v796_v6 = vsel %vm665_vm2, %v774_v3, %v775_v4  ;;  %1754 = vmatpush2.bf16.msra.mxu0 %v3724_v5  ;;  %v1010_v9 = vpop.permute.xlu0 %1009  ;;  %v4103_v0 = vld [vmem:[%s5406_s2 + $0x64] ss:$16 sps:$4 sm:$0xff]   ;;  %v4109_v2 = vld [vmem:[%s5406_s2 + $0x8c] ss:$16 sps:$4 sm:$0xff]   ;;  %v4105_v3 = vld [vmem:[%s5406_s2 + $0x60] ss:$16 sps:$4 sm:$0xff]  }
 0x17e   : > { %v797_v7 = vsel %vm780_vm5, %v751_v56, %v796_v6  ;;  %v757_v8 = vpop.permute.xlu1 %756  ;;  %v1188_v15 = vld [vmem:[#allocation3 + $0x110] sm:$0xff]  ;;  %v1045_v58 = vrot.slane %v1010_v9, 4  ;;  %v4106_v4 = vld [vmem:[%s5406_s2 + $0x84] ss:$16 sps:$4 sm:$0xff]  }
 0x17f   : > { %818 = vst.msk [vmem:[#allocation3 + $0x90] sm:$0xff] %vm4395_vm4, %v797_v7  ;;  %v777_v11 = vrot.slane %v757_v8, 4  ;;  %v4090_v56 = vld [vmem:[%s5406_s2 + $0x28] ss:$16 sps:$4 sm:$0xff]   ;;  %v4115_v6 = vld [vmem:[%s5406_s2 + $0xac] ss:$16 sps:$4 sm:$0xff]  }
 0x180   : > { %v4111_v5 = vld [vmem:[%s5406_s2 + $0x88] ss:$16 sps:$4 sm:$0xff]   ;;  %v4108_v7 = vld [vmem:[%s5406_s2 + $0x80] ss:$16 sps:$4 sm:$0xff]   ;;  %v4112_v8 = vld [vmem:[%s5406_s2 + $0xa4] ss:$16 sps:$4 sm:$0xff]  }
 0x181   : > { %v798_v12 = vsel %vm665_vm2, %v776_v10, %v777_v11  ;;  %v1014_v57 = vpop.permute.xlu0 %1013  ;;  %v4121_v10 = vld [vmem:[%s5406_s2 + $0xcc] ss:$16 sps:$4 sm:$0xff]   ;;  %v4114_v11 = vld [vmem:[%s5406_s2 + $0xa0] ss:$16 sps:$4 sm:$0xff]  }
 0x182   : > { %v799_v13 = vsel %vm780_vm5, %v755_v63, %v798_v12  ;;  %v1012_v14 = vpop.permute.xlu1 %1011  ;;  %v1189_v16 = vld [vmem:[#allocation3 + $0x118] sm:$0xff]  ;;  %v1047_v17 = vrot.slane %v1014_v57, 4 }
 0x183   : > { %v4069_v19 = vld [vmem:[#allocation3 + $0x114] ss:$8 sps:$4 sm:$0xff]   ;;  %819 = vst.msk [vmem:[#allocation3 + $0x98] sm:$0xff] %vm4395_vm4, %v799_v13  ;;  %v1046_v20 = vrot.slane %v1012_v14, 4  ;;  %v3738_v21 = vcombine.low %v1188_v15, %v1189_v16  ;;  %v4099_v63 = vld [vmem:[%s5406_s2 + $0x40] ss:$16 sps:$4 sm:$0xff]  }
 0x184   : > { %1852 = vmatprep.subr.bf16.mxu1 %v4069_v19  ;;  %v4118_v12 = vld [vmem:[%s5406_s2 + $0xc4] ss:$16 sps:$4 sm:$0xff]   ;;  %v4123_v13 = vld [vmem:[%s5406_s2 + $0xc8] ss:$16 sps:$4 sm:$0xff]   ;;  %v4127_v14 = vld [vmem:[%s5406_s2 + $0xec] ss:$16 sps:$4 sm:$0xff]  }
 0x185   : > { %v1066_v22 = vsel %vm665_vm2, %v1045_v58, %v1046_v20  ;;  %1853 = vmatpush1.bf16.msra.mxu1 %v3738_v21  ;;  %v743_v25 = vpop.permute.xlu0 %742  ;;  %v4124_v15 = vld [vmem:[%s5406_s2 + $0xe4] ss:$16 sps:$4 sm:$0xff]   ;;  %v4129_v16 = vld [vmem:[%s5406_s2 + $0xe8] ss:$16 sps:$4 sm:$0xff]   ;;  %v4126_v19 = vld [vmem:[%s5406_s2 + $0xe0] ss:$16 sps:$4 sm:$0xff]  }
 0x186   : > { %v1067_v23 = vsel %vm1062_vm8, %v1010_v9, %v1066_v22  ;;  %v1016_v24 = vpop.permute.xlu1 %1015  ;;  %v1172_v30 = vld [vmem:[#allocation3 + $0x90] sm:$0xff]  ;;  %v770_v33 = vrot.slane %v743_v25, 4 }
 0x187   : > { %1094 = vst.msk [vmem:[#allocation3 + $0x100] sm:$0xff] %vm4395_vm4, %v1067_v23  ;;  %v1048_v26 = vrot.slane %v1016_v24, 4  ;;  %v4117_v9 = vld [vmem:[%s5406_s2 + $0xa8] ss:$16 sps:$4 sm:$0xff]  }
 0x189   : > { %v1068_v27 = vsel %vm665_vm2, %v1047_v17, %v1048_v26  ;;  %v747_v35 = vpop.permute.xlu0 %746 }
 0x18a   : > { %v1069_v28 = vsel %vm1062_vm8, %v1014_v57, %v1068_v27  ;;  %v745_v29 = vpop.permute.xlu1 %744  ;;  %v1173_v31 = vld [vmem:[#allocation3 + $0x98] sm:$0xff]  ;;  %v772_v39 = vrot.slane %v747_v35, 4 }
 0x18b   : > { %v4071_v32 = vld [vmem:[#allocation3 + $0x94] ss:$8 sps:$4 sm:$0xff]   ;;  %1095 = vst.msk [vmem:[#allocation3 + $0x108] sm:$0xff] %vm4395_vm4, %v1069_v28  ;;  %v771_v18 = vrot.slane %v745_v29, 4  ;;  %v3722_v34 = vcombine.low %v1172_v30, %v1173_v31  ;;  %v4120_v57 = vld [vmem:[%s5406_s2 + $0xc0] ss:$16 sps:$4 sm:$0xff]   ;;  %v2125_v31 = vlaneseq }
 0x18c   : > { %1755 = vmatprep.subr.bf16.mxu0 %v4071_v32 }
 0x18d   : > { %v792_v36 = vsel %vm665_vm2, %v770_v33, %v771_v18  ;;  %1756 = vmatpush2.bf16.msra.mxu0 %v3722_v34 }
 0x18e   : > { %v793_v37 = vsel %vm780_vm5, %v743_v25, %v792_v36  ;;  %v749_v38 = vpop.permute.xlu1 %748 }
 0x18f   : > { %816 = vst.msk [vmem:[#allocation3 + $0x80] sm:$0xff] %vm4395_vm4, %v793_v37  ;;  %v773_v40 = vrot.slane %v749_v38, 4 }
 0x191   : > { %v794_v41 = vsel %vm665_vm2, %v772_v39, %v773_v40  ;;  %v2126_v39 = vand.u32 127, %v2125_v31  ;;  %vm2629_vm2 = vcmask 1014784  }
 0x192   : > { %v795_v42 = vsel %vm780_vm5, %v747_v35, %v794_v41  ;;  %v4073_v43 = vld [vmem:[#allocation3 + $0x104] ss:$8 sps:$4 sm:$0xff]   ;;  %v4075_v45 = vld [vmem:[#allocation3 + $0x100] ss:$8 sps:$4 sm:$0xff]  }
 0x193   : > { %817 = vst.msk [vmem:[#allocation3 + $0x88] sm:$0xff] %vm4395_vm4, %v795_v42  ;;  %1854 = vmatprep.subr.bf16.mxu1 %v4073_v43 }
 0x194   : > { %1855 = vmatpush1.bf16.msra.mxu1 %v4075_v45 }
 0x195   : > { %1870 = vmatprep.subr.bf16.mxu1 %v4076_v46 }
 0x198   : > { %1871 = vmatpush2.bf16.msra.mxu1 %v4078_v47 }
 0x199   : > { %2881 = vmatprep.subr.bf16.mxu1 %v4266_v49 }
 0x19a   : > { %v4082_v51 = vld [vmem:[#allocation3 + $0x84] ss:$8 sps:$4 sm:$0xff]   ;;  %v4084_v52 = vld [vmem:[#allocation3 + $0x80] ss:$8 sps:$4 sm:$0xff]  }
 0x19b   : > { %1757 = vmatprep.subr.bf16.mxu0 %v4082_v51  ;;  %1873 = vmatmul.mubr.bf16.vlgmr.msra.gmra.mxu1 %v4079_v48 }
 0x19c   : > { %1758 = vmatpush2.bf16.msra.mxu0 %v4084_v52  ;;  %3755 = vmatprep.mubr.msk.bf16.mxu1 %vm1702_vm6, %v4088_v50 }
 0x19f   : > { %1760 = vmatmul.mubr.bf16.vlgmr.msra.gmra.mxu0 %v4085_v53  ;;  %v2129_v53 = vadd.s32 4294967294, %v2126_v39 }
 0x1a0   : > { %1769 = vmatprep.mubr.bf16.mxu0 %v4091_v55 }
 0x1a1   : > { %vm2131_vm11 = vcmp.ge.s32.totalorder %v2129_v53, 16 }
 0x1a2   : > { %vm4880_vm13 = vmpackc.low %vm4267_vm12, %vm2131_vm11 }
 0x1a3   : > { %1883 = vmatmul.mubr.bf16.gmra.mxu1 %v4090_v56 }
 0x1a4   : > { %3756 = vmatprep.mubr.msk.bf16.mxu1 %vm1702_vm6, %v4094_v59 }
 0x1a5   : > { %v4860_v58 = vpop.permute.xlu1 %1257 }
 0x1a6   : > { %v4862_v20 = vpop.permute.xlu0 %1252 }
 0x1a7   : > { %1770 = vmatmul.mubr.bf16.gmra.mxu0 %v4093_v60 }
 0x1a8   : > { %1779 = vmatprep.mubr.bf16.mxu0 %v4097_v54 }
 0x1a9   : > { %v4864_v21 = vpop.permute.xlu1 %1242 }
 0x1aa   : > { %v4866_v22 = vpop.permute.xlu0 %1247 }
 0x1ab   : > { %1893 = vmatmul.mubr.bf16.gmra.mxu1 %v4096_v61 }
 0x1ac   : > { %3757 = vmatprep.mubr.msk.bf16.mxu1 %vm1702_vm6, %v4100_v62 }
 0x1ad   : > { %v1233_v23 = vpop.permute.xlu1 %1232 }
 0x1ae   : > { %v1238_v25 = vpop.permute.xlu0 %1237 }
 0x1af   : > { %1780 = vmatmul.mubr.bf16.gmra.mxu0 %v4099_v63 }
 0x1b0   : > { %1789 = vmatprep.mubr.bf16.mxu0 %v4103_v0 }
 0x1b2   : > { %v1228_v33 = vpop.permute.xlu0 %1227 }
 0x1b3   : > { %1903 = vmatmul.mubr.bf16.gmra.mxu1 %v4102_v1 }
 0x1b4   : > { %3758 = vmatprep.mubr.msk.bf16.mxu1 %vm1702_vm6, %v4109_v2 }
 0x1b7   : > { %1790 = vmatmul.mubr.bf16.gmra.mxu0 %v4105_v3  ;;  %v1223_v26 = vpop.permute.xlu1 %1222 }
 0x1b8   : > { %1799 = vmatprep.mubr.bf16.mxu0 %v4106_v4 }
 0x1bb   : > { %1913 = vmatmul.mubr.bf16.gmra.mxu1 %v4111_v5  ;;  %v4872_v0 = vpop.permute.xlu1 %1292 }
 0x1bc   : > { %3759 = vmatprep.mubr.msk.bf16.mxu1 %vm1702_vm6, %v4115_v6 }
 0x1bf   : > { %1800 = vmatmul.mubr.bf16.gmra.mxu0 %v4108_v7 }
 0x1c0   : > { %1809 = vmatprep.mubr.bf16.mxu0 %v4112_v8 }
 0x1c3   : > { %1923 = vmatmul.mubr.bf16.gmra.mxu1 %v4117_v9 }
 0x1c4   : > { %3760 = vmatprep.mubr.msk.bf16.mxu1 %vm1702_vm6, %v4121_v10 }
 0x1c7   : > { %1810 = vmatmul.mubr.bf16.gmra.mxu0 %v4114_v11 }
 0x1c8   : > { %1819 = vmatprep.mubr.bf16.mxu0 %v4118_v12  ;;  %v4878_v12 = vpop.permute.xlu0 %1297 }
 0x1cb   : > { %1933 = vmatmul.mubr.bf16.gmra.mxu1 %v4123_v13 }
 0x1cc   : > { %3761 = vmatprep.mubr.msk.bf16.mxu1 %vm1702_vm6, %v4127_v14 }
 0x1cf   : > { %1820 = vmatmul.mubr.bf16.gmra.mxu0 %v4120_v57 }
 0x1d0   : > { %1829 = vmatprep.mubr.bf16.mxu0 %v4124_v15 }
 0x1d3   : > { %1943 = vmatmul.mubr.bf16.gmra.mxu1 %v4129_v16 }
 0x1d7   : > { %1830 = vmatmul.mubr.bf16.gmra.mxu0 %v4126_v19 }
 0x25b   : > { %v1874_v24 = vpop.f32.mrf.mxu1 }
 0x25d   : > { %v1876_v17 = vpop.f32.mrf.mxu1 }
 0x25f   : > { %v1761_v27 = vpop.f32.mrf.mxu0  ;;  %v1878_v28 = vpop.f32.mrf.mxu1 }
 0x260   : > { %v1762_v29 = vadd.f32 %v1761_v27, %v1223_v26 }
 0x261   : > { %v1763_v30 = vpop.f32.mrf.mxu0  ;;  %v1880_v32 = vpop.f32.mrf.mxu1 }
 0x262   : > { %v1875_v18 = vadd.f32 %v1874_v24, %v1762_v29  ;;  %v1764_v34 = vadd.f32 %v1763_v30, %v1223_v26 }
 0x263   : > { %v1765_v35 = vpop.f32.mrf.mxu0  ;;  %v1884_v36 = vpop.f32.mrf.mxu1 }
 0x264   : > { %v1877_v37 = vadd.f32 %v1876_v17, %v1764_v34  ;;  %v1766_v38 = vadd.f32 %v1765_v35, %v1228_v33  ;;  %v1953_v42 = vmax.f32 %v1875_v18, 0.0  ;;  %v4897_v35 = vpop.permute.xlu0 %1287 }
 0x265   : > { %v1767_v40 = vpop.f32.mrf.mxu0  ;;  %v1886_v41 = vpop.f32.mrf.mxu1 }
 0x266   : > { %v1954_v43 = vmax.f32 %v1877_v37, 0.0  ;;  %v1879_v45 = vadd.f32 %v1878_v28, %v1766_v38  ;;  %v1768_v46 = vadd.f32 %v1767_v40, %v1228_v33 }
 0x267   : > { %v1771_v47 = vpop.f32.mrf.mxu0  ;;  %v1888_v48 = vpop.f32.mrf.mxu1 }
 0x268   : > { %v3887_v50 = vpack.c.bf16 %v1954_v43, %v1953_v42  ;;  %v1881_v51 = vadd.f32 %v1880_v32, %v1768_v46  ;;  %v1772_v52 = vadd.f32 %v1771_v47, %v1233_v23  ;;  %v1955_v59 = vmax.f32 %v1879_v45, 0.0 }
 0x269   : > { %v1773_v55 = vpop.f32.mrf.mxu0  ;;  %v1890_v56 = vpop.f32.mrf.mxu1 }
 0x26a   : > { %2081 = vst.msk [vmem:[#allocation4] sm:$0xff] %vm4395_vm4, %v3887_v50  ;;  %v1956_v60 = vmax.f32 %v1881_v51, 0.0  ;;  %v1885_v54 = vadd.f32 %v1884_v36, %v1772_v52  ;;  %v1774_v61 = vadd.f32 %v1773_v55, %v1233_v23  ;;  %v4885_v23 = vpop.permute.xlu1 %1282 }
 0x26b   : > { %2103 = vst.msk [vmem:[#allocation4] sm:$0xf] %vm2102_vm10, %v4266_v49  ;;  %v1775_v62 = vpop.f32.mrf.mxu0  ;;  %v1894_v63 = vpop.f32.mrf.mxu1 }
 0x26c   : > { %v3888_v1 = vpack.c.bf16 %v1956_v60, %v1955_v59  ;;  %v1887_v2 = vadd.f32 %v1886_v41, %v1774_v61  ;;  %v1776_v3 = vadd.f32 %v1775_v62, %v1238_v25  ;;  %v1957_v6 = vmax.f32 %v1885_v54, 0.0  ;;  %v4920_v61 = vpop.permute.xlu0 %1277 }
 0x26d   : > { %v1777_v4 = vpop.f32.mrf.mxu0  ;;  %v1896_v5 = vpop.f32.mrf.mxu1 }
 0x26e   : > { %2082 = vst.msk [vmem:[#allocation4 + $0x8] sm:$0xff] %vm4395_vm4, %v3888_v1  ;;  %v1958_v7 = vmax.f32 %v1887_v2, 0.0  ;;  %v1889_v8 = vadd.f32 %v1888_v48, %v1776_v3  ;;  %v1778_v9 = vadd.f32 %v1777_v4, %v1238_v25  ;;  %v4906_v43 = vpop.permute.xlu1 %1272 }
 0x26f   : > { %2104 = vst.msk [vmem:[#allocation4 + $0x8] sm:$0xf] %vm2102_vm10, %v4266_v49  ;;  %v1781_v10 = vpop.f32.mrf.mxu0  ;;  %v1898_v11 = vpop.f32.mrf.mxu1 }
 0x270   : > { %v3889_v14 = vpack.c.bf16 %v1958_v7, %v1957_v6  ;;  %v1891_v57 = vadd.f32 %v1890_v56, %v1778_v9  ;;  %v1782_v15 = vadd.f32 %v1781_v10, %v4864_v21  ;;  %v1959_v25 = vmax.f32 %v1889_v8, 0.0 }
 0x271   : > { %v1783_v16 = vpop.f32.mrf.mxu0  ;;  %v1900_v19 = vpop.f32.mrf.mxu1 }
 0x272   : > { %v2133_v24 = vld [vmem:[#allocation4] sm:$0xff]  ;;  %2083 = vst.msk [vmem:[#allocation4 + $0x10] sm:$0xff] %vm4395_vm4, %v3889_v14  ;;  %v1960_v17 = vmax.f32 %v1891_v57, 0.0  ;;  %v1895_v26 = vadd.f32 %v1894_v63, %v1782_v15  ;;  %v1784_v27 = vadd.f32 %v1783_v16, %v4864_v21  ;;  %v1263_v3 = vpop.permute.xlu1 %1262 }
 0x273   : > { %v2154_v28 = vsel %vm4880_vm13, 0, %v2133_v24  ;;  %2105 = vst.msk [vmem:[#allocation4 + $0x10] sm:$0xf] %vm2102_vm10, %v4266_v49  ;;  %v1785_v29 = vpop.f32.mrf.mxu0  ;;  %v1904_v30 = vpop.f32.mrf.mxu1 }
 0x274   : > { %2170 = vst.msk [vmem:[#allocation4] sm:$0xff] %vm4395_vm4, %v2154_v28  ;;  %v3890_v31 = vpack.c.bf16 %v1960_v17, %v1959_v25  ;;  %v1897_v32 = vadd.f32 %v1896_v5, %v1784_v27  ;;  %v1786_v33 = vadd.f32 %v1785_v29, %v4866_v22  ;;  %v1961_v36 = vmax.f32 %v1895_v26, 0.0  ;;  %v1268_v24 = vpop.permute.xlu0 %1267 }
 0x275   : > { %v1787_v18 = vpop.f32.mrf.mxu0  ;;  %v1906_v34 = vpop.f32.mrf.mxu1 }
 0x276   : > { %v2134_v21 = vld [vmem:[#allocation4 + $0x8] sm:$0xff]  ;;  %2084 = vst.msk [vmem:[#allocation4 + $0x18] sm:$0xff] %vm4395_vm4, %v3890_v31  ;;  %v1962_v37 = vmax.f32 %v1897_v32, 0.0  ;;  %v1899_v38 = vadd.f32 %v1898_v11, %v1786_v33  ;;  %v1788_v39 = vadd.f32 %v1787_v18, %v4866_v22 }
 0x277   : > { %v2155_v40 = vsel %vm4880_vm13, 0, %v2134_v21  ;;  %2106 = vst.msk [vmem:[#allocation4 + $0x18] sm:$0xf] %vm2102_vm10, %v4266_v49  ;;  %v1791_v41 = vpop.f32.mrf.mxu0  ;;  %v1908_v42 = vpop.f32.mrf.mxu1 }
 0x278   : > { %2171 = vst.msk [vmem:[#allocation4 + $0x8] sm:$0xff] %vm4395_vm4, %v2155_v40  ;;  %v3891_v45 = vpack.c.bf16 %v1962_v37, %v1961_v36  ;;  %v1901_v46 = vadd.f32 %v1900_v19, %v1788_v39  ;;  %v1792_v47 = vadd.f32 %v1791_v41, %v4862_v20  ;;  %v1963_v51 = vmax.f32 %v1899_v38, 0.0 }
 0x279   : > { %v1793_v48 = vpop.f32.mrf.mxu0  ;;  %v1910_v50 = vpop.f32.mrf.mxu1 }
 0x27a   : > { %v2135_v22 = vld [vmem:[#allocation4 + $0x10] sm:$0xff]  ;;  %2085 = vst.msk [vmem:[#allocation4 + $0x20] sm:$0xff] %vm4395_vm4, %v3891_v45  ;;  %v1964_v52 = vmax.f32 %v1901_v46, 0.0  ;;  %v1905_v53 = vadd.f32 %v1904_v30, %v1792_v47  ;;  %v1794_v55 = vadd.f32 %v1793_v48, %v4862_v20 }
 0x27b   : > { %v2156_v56 = vsel %vm4880_vm13, 0, %v2135_v22  ;;  %2107 = vst.msk [vmem:[#allocation4 + $0x20] sm:$0xf] %vm2102_vm10, %v4266_v49  ;;  %v1795_v59 = vpop.f32.mrf.mxu0  ;;  %v4918_v60 = vld [vmem:[#allocation4] sm:$0xff]  ;;  %v1914_v54 = vpop.f32.mrf.mxu1 }
 0x27c   : > { %2172 = vst.msk [vmem:[#allocation4 + $0x10] sm:$0xff] %vm4395_vm4, %v2156_v56  ;;  %v3892_v62 = vpack.c.bf16 %v1964_v52, %v1963_v51  ;;  %v1907_v63 = vadd.f32 %v1906_v34, %v1794_v55  ;;  %v1796_v1 = vadd.f32 %v1795_v59, %v4860_v58  ;;  %2267 = vrot.lane.b32.xlu1 %v4918_v60, %s4268_s14  ;;  %v1965_v5 = vmax.f32 %v1905_v53, 0.0 }
 0x27d   : > { %v1797_v20 = vpop.f32.mrf.mxu0  ;;  %v1916_v2 = vpop.f32.mrf.mxu1 }
 0x27e   : > { %v2136_v4 = vld [vmem:[#allocation4 + $0x18] sm:$0xff]  ;;  %2086 = vst.msk [vmem:[#allocation4 + $0x28] sm:$0xff] %vm4395_vm4, %v3892_v62  ;;  %v1966_v6 = vmax.f32 %v1907_v63, 0.0  ;;  %v1909_v7 = vadd.f32 %v1908_v42, %v1796_v1  ;;  %v1798_v8 = vadd.f32 %v1797_v20, %v4860_v58 }
 0x27f   : > { %v2157_v9 = vsel %vm4880_vm13, 0, %v2136_v4  ;;  %2108 = vst.msk [vmem:[#allocation4 + $0x28] sm:$0xf] %vm2102_vm10, %v4266_v49  ;;  %v1801_v10 = vpop.f32.mrf.mxu0  ;;  %v4934_v11 = vld [vmem:[#allocation4 + $0x8] sm:$0xff]  ;;  %v1918_v14 = vpop.f32.mrf.mxu1 }
 0x280   : > { %2173 = vst.msk [vmem:[#allocation4 + $0x18] sm:$0xff] %vm4395_vm4, %v2157_v9  ;;  %v3893_v57 = vpack.c.bf16 %v1966_v6, %v1965_v5  ;;  %v1911_v15 = vadd.f32 %v1910_v50, %v1798_v8  ;;  %v1802_v16 = vadd.f32 %v1801_v10, %v1263_v3  ;;  %2202 = vrot.lane.b32.xlu1 %v4918_v60, %s4269_s15  ;;  %v1967_v17 = vmax.f32 %v1909_v7, 0.0 }
 0x281   : > { %2269 = vrot.lane.b32.xlu0 %v4934_v11, %s4268_s14  ;;  %v1803_v58 = vpop.f32.mrf.mxu0  ;;  %v1920_v19 = vpop.f32.mrf.mxu1 }
 0x282   : > { %v2137_v25 = vld [vmem:[#allocation4 + $0x20] sm:$0xff]  ;;  %2087 = vst.msk [vmem:[#allocation4 + $0x30] sm:$0xff] %vm4395_vm4, %v3893_v57  ;;  %v1968_v26 = vmax.f32 %v1911_v15, 0.0  ;;  %v1804_v27 = vadd.f32 %v1803_v58, %v1263_v3  ;;  %v1915_v28 = vadd.f32 %v1914_v54, %v1802_v16 }
 0x283   : > { %v2158_v29 = vsel %vm4880_vm13, 0, %v2137_v25  ;;  %2109 = vst.msk [vmem:[#allocation4 + $0x30] sm:$0xf] %vm2102_vm10, %v4266_v49  ;;  %v1805_v30 = vpop.f32.mrf.mxu0  ;;  %v4948_v31 = vld [vmem:[#allocation4 + $0x10] sm:$0xff]  ;;  %v1924_v32 = vpop.f32.mrf.mxu1 }
 0x284   : > { %2174 = vst.msk [vmem:[#allocation4 + $0x20] sm:$0xff] %vm4395_vm4, %v2158_v29  ;;  %v3894_v33 = vpack.c.bf16 %v1968_v26, %v1967_v17  ;;  %v1806_v18 = vadd.f32 %v1805_v30, %v1268_v24  ;;  %v1917_v34 = vadd.f32 %v1916_v2, %v1804_v27  ;;  %2271 = vrot.lane.b32.xlu1 %v4948_v31, %s4268_s14  ;;  %v1969_v38 = vmax.f32 %v1915_v28, 0.0 }
 0x285   : > { %2204 = vrot.lane.b32.xlu0 %v4934_v11, %s4269_s15  ;;  %v1807_v21 = vpop.f32.mrf.mxu0  ;;  %v1926_v36 = vpop.f32.mrf.mxu1 }
 0x286   : > { %v2138_v37 = vld [vmem:[#allocation4 + $0x28] sm:$0xff]  ;;  %2088 = vst.msk [vmem:[#allocation4 + $0x38] sm:$0xff] %vm4395_vm4, %v3894_v33  ;;  %v1970_v39 = vmax.f32 %v1917_v34, 0.0  ;;  %v1808_v40 = vadd.f32 %v1807_v21, %v1268_v24  ;;  %v1919_v41 = vadd.f32 %v1918_v14, %v1806_v18 }
 0x287   : > { %v2159_v42 = vsel %vm4880_vm13, 0, %v2138_v37  ;;  %2110 = vst.msk [vmem:[#allocation4 + $0x38] sm:$0xf] %vm2102_vm10, %v4266_v49  ;;  %v1811_v45 = vpop.f32.mrf.mxu0  ;;  %v4962_v46 = vld [vmem:[#allocation4 + $0x18] sm:$0xff]  ;;  %v1928_v47 = vpop.f32.mrf.mxu1 }
 0x288   : > { %2175 = vst.msk [vmem:[#allocation4 + $0x28] sm:$0xff] %vm4395_vm4, %v2159_v42  ;;  %v3895_v48 = vpack.c.bf16 %v1970_v39, %v1969_v38  ;;  %v1812_v50 = vadd.f32 %v1811_v45, %v4906_v43  ;;  %v1921_v22 = vadd.f32 %v1920_v19, %v1808_v40  ;;  %2206 = vrot.lane.b32.xlu1 %v4948_v31, %s4269_s15  ;;  %v1971_v55 = vmax.f32 %v1919_v41, 0.0 }
 0x289   : > { %2273 = vrot.lane.b32.xlu0 %v4962_v46, %s4268_s14  ;;  %v1813_v51 = vpop.f32.mrf.mxu0  ;;  %v1930_v52 = vpop.f32.mrf.mxu1 }
 0x28a   : > { %v2139_v53 = vld [vmem:[#allocation4 + $0x30] sm:$0xff]  ;;  %2089 = vst.msk [vmem:[#allocation4 + $0x40] sm:$0xff] %vm4395_vm4, %v3895_v48  ;;  %v1972_v56 = vmax.f32 %v1921_v22, 0.0  ;;  %v1814_v59 = vadd.f32 %v1813_v51, %v4906_v43  ;;  %v1925_v54 = vadd.f32 %v1924_v32, %v1812_v50 }
 0x28b   : > { %v2160_v62 = vsel %vm4880_vm13, 0, %v2139_v53  ;;  %2111 = vst.msk [vmem:[#allocation4 + $0x40] sm:$0xf] %vm2102_vm10, %v4266_v49  ;;  %v1815_v63 = vpop.f32.mrf.mxu0  ;;  %v2255_v1 = vld [vmem:[#allocation4 + $0x20] sm:$0xff]  ;;  %v1934_v20 = vpop.f32.mrf.mxu1 }
 0x28c   : > { %2176 = vst.msk [vmem:[#allocation4 + $0x30] sm:$0xff] %vm4395_vm4, %v2160_v62  ;;  %v3896_v2 = vpack.c.bf16 %v1972_v56, %v1971_v55  ;;  %v1816_v3 = vadd.f32 %v1815_v63, %v4920_v61  ;;  %v1927_v4 = vadd.f32 %v1926_v36, %v1814_v59  ;;  %2275 = vrot.lane.b32.xlu1 %v2255_v1, %s4268_s14  ;;  %v1973_v7 = vmax.f32 %v1925_v54, 0.0 }
 0x28d   : > { %2208 = vrot.lane.b32.xlu0 %v4962_v46, %s4269_s15  ;;  %v1817_v43 = vpop.f32.mrf.mxu0  ;;  %v1936_v5 = vpop.f32.mrf.mxu1 }
 0x28e   : > { %v2140_v6 = vld [vmem:[#allocation4 + $0x38] sm:$0xff]  ;;  %2090 = vst.msk [vmem:[#allocation4 + $0x48] sm:$0xff] %vm4395_vm4, %v3896_v2  ;;  %v1974_v8 = vmax.f32 %v1927_v4, 0.0  ;;  %v1818_v9 = vadd.f32 %v1817_v43, %v4920_v61  ;;  %v1929_v10 = vadd.f32 %v1928_v47, %v1816_v3 }
 0x28f   : > { %v2161_v14 = vsel %vm4880_vm13, 0, %v2140_v6  ;;  %2112 = vst.msk [vmem:[#allocation4 + $0x48] sm:$0xf] %vm2102_vm10, %v4266_v49  ;;  %v1821_v57 = vpop.f32.mrf.mxu0  ;;  %v2256_v15 = vld [vmem:[#allocation4 + $0x28] sm:$0xff]  ;;  %v1938_v16 = vpop.f32.mrf.mxu1 }
 0x290   : > { %2177 = vst.msk [vmem:[#allocation4 + $0x38] sm:$0xff] %vm4395_vm4, %v2161_v14  ;;  %v3897_v58 = vpack.c.bf16 %v1974_v8, %v1973_v7  ;;  %v1822_v19 = vadd.f32 %v1821_v57, %v4885_v23  ;;  %v1931_v24 = vadd.f32 %v1930_v52, %v1818_v9  ;;  %2210 = vrot.lane.b32.xlu1 %v2255_v1, %s4269_s15  ;;  %v1975_v26 = vmax.f32 %v1929_v10, 0.0 }
 0x291   : > { %2277 = vrot.lane.b32.xlu0 %v2256_v15, %s4268_s14  ;;  %v1823_v61 = vpop.f32.mrf.mxu0  ;;  %v1940_v25 = vpop.f32.mrf.mxu1 }
 0x292   : > { %v2141_v17 = vld [vmem:[#allocation4 + $0x40] sm:$0xff]  ;;  %2091 = vst.msk [vmem:[#allocation4 + $0x50] sm:$0xff] %vm4395_vm4, %v3897_v58  ;;  %v1976_v27 = vmax.f32 %v1931_v24, 0.0  ;;  %v1824_v28 = vadd.f32 %v1823_v61, %v4885_v23  ;;  %v1935_v29 = vadd.f32 %v1934_v20, %v1822_v19 }
 0x293   : > { %v2162_v30 = vsel %vm4880_vm13, 0, %v2141_v17  ;;  %2113 = vst.msk [vmem:[#allocation4 + $0x50] sm:$0xf] %vm2102_vm10, %v4266_v49  ;;  %v1825_v32 = vpop.f32.mrf.mxu0  ;;  %v2257_v33 = vld [vmem:[#allocation4 + $0x30] sm:$0xff]  ;;  %v1944_v18 = vpop.f32.mrf.mxu1 }
 0x294   : > { %2178 = vst.msk [vmem:[#allocation4 + $0x40] sm:$0xff] %vm4395_vm4, %v2162_v30  ;;  %v3898_v34 = vpack.c.bf16 %v1976_v27, %v1975_v26  ;;  %v1826_v21 = vadd.f32 %v1825_v32, %v4897_v35  ;;  %v1937_v36 = vadd.f32 %v1936_v5, %v1824_v28  ;;  %2279 = vrot.lane.b32.xlu1 %v2257_v33, %s4268_s14  ;;  %v1977_v39 = vmax.f32 %v1935_v29, 0.0 }
 0x295   : > { %2212 = vrot.lane.b32.xlu0 %v2256_v15, %s4269_s15  ;;  %v1827_v23 = vpop.f32.mrf.mxu0  ;;  %v1946_v37 = vpop.f32.mrf.mxu1 }
 0x296   : > { %v2142_v38 = vld [vmem:[#allocation4 + $0x48] sm:$0xff]  ;;  %2092 = vst.msk [vmem:[#allocation4 + $0x58] sm:$0xff] %vm4395_vm4, %v3898_v34  ;;  %v1978_v40 = vmax.f32 %v1937_v36, 0.0  ;;  %v1828_v41 = vadd.f32 %v1827_v23, %v4897_v35  ;;  %v1939_v42 = vadd.f32 %v1938_v16, %v1826_v21  ;;  %v4145_v36 = vld [vmem:[%s5408_s4 + $0x4] ss:$8 sps:$4 sm:$0xff]  }
 0x297   : > { %v2163_v45 = vsel %vm4880_vm13, 0, %v2142_v38  ;;  %2114 = vst.msk [vmem:[#allocation4 + $0x58] sm:$0xf] %vm2102_vm10, %v4266_v49  ;;  %v1831_v47 = vpop.f32.mrf.mxu0  ;;  %v5015_v48 = vld [vmem:[#allocation4 + $0x38] sm:$0xff]  ;;  %v1948_v52 = vpop.f32.mrf.mxu1  ;;  %3800 = vmatprep.mubr.msk.bf16.mxu1 %vm2865_vm14, %v4145_v36  ;;  %v2690_v38 = vld [vmem:[%s5409_s5 + $0x10] sm:$0xff] }
 0x298   : > { %2179 = vst.msk [vmem:[#allocation4 + $0x48] sm:$0xff] %vm4395_vm4, %v2163_v45  ;;  %v3899_v50 = vpack.c.bf16 %v1978_v40, %v1977_v39  ;;  %v1832_v22 = vadd.f32 %v1831_v47, %v4872_v0  ;;  %v1941_v51 = vadd.f32 %v1940_v25, %v1828_v41  ;;  %2340 = vrot.lane.b32.xlu1 %v2255_v1, %s4270_s17  ;;  %v1979_v55 = vmax.f32 %v1939_v42, 0.0  ;;  %v4176_v23 = vld [vmem:[%s5410_s6 + $0x4] ss:$12 sps:$4 sm:$0xff]   ;;  %v2689_v39 = vld [vmem:[%s5409_s5 + $0x8] sm:$0xff]  ;;  %v2691_v47 = vld [vmem:[%s5409_s5 + $0x18] sm:$0xff] }
 0x299   : > { %2281 = vrot.lane.b32.xlu0 %v5015_v48, %s4268_s14  ;;  %v1833_v35 = vpop.f32.mrf.mxu0  ;;  %v1950_v4 = vpop.f32.mrf.mxu1  ;;  %3316 = vmatprep.mubr.bf16.mxu0 %v4176_v23  ;;  %v2692_v45 = vld [vmem:[%s5409_s5 + $0x20] sm:$0xff] }
 0x29a   : > { %v2143_v53 = vld [vmem:[#allocation4 + $0x50] sm:$0xff]  ;;  %2093 = vst.msk [vmem:[#allocation4 + $0x60] sm:$0xff] %vm4395_vm4, %v3899_v50  ;;  %v1980_v56 = vmax.f32 %v1941_v51, 0.0  ;;  %v1834_v59 = vadd.f32 %v1833_v35, %v4872_v0  ;;  %v1945_v54 = vadd.f32 %v1944_v18, %v1832_v22 }
 0x29b   : > { %v2164_v62 = vsel %vm4880_vm13, 0, %v2143_v53  ;;  %2115 = vst.msk [vmem:[#allocation4 + $0x60] sm:$0xf] %vm2102_vm10, %v4266_v49  ;;  %v1835_v63 = vpop.f32.mrf.mxu0  ;;  %v2381_v1 = vld [vmem:[#allocation4 + $0x40] sm:$0xf]  ;;  %v2694_v53 = vld [vmem:[%s5409_s5 + $0x30] sm:$0xff] }
 0x29c   : > { %2180 = vst.msk [vmem:[#allocation4 + $0x50] sm:$0xff] %vm4395_vm4, %v2164_v62  ;;  %v3900_v20 = vpack.c.bf16 %v1980_v56, %v1979_v55  ;;  %v1836_v2 = vadd.f32 %v1835_v63, %v4878_v12  ;;  %v1947_v3 = vadd.f32 %v1946_v37, %v1834_v59  ;;  %2214 = vrot.lane.b32.xlu1 %v2257_v33, %s4269_s15  ;;  %2389 = vst [vmem:[#allocation5 + $0x60] sm:$0xf] %v2381_v1  ;;  %v2525_v17 = vld [vmem:[#allocation4 + $0x40] sm:$0xff]  ;;  %v2688_v37 = vld [vmem:[%s5409_s5] sm:$0xff] }
 0x29d   : > { %2342 = vrot.lane.b32.xlu0 %v2256_v15, %s4270_s17  ;;  %v1837_v0 = vpop.f32.mrf.mxu0  ;;  %v1981_v5 = vmax.f32 %v1945_v54, 0.0  ;;  %v2693_v55 = vld [vmem:[%s5409_s5 + $0x28] sm:$0xff] }
 0x29e   : > { %v2144_v43 = vld [vmem:[#allocation4 + $0x58] sm:$0xff]  ;;  %2094 = vst.msk [vmem:[#allocation4 + $0x68] sm:$0xff] %vm4395_vm4, %v3900_v20  ;;  %v1982_v6 = vmax.f32 %v1947_v3, 0.0  ;;  %v1838_v7 = vadd.f32 %v1837_v0, %v4878_v12  ;;  %v1949_v8 = vadd.f32 %v1948_v52, %v1836_v2  ;;  %v2695_v2 = vld [vmem:[%s5409_s5 + $0x38] sm:$0xff] }
 0x29f   : > { %v2165_v9 = vsel %vm4880_vm13, 0, %v2144_v43  ;;  %2116 = vst.msk [vmem:[#allocation4 + $0x68] sm:$0xf] %vm2102_vm10, %v4266_v49  ;;  %v2382_v10 = vld [vmem:[#allocation4 + $0x48] sm:$0xf]  ;;  %v2696_v20 = vld [vmem:[%s5409_s5 + $0x40] sm:$0xff] }
 0x2a0   : > { %2181 = vst.msk [vmem:[#allocation4 + $0x58] sm:$0xff] %vm4395_vm4, %v2165_v9  ;;  %v3901_v14 = vpack.c.bf16 %v1982_v6, %v1981_v5  ;;  %v1951_v57 = vadd.f32 %v1950_v4, %v1838_v7  ;;  %2344 = vrot.lane.b32.xlu1 %v2257_v33, %s4270_s17  ;;  %2390 = vst [vmem:[#allocation5 + $0x64] sm:$0xf] %v2382_v10  ;;  %v1983_v15 = vmax.f32 %v1949_v8, 0.0  ;;  %v2526_v27 = vld [vmem:[#allocation4 + $0x48] sm:$0xff]  ;;  %v3014_v5 = vld [vmem:[%s5411_s7] sm:$0xff] }
 0x2a1   : > { %2338 = vrot.lane.b32.xlu0 %v4962_v46, %s4270_s17  ;;  %v2697_v8 = vld [vmem:[%s5409_s5 + $0x48] sm:$0xff] }
 0x2a2   : > { %v2145_v12 = vld [vmem:[#allocation4 + $0x60] sm:$0xff]  ;;  %2095 = vst.msk [vmem:[#allocation4 + $0x70] sm:$0xff] %vm4395_vm4, %v3901_v14  ;;  %v1984_v16 = vmax.f32 %v1951_v57, 0.0 }
 0x2a3   : > { %v2166_v58 = vsel %vm4880_vm13, 0, %v2145_v12  ;;  %2117 = vst.msk [vmem:[#allocation4 + $0x70] sm:$0xf] %vm2102_vm10, %v4266_v49  ;;  %v2383_v19 = vld [vmem:[#allocation4 + $0x50] sm:$0xf]  ;;  %v3016_v12 = vld [vmem:[%s5411_s7 + $0x10] sm:$0xff] }
 0x2a4   : > { %2182 = vst.msk [vmem:[#allocation4 + $0x60] sm:$0xff] %vm4395_vm4, %v2166_v58  ;;  %v3902_v24 = vpack.c.bf16 %v1984_v16, %v1983_v15  ;;  %2336 = vrot.lane.b32.xlu1 %v4948_v31, %s4270_s17  ;;  %2391 = vst [vmem:[#allocation5 + $0x68] sm:$0xf] %v2383_v19  ;;  %v2527_v29 = vld [vmem:[#allocation4 + $0x50] sm:$0xff]  ;;  %v3015_v58 = vld [vmem:[%s5411_s7 + $0x8] sm:$0xff] }
 0x2a5   : > { %2334 = vrot.lane.b32.xlu0 %v4934_v11, %s4270_s17 }
 0x2a6   : > { %v2146_v46 = vld [vmem:[#allocation4 + $0x68] sm:$0xff]  ;;  %2096 = vst.msk [vmem:[#allocation4 + $0x78] sm:$0xff] %vm4395_vm4, %v3902_v24 }
 0x2a7   : > { %v2167_v61 = vsel %vm4880_vm13, 0, %v2146_v46  ;;  %2118 = vst.msk [vmem:[#allocation4 + $0x78] sm:$0xf] %vm2102_vm10, %v4266_v49  ;;  %v2384_v25 = vld [vmem:[#allocation4 + $0x58] sm:$0xf] }
 0x2a8   : > { %2183 = vst.msk [vmem:[#allocation4 + $0x68] sm:$0xff] %vm4395_vm4, %v2167_v61  ;;  %2332 = vrot.lane.b32.xlu1 %v4918_v60, %s4270_s17  ;;  %2392 = vst [vmem:[#allocation5 + $0x6c] sm:$0xf] %v2384_v25  ;;  %v2528_v32 = vld [vmem:[#allocation4 + $0x58] sm:$0xff] }
 0x2a9   : > { %2216 = vrot.lane.b32.xlu0 %v5015_v48, %s4269_s15  ;;  %v3018_v25 = vld [vmem:[%s5411_s7 + $0x20] sm:$0xff] }
 0x2aa   : > { %v2147_v11 = vld [vmem:[#allocation4 + $0x70] sm:$0xff] }
 0x2ab   : > { %v2168_v31 = vsel %vm4880_vm13, 0, %v2147_v11  ;;  %v2385_v26 = vld [vmem:[#allocation4 + $0x60] sm:$0xf] }
 0x2ac   : > { %2184 = vst.msk [vmem:[#allocation4 + $0x70] sm:$0xff] %vm4395_vm4, %v2168_v31  ;;  %2541 = vrot.lane.b32.xlu1 %v2525_v17, %s4270_s17  ;;  %2393 = vst [vmem:[#allocation5 + $0x70] sm:$0xf] %v2385_v26  ;;  %v2529_v18 = vld [vmem:[#allocation4 + $0x60] sm:$0xff] }
 0x2ad   : > { %2346 = vrot.lane.b32.xlu0 %v5015_v48, %s4270_s17 }
 0x2ae   : > { %v2148_v60 = vld [vmem:[#allocation4 + $0x78] sm:$0xff] }
 0x2af   : > { %v2169_v28 = vsel %vm4880_vm13, 0, %v2148_v60  ;;  %v2386_v30 = vld [vmem:[#allocation4 + $0x68] sm:$0xf] }
 0x2b0   : > { %2185 = vst.msk [vmem:[#allocation4 + $0x78] sm:$0xff] %vm4395_vm4, %v2169_v28  ;;  %2545 = vrot.lane.b32.xlu1 %v2527_v29, %s4270_s17  ;;  %2394 = vst [vmem:[#allocation5 + $0x74] sm:$0xf] %v2386_v30  ;;  %v2530_v44 = vld [vmem:[#allocation4 + $0x68] sm:$0xff] }
 0x2b1   : > { %2543 = vrot.lane.b32.xlu0 %v2526_v27, %s4270_s17 }
 0x2b3   : > { %v2387_v33 = vld [vmem:[#allocation4 + $0x70] sm:$0xf] }
 0x2b4   : > { %2417 = vrot.lane.b32.xlu1 %v2527_v29, %s4269_s15  ;;  %2395 = vst [vmem:[#allocation5 + $0x78] sm:$0xf] %v2387_v33  ;;  %v2531_v34 = vld [vmem:[#allocation4 + $0x70] sm:$0xff]  ;;  %v3019_v33 = vld [vmem:[%s5411_s7 + $0x28] sm:$0xff] }
 0x2b5   : > { %2547 = vrot.lane.b32.xlu0 %v2528_v32, %s4270_s17 }
 0x2b7   : > { %v2388_v13 = vld [vmem:[#allocation4 + $0x78] sm:$0xf] }
 0x2b8   : > { %2549 = vrot.lane.b32.xlu1 %v2529_v18, %s4270_s17  ;;  %2396 = vst [vmem:[#allocation5 + $0x7c] sm:$0xf] %v2388_v13  ;;  %v2532_v21 = vld [vmem:[#allocation4 + $0x78] sm:$0xff] }
 0x2b9   : > { %2419 = vrot.lane.b32.xlu0 %v2528_v32, %s4269_s15 }
 0x2bc   : > { %2421 = vrot.lane.b32.xlu1 %v2529_v18, %s4269_s15 }
 0x2bd   : > { %2551 = vrot.lane.b32.xlu0 %v2530_v44, %s4270_s17 }
 0x2c0   : > { %2553 = vrot.lane.b32.xlu1 %v2531_v34, %s4270_s17 }
 0x2c1   : > { %2423 = vrot.lane.b32.xlu0 %v2530_v44, %s4269_s15 }
 0x2c4   : > { %2425 = vrot.lane.b32.xlu1 %v2531_v34, %s4269_s15 }
 0x2c5   : > { %2555 = vrot.lane.b32.xlu0 %v2532_v21, %s4270_s17 }
 0x2c8   : > { %2413 = vrot.lane.b32.xlu1 %v2525_v17, %s4269_s15 }
 0x2c9   : > { %2427 = vrot.lane.b32.xlu0 %v2532_v21, %s4269_s15 }
 0x2cc   : > { %2489 = vrot.lane.b32.xlu1 %v2531_v34, %s4268_s14 }
 0x2cd   : > { %2415 = vrot.lane.b32.xlu0 %v2526_v27, %s4269_s15 }
 0x2d0   : > { %2485 = vrot.lane.b32.xlu1 %v2529_v18, %s4268_s14 }
 0x2d1   : > { %2487 = vrot.lane.b32.xlu0 %v2530_v44, %s4268_s14 }
 0x2d4   : > { %2617 = vrot.lane.b32.xlu1 %v2531_v34, %s4261_s16 }
 0x2d5   : > { %2483 = vrot.lane.b32.xlu0 %v2528_v32, %s4268_s14 }
 0x2d8   : > { %2481 = vrot.lane.b32.xlu1 %v2527_v29, %s4268_s14 }
 0x2d9   : > { %2491 = vrot.lane.b32.xlu0 %v2532_v21, %s4268_s14 }
 0x2dc   : > { %2613 = vrot.lane.b32.xlu1 %v2529_v18, %s4261_s16 }
 0x2dd   : > { %2615 = vrot.lane.b32.xlu0 %v2530_v44, %s4261_s16 }
 0x2e0   : > { %2477 = vrot.lane.b32.xlu1 %v2525_v17, %s4268_s14 }
 0x2e1   : > { %2619 = vrot.lane.b32.xlu0 %v2532_v21, %s4261_s16  ;;  %v3022_v21 = vld [vmem:[%s5411_s7 + $0x40] sm:$0xff] }
 0x2e4   : > { %2609 = vrot.lane.b32.xlu1 %v2527_v29, %s4261_s16  ;;  %v3020_v29 = vld [vmem:[%s5411_s7 + $0x30] sm:$0xff] }
 0x2e5   : > { %2479 = vrot.lane.b32.xlu0 %v2526_v27, %s4268_s14 }
 0x2e8   : > { %2605 = vrot.lane.b32.xlu1 %v2525_v17, %s4261_s16  ;;  %v3017_v17 = vld [vmem:[%s5411_s7 + $0x18] sm:$0xff] }
 0x2e9   : > { %2611 = vrot.lane.b32.xlu0 %v2528_v32, %s4261_s16 }
 0x2ec   : > { %2700 = vperm.xlu1 %4024, %v2688_v37   ;;  %v3021_v37 = vld [vmem:[%s5411_s7 + $0x38] sm:$0xff] }
 0x2ed   : > { %2607 = vrot.lane.b32.xlu0 %v2526_v27, %s4261_s16 }
 0x2ee   : > { %v2268_v40 = vpop.permute.xlu1 %2267 }
 0x2ef   : > { %v2283_v41 = vrot.slane %v2268_v40, 4 }
 0x2f0   : > { %2710 = vperm.xlu1 %4024, %v2690_v38  }
 0x2f1   : > { %2705 = vperm.xlu0 %4023, %v2689_v39   ;;  %v2292_v42 = vsel %vm2291_vm15, %v2268_v40, %v2283_v41 }
 0x2f2   : > { %2308 = vst [vmem:[#allocation5 + $0x20] sm:$0xf] %v2292_v42  ;;  %v2203_v48 = vpop.permute.xlu1 %2202 }
 0x2f3   : > { %v2270_v50 = vpop.permute.xlu0 %2269  ;;  %v2218_v22 = vrot.slane %v2203_v48, 4 }
 0x2f4   : > { %v2284_v51 = vrot.slane %v2270_v50, 4  ;;  %2720 = vperm.xlu1 %4024, %v2692_v45  }
 0x2f5   : > { %2715 = vperm.xlu0 %4023, %v2691_v47   ;;  %v2227_v35 = vsel %vm2226_vm0, %v2203_v48, %v2218_v22  ;;  %v3023_v47 = vld [vmem:[%s5411_s7 + $0x48] sm:$0xff] }
 0x2f6   : > { %v2293_v52 = vsel %vm2291_vm15, %v2270_v50, %v2284_v51  ;;  %2243 = vst [vmem:[#allocation5] sm:$0xf] %v2227_v35  ;;  %v2272_v56 = vpop.permute.xlu1 %2271 }
 0x2f7   : > { %2309 = vst [vmem:[#allocation5 + $0x24] sm:$0xf] %v2293_v52  ;;  %v2205_v59 = vpop.permute.xlu0 %2204  ;;  %v2285_v54 = vrot.slane %v2272_v56, 4 }
 0x2f8   : > { %v2219_v62 = vrot.slane %v2205_v59, 4  ;;  %2730 = vperm.xlu1 %4024, %v2694_v53  }
 0x2f9   : > { %2725 = vperm.xlu0 %4023, %v2693_v55   ;;  %v2294_v63 = vsel %vm2291_vm15, %v2272_v56, %v2285_v54 }
 0x2fa   : > { %v2228_v1 = vsel %vm2226_vm0, %v2205_v59, %v2219_v62  ;;  %2310 = vst [vmem:[#allocation5 + $0x28] sm:$0xf] %v2294_v63  ;;  %v2207_v3 = vpop.permute.xlu1 %2206 }
 0x2fb   : > { %2244 = vst [vmem:[#allocation5 + $0x4] sm:$0xf] %v2228_v1  ;;  %v2274_v0 = vpop.permute.xlu0 %2273  ;;  %v2220_v4 = vrot.slane %v2207_v3, 4 }
 0x2fc   : > { %v2286_v43 = vrot.slane %v2274_v0, 4  ;;  %2740 = vperm.xlu1 %4024, %v2696_v20  }
 0x2fd   : > { %2735 = vperm.xlu0 %4023, %v2695_v2   ;;  %v2229_v6 = vsel %vm2226_vm0, %v2207_v3, %v2220_v4 }
 0x2fe   : > { %v2295_v7 = vsel %vm2291_vm15, %v2274_v0, %v2286_v43  ;;  %2245 = vst [vmem:[#allocation5 + $0x8] sm:$0xf] %v2229_v6  ;;  %v2276_v9 = vpop.permute.xlu1 %2275 }
 0x2ff   : > { %2311 = vst [vmem:[#allocation5 + $0x2c] sm:$0xf] %v2295_v7  ;;  %v2209_v10 = vpop.permute.xlu0 %2208  ;;  %v2287_v14 = vrot.slane %v2276_v9, 4 }
 0x300   : > { %v2221_v57 = vrot.slane %v2209_v10, 4  ;;  %3026 = vperm.xlu1 %4024, %v3014_v5  }
 0x301   : > { %2745 = vperm.xlu0 %4023, %v2697_v8   ;;  %v2296_v15 = vsel %vm2291_vm15, %v2276_v9, %v2287_v14 }
 0x302   : > { %v2230_v16 = vsel %vm2226_vm0, %v2209_v10, %v2221_v57  ;;  %2312 = vst [vmem:[#allocation5 + $0x30] sm:$0xf] %v2296_v15  ;;  %v2211_v19 = vpop.permute.xlu1 %2210  ;;  %v4133_v57 = vld [vmem:[#allocation5 + $0x20] sm:$0xff]  }
 0x303   : > { %2246 = vst [vmem:[#allocation5 + $0xc] sm:$0xf] %v2230_v16  ;;  %v2278_v24 = vpop.permute.xlu0 %2277  ;;  %v2222_v46 = vrot.slane %v2211_v19, 4 }
 0x304   : > { %v2288_v61 = vrot.slane %v2278_v24, 4  ;;  %3036 = vperm.xlu1 %4024, %v3016_v12  }
 0x305   : > { %3031 = vperm.xlu0 %4023, %v3015_v58   ;;  %v2231_v11 = vsel %vm2226_vm0, %v2211_v19, %v2222_v46 }
 0x306   : > { %v2297_v31 = vsel %vm2291_vm15, %v2278_v24, %v2288_v61  ;;  %2247 = vst [vmem:[#allocation5 + $0x10] sm:$0xf] %v2231_v11  ;;  %v2280_v26 = vpop.permute.xlu1 %2279  ;;  %v4132_v5 = vld [vmem:[#allocation5 + $0x28] sm:$0xff]  }
 0x307   : > { %2313 = vst [vmem:[#allocation5 + $0x34] sm:$0xf] %v2297_v31  ;;  %v2213_v60 = vpop.permute.xlu0 %2212  ;;  %v2289_v27 = vrot.slane %v2280_v26, 4 }
 0x308   : > { %v2223_v28 = vrot.slane %v2213_v60, 4  ;;  %3046 = vperm.xlu1 %4024, %v3018_v25  }
 0x309   : > { %3041 = vperm.xlu0 %4023, %v3017_v17   ;;  %v2298_v30 = vsel %vm2291_vm15, %v2280_v26, %v2289_v27 }
 0x30a   : > { %v2232_v32 = vsel %vm2226_vm0, %v2213_v60, %v2223_v28  ;;  %2314 = vst [vmem:[#allocation5 + $0x38] sm:$0xf] %v2298_v30  ;;  %v2341_v18 = vpop.permute.xlu1 %2340 }
 0x30b   : > { %2248 = vst [vmem:[#allocation5 + $0x14] sm:$0xf] %v2232_v32  ;;  %v2282_v13 = vpop.permute.xlu0 %2281  ;;  %v2352_v44 = vrot.slane %v2341_v18, 4 }
 0x30c   : > { %v2290_v34 = vrot.slane %v2282_v13, 4  ;;  %3056 = vperm.xlu1 %4024, %v3020_v29  }
 0x30d   : > { %3051 = vperm.xlu0 %4023, %v3019_v33   ;;  %v2361_v36 = vsel %vm2356_vm1, %v2341_v18, %v2352_v44  ;;  %v4136_v18 = vld [vmem:[#allocation5 + $0x8] sm:$0xff]  }
 0x30e   : > { %v2299_v23 = vsel %vm2291_vm15, %v2282_v13, %v2290_v34  ;;  %2377 = vst [vmem:[#allocation5 + $0x50] sm:$0xf] %v2361_v36  ;;  %v2215_v38 = vpop.permute.xlu1 %2214  ;;  %v4131_v1 = vld [vmem:[#allocation5 + $0x30] sm:$0xff]  }
 0x30f   : > { %2315 = vst [vmem:[#allocation5 + $0x3c] sm:$0xf] %v2299_v23  ;;  %v2343_v39 = vpop.permute.xlu0 %2342  ;;  %v2224_v40 = vrot.slane %v2215_v38, 4 }
 0x310   : > { %v2353_v41 = vrot.slane %v2343_v39, 4  ;;  %3066 = vperm.xlu1 %4024, %v3022_v21  }
 0x311   : > { %3061 = vperm.xlu0 %4023, %v3021_v37   ;;  %v2233_v42 = vsel %vm2226_vm0, %v2215_v38, %v2224_v40  ;;  %v4137_v37 = vld [vmem:[#allocation5] sm:$0xff]  }
 0x312   : > { %v2362_v45 = vsel %vm2356_vm1, %v2343_v39, %v2353_v41  ;;  %2249 = vst [vmem:[#allocation5 + $0x18] sm:$0xf] %v2233_v42  ;;  %v2345_v48 = vpop.permute.xlu1 %2344  ;;  %v4135_v60 = vld [vmem:[#allocation5 + $0x10] sm:$0xff]  }
 0x313   : > { %2378 = vst [vmem:[#allocation5 + $0x54] sm:$0xf] %v2362_v45  ;;  %v2339_v50 = vpop.permute.xlu0 %2338  ;;  %v2354_v22 = vrot.slane %v2345_v48, 4 }
 0x314   : > { %v2351_v51 = vrot.slane %v2339_v50, 4 }
 0x315   : > { %3071 = vperm.xlu0 %4023, %v3023_v47   ;;  %v2363_v35 = vsel %vm2356_vm1, %v2345_v48, %v2354_v22 }
 0x316   : > { %v2360_v52 = vsel %vm2356_vm1, %v2339_v50, %v2351_v51  ;;  %v4130_v53 = vld [vmem:[#allocation5 + $0x38] sm:$0xff]   ;;  %2379 = vst [vmem:[#allocation5 + $0x58] sm:$0xf] %v2363_v35  ;;  %v2337_v55 = vpop.permute.xlu1 %2336 }
 0x317   : > { %2376 = vst [vmem:[#allocation5 + $0x4c] sm:$0xf] %v2360_v52  ;;  %v2335_v56 = vpop.permute.xlu0 %2334  ;;  %v2350_v59 = vrot.slane %v2337_v55, 4  ;;  %2882 = vmatpush1.bf16.msra.mxu1 %v4130_v53 }
 0x318   : > { %v2349_v54 = vrot.slane %v2335_v56, 4  ;;  %2883 = vmatprep.subr.bf16.mxu1 %v4266_v49 }
 0x319   : > { %v2359_v62 = vsel %vm2356_vm1, %v2337_v55, %v2350_v59 }
 0x31a   : > { %v2358_v63 = vsel %vm2356_vm1, %v2335_v56, %v2349_v54  ;;  %2375 = vst [vmem:[#allocation5 + $0x48] sm:$0xf] %v2359_v62  ;;  %v2333_v20 = vpop.permute.xlu1 %2332  ;;  %v4139_v53 = vld [vmem:[#allocation5 + $0x50] sm:$0xff]  }
 0x31b   : > { %2374 = vst [vmem:[#allocation5 + $0x44] sm:$0xf] %v2358_v63  ;;  %v2217_v2 = vpop.permute.xlu0 %2216  ;;  %v2348_v3 = vrot.slane %v2333_v20, 4  ;;  %2884 = vmatpush1.bf16.msra.mxu1 %v4131_v1 }
 0x31c   : > { %v2225_v0 = vrot.slane %v2217_v2, 4  ;;  %2885 = vmatprep.subr.bf16.mxu1 %v4266_v49 }
 0x31d   : > { %v2357_v4 = vsel %vm2356_vm1, %v2333_v20, %v2348_v3 }
 0x31e   : > { %v2234_v43 = vsel %vm2226_vm0, %v2217_v2, %v2225_v0  ;;  %2373 = vst [vmem:[#allocation5 + $0x40] sm:$0xf] %v2357_v4  ;;  %v2542_v6 = vpop.permute.xlu1 %2541 }
 0x31f   : > { %2250 = vst [vmem:[#allocation5 + $0x1c] sm:$0xf] %v2234_v43  ;;  %v2347_v7 = vpop.permute.xlu0 %2346  ;;  %v2557_v8 = vrot.slane %v2542_v6, 4  ;;  %2886 = vmatpush1.bf16.msra.mxu1 %v4132_v5 }
 0x320   : > { %v2355_v9 = vrot.slane %v2347_v7, 4  ;;  %2887 = vmatprep.subr.bf16.mxu1 %v4266_v49 }
 0x321   : > { %v2565_v10 = vsel %vm2356_vm1, %v2542_v6, %v2557_v8  ;;  %v4140_v1 = vld [vmem:[#allocation5 + $0x48] sm:$0xff]  }
 0x322   : > { %v2364_v14 = vsel %vm2356_vm1, %v2347_v7, %v2355_v9  ;;  %2581 = vst [vmem:[#allocation5 + $0xc0] sm:$0xf] %v2565_v10  ;;  %v2546_v12 = vpop.permute.xlu1 %2545  ;;  %v4143_v9 = vld [vmem:[%s5408_s4] ss:$8 sps:$4 sm:$0xff]  }
 0x323   : > { %2380 = vst [vmem:[#allocation5 + $0x5c] sm:$0xf] %v2364_v14  ;;  %v2544_v15 = vpop.permute.xlu0 %2543  ;;  %v2559_v16 = vrot.slane %v2546_v12, 4  ;;  %2888 = vmatpush1.bf16.msra.mxu1 %v4133_v57  ;;  %v4271_v57 = vmov 0.0  }
 0x324   : > { %v2558_v58 = vrot.slane %v2544_v15, 4  ;;  %2889 = vmatprep.subr.bf16.mxu1 %v4266_v49 }
 0x325   : > { %v2567_v19 = vsel %vm2356_vm1, %v2546_v12, %v2559_v16  ;;  %v4141_v4 = vld [vmem:[#allocation5 + $0x40] sm:$0xff]  }
 0x326   : > { %v2566_v24 = vsel %vm2356_vm1, %v2544_v15, %v2558_v58  ;;  %v4134_v46 = vld [vmem:[#allocation5 + $0x18] sm:$0xff]   ;;  %2583 = vst [vmem:[#allocation5 + $0xc8] sm:$0xf] %v2567_v19  ;;  %v2418_v61 = vpop.permute.xlu1 %2417 }
 0x327   : > { %2582 = vst [vmem:[#allocation5 + $0xc4] sm:$0xf] %v2566_v24  ;;  %v2548_v25 = vpop.permute.xlu0 %2547  ;;  %v2431_v11 = vrot.slane %v2418_v61, 4  ;;  %2890 = vmatpush1.bf16.msra.mxu1 %v4134_v46 }
 0x328   : > { %v2560_v31 = vrot.slane %v2548_v25, 4  ;;  %2891 = vmatprep.subr.bf16.mxu1 %v4266_v49 }
 0x329   : > { %v2439_v17 = vsel %vm2226_vm0, %v2418_v61, %v2431_v11 }
 0x32a   : > { %v2568_v26 = vsel %vm2356_vm1, %v2548_v25, %v2560_v31  ;;  %2455 = vst [vmem:[#allocation5 + $0x88] sm:$0xf] %v2439_v17  ;;  %v2550_v27 = vpop.permute.xlu1 %2549  ;;  %v4138_v47 = vld [vmem:[#allocation5 + $0x58] sm:$0xff]  }
 0x32b   : > { %2584 = vst [vmem:[#allocation5 + $0xcc] sm:$0xf] %v2568_v26  ;;  %v2420_v28 = vpop.permute.xlu0 %2419  ;;  %v2561_v29 = vrot.slane %v2550_v27, 4  ;;  %2892 = vmatpush1.bf16.msra.mxu1 %v4135_v60 }
 0x32c   : > { %v2432_v30 = vrot.slane %v2420_v28, 4  ;;  %2893 = vmatprep.subr.bf16.mxu1 %v4266_v49 }
 0x32d   : > { %v2569_v32 = vsel %vm2356_vm1, %v2550_v27, %v2561_v29  ;;  %v4152_v27 = vld [vmem:[%s5408_s4 + $0x10] ss:$8 sps:$4 sm:$0xff]  }
 0x32e   : > { %v2440_v33 = vsel %vm2226_vm0, %v2420_v28, %v2432_v30  ;;  %2585 = vst [vmem:[#allocation5 + $0xd0] sm:$0xf] %v2569_v32  ;;  %v2422_v13 = vpop.permute.xlu1 %2421  ;;  %v4156_v30 = vld [vmem:[%s5408_s4 + $0x24] ss:$8 sps:$4 sm:$0xff]  }
 0x32f   : > { %2456 = vst [vmem:[#allocation5 + $0x8c] sm:$0xf] %v2440_v33  ;;  %v2552_v44 = vpop.permute.xlu0 %2551  ;;  %v2433_v34 = vrot.slane %v2422_v13, 4  ;;  %2894 = vmatpush1.bf16.msra.mxu1 %v4136_v18 }
 0x330   : > { %v2562_v21 = vrot.slane %v2552_v44, 4  ;;  %2895 = vmatprep.subr.bf16.mxu1 %v4266_v49 }
 0x331   : > { %v2441_v36 = vsel %vm2226_vm0, %v2422_v13, %v2433_v34  ;;  %v4154_v34 = vld [vmem:[#allocation5 + $0xc0] sm:$0xff]  }
 0x332   : > { %v2570_v23 = vsel %vm2356_vm1, %v2552_v44, %v2562_v21  ;;  %2457 = vst [vmem:[#allocation5 + $0x90] sm:$0xf] %v2441_v36  ;;  %v2554_v38 = vpop.permute.xlu1 %2553  ;;  %v4149_v60 = vld [vmem:[#allocation5 + $0xc8] sm:$0xff]  }
 0x333   : > { %2586 = vst [vmem:[#allocation5 + $0xd4] sm:$0xf] %v2570_v23  ;;  %v2424_v39 = vpop.permute.xlu0 %2423  ;;  %v2563_v40 = vrot.slane %v2554_v38, 4  ;;  %2896 = vmatpush1.bf16.msra.mxu1 %v4137_v37 }
 0x334   : > { %v2434_v41 = vrot.slane %v2424_v39, 4  ;;  %2905 = vmatprep.subr.bf16.mxu1 %v4266_v49 }
 0x335   : > { %v2571_v42 = vsel %vm2356_vm1, %v2554_v38, %v2563_v40 }
 0x336   : > { %v2442_v45 = vsel %vm2226_vm0, %v2424_v39, %v2434_v41  ;;  %2587 = vst [vmem:[#allocation5 + $0xd8] sm:$0xf] %v2571_v42  ;;  %v2426_v48 = vpop.permute.xlu1 %2425  ;;  %v4153_v18 = vld [vmem:[#allocation5 + $0x88] sm:$0xff]   ;;  %v4158_v41 = vld [vmem:[%s5408_s4 + $0x20] ss:$8 sps:$4 sm:$0xff]  }
 0x337   : > { %2458 = vst [vmem:[#allocation5 + $0x94] sm:$0xf] %v2442_v45  ;;  %v2556_v50 = vpop.permute.xlu0 %2555  ;;  %v2435_v22 = vrot.slane %v2426_v48, 4  ;;  %2906 = vmatpush2.bf16.msra.mxu1 %v4138_v47  ;;  %v4163_v47 = vld [vmem:[%s5408_s4 + $0x34] ss:$8 sps:$4 sm:$0xff]  }
 0x338   : > { %v2564_v51 = vrot.slane %v2556_v50, 4  ;;  %2907 = vmatprep.subr.bf16.mxu1 %v4266_v49 }
 0x339   : > { %v2443_v35 = vsel %vm2226_vm0, %v2426_v48, %v2435_v22 }
 0x33a   : > { %v2572_v52 = vsel %vm2356_vm1, %v2556_v50, %v2564_v51  ;;  %2459 = vst [vmem:[#allocation5 + $0x98] sm:$0xf] %v2443_v35  ;;  %v2414_v55 = vpop.permute.xlu1 %2413  ;;  %v4147_v24 = vld [vmem:[#allocation5 + $0xd0] sm:$0xff]  }
 0x33b   : > { %2588 = vst [vmem:[#allocation5 + $0xdc] sm:$0xf] %v2572_v52  ;;  %v2428_v56 = vpop.permute.xlu0 %2427  ;;  %v2429_v59 = vrot.slane %v2414_v55, 4  ;;  %2908 = vmatpush2.bf16.msra.mxu1 %v4139_v53  ;;  %v4160_v52 = vld [vmem:[#allocation5 + $0x78] sm:$0xff]  }
 0x33c   : > { %v2436_v54 = vrot.slane %v2428_v56, 4  ;;  %2909 = vmatprep.subr.bf16.mxu1 %v4266_v49 }
 0x33d   : > { %v2437_v62 = vsel %vm2226_vm0, %v2414_v55, %v2429_v59 }
 0x33e   : > { %v2444_v63 = vsel %vm2226_vm0, %v2428_v56, %v2436_v54  ;;  %2453 = vst [vmem:[#allocation5 + $0x80] sm:$0xf] %v2437_v62  ;;  %v2490_v20 = vpop.permute.xlu1 %2489  ;;  %v4148_v31 = vld [vmem:[#allocation5 + $0x90] sm:$0xff]  }
 0x33f   : > { %2460 = vst [vmem:[#allocation5 + $0x9c] sm:$0xf] %v2444_v63  ;;  %v2416_v2 = vpop.permute.xlu0 %2415  ;;  %v2499_v3 = vrot.slane %v2490_v20, 4  ;;  %2910 = vmatpush2.bf16.msra.mxu1 %v4140_v1  ;;  %v4162_v1 = vld [vmem:[#allocation5 + $0x70] sm:$0xff]  }
 0x340   : > { %v2430_v0 = vrot.slane %v2416_v2, 4  ;;  %2911 = vmatprep.subr.bf16.mxu1 %v4266_v49  ;;  %v4150_v49 = vld [vmem:[%s5408_s4 + $0x14] ss:$8 sps:$4 sm:$0xff]  }
 0x341   : > { %v2507_v43 = vsel %vm2291_vm15, %v2490_v20, %v2499_v3  ;;  %v4166_v20 = vld [vmem:[%s5408_s4 + $0x30] ss:$8 sps:$4 sm:$0xff]  }
 0x342   : > { %v2438_v5 = vsel %vm2226_vm0, %v2416_v2, %v2430_v0  ;;  %v4142_v6 = vld [vmem:[#allocation5 + $0xd8] sm:$0xff]   ;;  %2523 = vst [vmem:[#allocation5 + $0xb8] sm:$0xf] %v2507_v43  ;;  %v2486_v7 = vpop.permute.xlu1 %2485 }
 0x343   : > { %2454 = vst [vmem:[#allocation5 + $0x84] sm:$0xf] %v2438_v5  ;;  %v2488_v8 = vpop.permute.xlu0 %2487  ;;  %v2497_v10 = vrot.slane %v2486_v7, 4  ;;  %2912 = vmatpush2.bf16.msra.mxu1 %v4141_v4  ;;  %3903 = vmatprep.subr.bf16.mxu0 %v4142_v6  ;;  %v4172_v4 = vld [vmem:[%s5408_s4 + $0x44] ss:$8 sps:$4 sm:$0xff]  }
 0x344   : > { %v2498_v14 = vrot.slane %v2488_v8, 4  ;;  %3958 = vmatprep.subr.bf16.mxu1 %v4271_v57 }
 0x345   : > { %v2505_v12 = vsel %vm2291_vm15, %v2486_v7, %v2497_v10 }
 0x346   : > { %v2506_v15 = vsel %vm2291_vm15, %v2488_v8, %v2498_v14  ;;  %v4146_v16 = vld [vmem:[#allocation5 + $0x98] sm:$0xff]   ;;  %2521 = vst [vmem:[#allocation5 + $0xb0] sm:$0xf] %v2505_v12  ;;  %v2618_v58 = vpop.permute.xlu1 %2617  ;;  %2914 = vmatmul.mubr.bf16.vlgmr.msra.gmra.mxu1 %v4143_v9  ;;  %v4168_v8 = vld [vmem:[#allocation5 + $0x68] sm:$0xff]   ;;  %v4171_v12 = vld [vmem:[#allocation5 + $0x60] sm:$0xff]  }
 0x347   : > { %2522 = vst [vmem:[#allocation5 + $0xb4] sm:$0xf] %v2506_v15  ;;  %v2484_v19 = vpop.permute.xlu0 %2483  ;;  %v2627_v46 = vrot.slane %v2618_v58, 4  ;;  %3904 = vmatpush3.bf16.msra.mxu0 %v4146_v16  ;;  %3801 = vmatprep.mubr.msk.bf16.mxu1 %vm2865_vm14, %v4150_v49  ;;  %v4177_v15 = vld [vmem:[%s5408_s4 + $0x40] ss:$8 sps:$4 sm:$0xff]  }
 0x348   : > { %v2496_v61 = vrot.slane %v2484_v19, 4  ;;  %3905 = vmatprep.subr.bf16.mxu0 %v4147_v24  ;;  %v4174_v16 = vld [vmem:[%s5410_s6] ss:$12 sps:$4 sm:$0xff]  }
 0x349   : > { %v2636_v25 = vsel %vm2629_vm2, %v2618_v58, %v2627_v46  ;;  %v4180_v58 = vld [vmem:[%s5410_s6 + $0x1c] ss:$12 sps:$4 sm:$0xff]  }
 0x34a   : > { %v2504_v11 = vsel %vm2291_vm15, %v2484_v19, %v2496_v61  ;;  %2652 = vst [vmem:[#allocation5 + $0xf8] sm:$0xf] %v2636_v25  ;;  %v2482_v17 = vpop.permute.xlu1 %2481  ;;  %v4155_v38 = vld [vmem:[#allocation5 + $0x80] sm:$0xff]   ;;  %v4183_v61 = vld [vmem:[%s5410_s6 + $0x18] ss:$12 sps:$4 sm:$0xff]  }
 0x34b   : > { %2520 = vst [vmem:[#allocation5 + $0xac] sm:$0xf] %v2504_v11  ;;  %v2492_v26 = vpop.permute.xlu0 %2491  ;;  %v2495_v28 = vrot.slane %v2482_v17, 4  ;;  %3906 = vmatpush3.bf16.msra.mxu0 %v4148_v31  ;;  %v4182_v46 = vld [vmem:[%s5410_s6 + $0x8] ss:$12 sps:$4 sm:$0xff]  }
 0x34c   : > { %v2500_v29 = vrot.slane %v2492_v26, 4  ;;  %3907 = vmatprep.subr.bf16.mxu0 %v4149_v60  ;;  %v4184_v25 = vld [vmem:[%s5410_s6 + $0x34] ss:$12 sps:$4 sm:$0xff]   ;;  %v4187_v31 = vld [vmem:[%s5410_s6 + $0x30] ss:$12 sps:$4 sm:$0xff]  }
 0x34d   : > { %v2503_v32 = vsel %vm2291_vm15, %v2482_v17, %v2495_v28  ;;  %v4186_v11 = vld [vmem:[%s5410_s6 + $0x20] ss:$12 sps:$4 sm:$0xff]   ;;  %v4191_v60 = vld [vmem:[%s5410_s6 + $0x48] ss:$12 sps:$4 sm:$0xff]   ;;  %v4194_v28 = vld [vmem:[%s5410_s6 + $0x50] ss:$12 sps:$4 sm:$0xff]  }
 0x34e   : > { %v2508_v33 = vsel %vm2291_vm15, %v2492_v26, %v2500_v29  ;;  %2519 = vst [vmem:[#allocation5 + $0xa8] sm:$0xf] %v2503_v32  ;;  %v2614_v13 = vpop.permute.xlu1 %2613  ;;  %2922 = vmatmul.mubr.bf16.gmra.mxu1 %v4152_v27  ;;  %v4161_v56 = vld [vmem:[#allocation5 + $0xb0] sm:$0xff]   ;;  %v4192_v27 = vld [vmem:[%s5410_s6 + $0x64] ss:$12 sps:$4 sm:$0xff]  }
 0x34f   : > { %2524 = vst [vmem:[#allocation5 + $0xbc] sm:$0xf] %v2508_v33  ;;  %v2616_v44 = vpop.permute.xlu0 %2615  ;;  %v2625_v21 = vrot.slane %v2614_v13, 4  ;;  %3908 = vmatpush3.bf16.msra.mxu0 %v4153_v18  ;;  %3802 = vmatprep.mubr.msk.bf16.mxu1 %vm2865_vm14, %v4156_v30  ;;  %v4188_v17 = vld [vmem:[%s5410_s6 + $0x4c] ss:$12 sps:$4 sm:$0xff]  }
 0x350   : > { %v2626_v36 = vrot.slane %v2616_v44, 4  ;;  %3909 = vmatprep.subr.bf16.mxu0 %v4154_v34  ;;  %v4190_v26 = vld [vmem:[%s5410_s6 + $0x38] ss:$12 sps:$4 sm:$0xff]   ;;  %v4195_v29 = vld [vmem:[%s5410_s6 + $0x60] ss:$12 sps:$4 sm:$0xff]  }
 0x351   : > { %v2634_v23 = vsel %vm2629_vm2, %v2614_v13, %v2625_v21  ;;  %v4196_v30 = vld [vmem:[%s5410_s6 + $0x68] ss:$12 sps:$4 sm:$0xff]  }
 0x352   : > { %v2635_v37 = vsel %vm2629_vm2, %v2616_v44, %v2626_v36  ;;  %2650 = vst [vmem:[#allocation5 + $0xf0] sm:$0xf] %v2634_v23  ;;  %v2478_v39 = vpop.permute.xlu1 %2477 }
 0x353   : > { %2651 = vst [vmem:[#allocation5 + $0xf4] sm:$0xf] %v2635_v37  ;;  %v2620_v40 = vpop.permute.xlu0 %2619  ;;  %v2493_v42 = vrot.slane %v2478_v39, 4  ;;  %3910 = vmatpush3.bf16.msra.mxu0 %v4155_v38 }
 0x354   : > { %v2628_v45 = vrot.slane %v2620_v40, 4 }
 0x355   : > { %v2501_v48 = vsel %vm2291_vm15, %v2478_v39, %v2493_v42  ;;  %v4165_v0 = vld [vmem:[#allocation5 + $0xa8] sm:$0xff]  }
 0x356   : > { %v2637_v50 = vsel %vm2629_vm2, %v2620_v40, %v2628_v45  ;;  %v4159_v22 = vld [vmem:[#allocation5 + $0xb8] sm:$0xff]   ;;  %2517 = vst [vmem:[#allocation5 + $0xa0] sm:$0xf] %v2501_v48  ;;  %v2610_v51 = vpop.permute.xlu1 %2609  ;;  %2930 = vmatmul.mubr.bf16.gmra.mxu1 %v4158_v41 }
 0x357   : > { %2653 = vst [vmem:[#allocation5 + $0xfc] sm:$0xf] %v2637_v50  ;;  %v2480_v35 = vpop.permute.xlu0 %2479  ;;  %v2623_v53 = vrot.slane %v2610_v51, 4  ;;  %3911 = vmatprep.subr.bf16.mxu0 %v4159_v22  ;;  %3803 = vmatprep.mubr.msk.bf16.mxu1 %vm2865_vm14, %v4163_v47 }
 0x358   : > { %v2494_v55 = vrot.slane %v2480_v35, 4  ;;  %3912 = vmatpush3.bf16.msra.mxu0 %v4160_v52 }
 0x359   : > { %v2632_v59 = vsel %vm2629_vm2, %v2610_v51, %v2623_v53  ;;  %3913 = vmatprep.subr.bf16.mxu0 %v4161_v56 }
 0x35a   : > { %v2502_v54 = vsel %vm2291_vm15, %v2480_v35, %v2494_v55  ;;  %2648 = vst [vmem:[#allocation5 + $0xe8] sm:$0xf] %v2632_v59  ;;  %v2606_v62 = vpop.permute.xlu1 %2605  ;;  %v4170_v10 = vld [vmem:[#allocation5 + $0xf0] sm:$0xff]  }
 0x35b   : > { %2518 = vst [vmem:[#allocation5 + $0xa4] sm:$0xf] %v2502_v54  ;;  %v2612_v63 = vpop.permute.xlu0 %2611  ;;  %v2621_v2 = vrot.slane %v2606_v62, 4 }
 0x35c   : > { %v2624_v3 = vrot.slane %v2612_v63, 4  ;;  %3914 = vmatpush3.bf16.msra.mxu0 %v4162_v1 }
 0x35d   : > { %v2630_v43 = vsel %vm2629_vm2, %v2606_v62, %v2621_v2  ;;  %3915 = vmatprep.subr.bf16.mxu0 %v4165_v0 }
 0x35e   : > { %v2633_v5 = vsel %vm2629_vm2, %v2612_v63, %v2624_v3  ;;  %v4167_v6 = vld [vmem:[#allocation5 + $0xf8] sm:$0xff]   ;;  %2646 = vst [vmem:[#allocation5 + $0xe0] sm:$0xf] %v2630_v43  ;;  %2938 = vmatmul.mubr.bf16.gmra.mxu1 %v4166_v20 }
 0x35f   : > { %2649 = vst [vmem:[#allocation5 + $0xec] sm:$0xf] %v2633_v5  ;;  %v2608_v7 = vpop.permute.xlu0 %2607  ;;  %3959 = vmatpush3.bf16.msra.mxu1 %v4167_v6  ;;  %3804 = vmatprep.mubr.msk.bf16.mxu1 %vm2865_vm14, %v4172_v4 }
 0x360   : > { %v2622_v9 = vrot.slane %v2608_v7, 4  ;;  %3916 = vmatpush3.bf16.msra.mxu0 %v4168_v8  ;;  %3960 = vmatprep.subr.bf16.mxu1 %v4271_v57 }
 0x362   : > { %v2631_v14 = vsel %vm2629_vm2, %v2608_v7, %v2622_v9  ;;  %v4169_v49 = vld [vmem:[#allocation5 + $0xa0] sm:$0xff]  }
 0x363   : > { %2647 = vst [vmem:[#allocation5 + $0xe4] sm:$0xf] %v2631_v14  ;;  %3917 = vmatprep.subr.bf16.mxu0 %v4169_v49  ;;  %3961 = vmatpush3.bf16.msra.mxu1 %v4170_v10 }
 0x364   : > { %3918 = vmatpush3.bf16.msra.mxu0 %v4171_v12  ;;  %3962 = vmatprep.subr.bf16.mxu1 %v4271_v57 }
 0x366   : > { %v4178_v19 = vld [vmem:[#allocation5 + $0xe8] sm:$0xff]   ;;  %2946 = vmatmul.mubr.bf16.gmra.mxu1 %v4177_v15 }
 0x367   : > { %3317 = vmatmul.mubr.bf16.vlgmr.msra.gmra.mxu0 %v4174_v16  ;;  %3963 = vmatpush3.bf16.msra.mxu1 %v4178_v19  ;;  %v2701_v33 = vpop.permute.xlu1 %2700 }
 0x368   : > { %3964 = vmatprep.subr.bf16.mxu1 %v4271_v57  ;;  %3966 = vmatprep.mubr.msk.bf16.mxu1 %vm4272_vm3, %v4271_v57 }
 0x369   : > { %3324 = vmatprep.mubr.bf16.mxu0 %v4180_v58 }
 0x36a   : > { %v4179_v24 = vld [vmem:[#allocation5 + $0xe0] sm:$0xff]  }
 0x36b   : > { %3965 = vmatpush3.bf16.msra.mxu1 %v4179_v24 }
 0x36c   : > { %v2706_v34 = vpop.permute.xlu0 %2705 }
 0x36e   : > { %3967 = vmatmul.mubr.msk.bf16.vlgmr.msra.gmra.mxu1 %vm2865_vm14, %v4182_v46 }
 0x36f   : > { %3325 = vmatmul.mubr.bf16.gmra.mxu0 %v4183_v61  ;;  %3970 = vmatprep.mubr.msk.bf16.mxu1 %vm4272_vm3, %v4271_v57 }
 0x370   : > { %3332 = vmatprep.mubr.bf16.mxu0 %v4184_v25  ;;  %v2716_v42 = vpop.permute.xlu0 %2715 }
 0x374   : > { %v2726_v55 = vpop.permute.xlu0 %2725 }
 0x376   : > { %3971 = vmatmul.mubr.msk.bf16.gmra.mxu1 %vm2865_vm14, %v4186_v11 }
 0x377   : > { %3333 = vmatmul.mubr.bf16.gmra.mxu0 %v4187_v31  ;;  %3974 = vmatprep.mubr.msk.bf16.mxu1 %vm4272_vm3, %v4271_v57 }
 0x378   : > { %3340 = vmatprep.mubr.bf16.mxu0 %v4188_v17  ;;  %v2736_v5 = vpop.permute.xlu0 %2735 }
 0x37c   : > { %v2746_v19 = vpop.permute.xlu0 %2745 }
 0x37e   : > { %3975 = vmatmul.mubr.msk.bf16.gmra.mxu1 %vm2865_vm14, %v4190_v26 }
 0x37f   : > { %3341 = vmatmul.mubr.bf16.gmra.mxu0 %v4191_v60  ;;  %3978 = vmatprep.mubr.msk.bf16.mxu1 %vm4272_vm3, %v4271_v57 }
 0x380   : > { %3348 = vmatprep.mubr.bf16.mxu0 %v4192_v27 }
 0x386   : > { %3979 = vmatmul.mubr.msk.bf16.gmra.mxu1 %vm2865_vm14, %v4194_v28 }
 0x387   : > { %3349 = vmatmul.mubr.bf16.gmra.mxu0 %v4195_v29  ;;  %3982 = vmatprep.mubr.msk.bf16.mxu1 %vm4272_vm3, %v4271_v57  ;;  %v2711_v57 = vpop.permute.xlu1 %2710 }
 0x38b   : > { %v2721_v22 = vpop.permute.xlu1 %2720 }
 0x38e   : > { %3983 = vmatmul.mubr.msk.bf16.gmra.mxu1 %vm2865_vm14, %v4196_v30 }
 0x38f   : > { %v2731_v1 = vpop.permute.xlu1 %2730 }
 0x393   : > { %v2741_v9 = vpop.permute.xlu1 %2740 }
 0x397   : > { %v3027_v31 = vpop.permute.xlu1 %3026 }
 0x406   : > { %v2915_v32 = vpop.f32.mrf.mxu1 }
 0x407   : > { %v5339_v18 = vadd.f32 %v2915_v32, %v2701_v33 }
 0x408   : > { %v2917_v13 = vpop.f32.mrf.mxu1 }
 0x409   : > { %v3845_v21 = vmul.f32 -1.442695, %v5339_v18 }
 0x40a   : > { %v2918_v44 = vpop.f32.mrf.mxu1 }
 0x40b   : > { %v5342_v36 = vadd.f32 %v2918_v44, %v2706_v34  ;;  %4197 = vpow2.f32 %v3845_v21  ;;  %v3032_v44 = vpop.permute.xlu0 %3031 }
 0x40c   : > { %v2920_v23 = vpop.f32.mrf.mxu1 }
 0x40d   : > { %v3846_v38 = vmul.f32 -1.442695, %v5342_v36 }
 0x40e   : > { %v2923_v37 = vpop.f32.mrf.mxu1 }
 0x40f   : > { %v5345_v39 = vadd.f32 %v2923_v37, %v2711_v57  ;;  %4199 = vpow2.f32 %v3846_v38 }
 0x410   : > { %v2925_v40 = vpop.f32.mrf.mxu1 }
 0x411   : > { %v3847_v45 = vmul.f32 -1.442695, %v5345_v39 }
 0x412   : > { %v2926_v41 = vpop.f32.mrf.mxu1 }
 0x413   : > { %v5348_v47 = vadd.f32 %v2926_v41, %v2716_v42  ;;  %4201 = vpow2.f32 %v3847_v45 }
 0x414   : > { %v2928_v48 = vpop.f32.mrf.mxu1 }
 0x415   : > { %v3848_v51 = vmul.f32 -1.442695, %v5348_v47 }
 0x416   : > { %v2931_v50 = vpop.f32.mrf.mxu1 }
 0x417   : > { %v5351_v35 = vadd.f32 %v2931_v50, %v2721_v22  ;;  %4203 = vpow2.f32 %v3848_v51  ;;  %v3037_v22 = vpop.permute.xlu1 %3036 }
 0x418   : > { %v2933_v52 = vpop.f32.mrf.mxu1  ;;  %v4198_v54 = vpop.eup %4197 }
 0x419   : > { %v3849_v56 = vmul.f32 -1.442695, %v5351_v35  ;;  %v3460_v20 = vadd.f32 1.0, %v4198_v54 }
 0x41a   : > { %v2934_v53 = vpop.f32.mrf.mxu1 }
 0x41b   : > { %v5354_v62 = vadd.f32 %v2934_v53, %v2726_v55  ;;  %4205 = vpow2.f32 %v3849_v56 }
 0x41c   : > { %v2936_v59 = vpop.f32.mrf.mxu1  ;;  %v4200_v3 = vpop.eup %4199  ;;  %4207 = vrcp.f32 %v3460_v20 }
 0x41d   : > { %v3850_v0 = vmul.f32 -1.442695, %v5354_v62  ;;  %v3461_v6 = vadd.f32 1.0, %v4200_v3 }
 0x41e   : > { %v2939_v63 = vpop.f32.mrf.mxu1 }
 0x41f   : > { %v5357_v4 = vadd.f32 %v2939_v63, %v2731_v1  ;;  %4209 = vpow2.f32 %v3850_v0  ;;  %v3042_v0 = vpop.permute.xlu0 %3041 }
 0x420   : > { %v2941_v2 = vpop.f32.mrf.mxu1  ;;  %v4202_v8 = vpop.eup %4201  ;;  %4211 = vrcp.f32 %v3461_v6 }
 0x421   : > { %v3851_v10 = vmul.f32 -1.442695, %v5357_v4  ;;  %v3462_v15 = vadd.f32 1.0, %v4202_v8 }
 0x422   : > { %v2942_v43 = vpop.f32.mrf.mxu1 }
 0x423   : > { %v5360_v14 = vadd.f32 %v2942_v43, %v2736_v5  ;;  %4213 = vpow2.f32 %v3851_v10 }
 0x424   : > { %v2944_v7 = vpop.f32.mrf.mxu1  ;;  %v4204_v58 = vpop.eup %4203  ;;  %4215 = vrcp.f32 %v3462_v15 }
 0x425   : > { %v3852_v24 = vmul.f32 -1.442695, %v5360_v14  ;;  %v3463_v26 = vadd.f32 1.0, %v4204_v58 }
 0x426   : > { %v2947_v49 = vpop.f32.mrf.mxu1 }
 0x427   : > { %v3919_v12 = vpop.f32.mrf.mxu0  ;;  %v5363_v46 = vadd.f32 %v2947_v49, %v2741_v9  ;;  %4217 = vpow2.f32 %v3852_v24 }
 0x428   : > { %v2949_v16 = vpop.f32.mrf.mxu1  ;;  %v4206_v28 = vpop.eup %4205  ;;  %4219 = vrcp.f32 %v3463_v26 }
 0x429   : > { %v3920_v61 = vpop.f32.mrf.mxu0  ;;  %v3853_v29 = vmul.f32 -1.442695, %v5363_v46  ;;  %v3464_v23 = vadd.f32 1.0, %v4206_v28  ;;  %v4208_v38 = vpop.eup %4207 }
 0x42a   : > { %v3921_v25 = vadd.f32 %v3920_v61, %v3919_v12  ;;  %v2950_v11 = vpop.f32.mrf.mxu1 }
 0x42b   : > { %v3922_v17 = vpop.f32.mrf.mxu0  ;;  %v5366_v30 = vadd.f32 %v2950_v11, %v2746_v19  ;;  %4221 = vpow2.f32 %v3853_v29  ;;  %v3047_v19 = vpop.permute.xlu1 %3046 }
 0x42c   : > { %v2952_v60 = vpop.f32.mrf.mxu1  ;;  %v3319_v27 = vadd.f32 %v3921_v25, %v3027_v31  ;;  %v4210_v45 = vpop.eup %4209  ;;  %4223 = vrcp.f32 %v3464_v23 }
 0x42d   : > { %v3923_v32 = vpop.f32.mrf.mxu0  ;;  %v3854_v40 = vmul.f32 -1.442695, %v5366_v30  ;;  %v4212_v59 = vpop.eup %4211  ;;  %v3465_v54 = vadd.f32 1.0, %v4210_v45 }
 0x42e   : > { %v3924_v33 = vadd.f32 %v3923_v32, %v3922_v17  ;;  %v3391_v13 = vpop.f32.mrf.mxu1 }
 0x42f   : > { %v3392_v34 = vadd.f32 %v3391_v13, %v3319_v27  ;;  %v3925_v21 = vpop.f32.mrf.mxu0  ;;  %4225 = vpow2.f32 %v3854_v40 }
 0x430   : > { %v3968_v37 = vpop.f32.mrf.mxu1  ;;  %v3322_v57 = vadd.f32 %v3924_v33, %v3032_v44  ;;  %v4214_v20 = vpop.eup %4213  ;;  %4227 = vrcp.f32 %v3465_v54 }
 0x431   : > { %v3490_v41 = vsub.f32 %v5339_v18, %v3392_v34  ;;  %v3926_v42 = vpop.f32.mrf.mxu0  ;;  %v4216_v9 = vpop.eup %4215  ;;  %v3466_v10 = vadd.f32 1.0, %v4214_v20 }
 0x432   : > { %v3927_v48 = vadd.f32 %v3926_v42, %v3925_v21  ;;  %v3394_v50 = vpop.f32.mrf.mxu1  ;;  %v3052_v33 = vpop.permute.xlu0 %3051 }
 0x433   : > { %v3500_v51 = vmul.f32 %v4208_v38, %v3490_v41  ;;  %v3395_v52 = vadd.f32 %v3394_v50, %v3322_v57  ;;  %v3928_v53 = vpop.f32.mrf.mxu0  ;;  %4229 = vrcp.f32 %v3466_v10 }
 0x434   : > { %v3969_v55 = vpop.f32.mrf.mxu1  ;;  %v3327_v56 = vadd.f32 %v3927_v48, %v3037_v22  ;;  %v3057_v48 = vpop.permute.xlu1 %3056 }
 0x435   : > { %v3510_v18 = vadd.f32 %v3500_v51, %v3392_v34  ;;  %v3491_v63 = vsub.f32 %v5342_v36, %v3395_v52  ;;  %v3929_v1 = vpop.f32.mrf.mxu0  ;;  %v4218_v36 = vpop.eup %4217 }
 0x436   : > { %v3930_v2 = vadd.f32 %v3929_v1, %v3928_v53  ;;  %v3399_v3 = vpop.f32.mrf.mxu1  ;;  %v4220_v17 = vpop.eup %4219  ;;  %v3467_v26 = vadd.f32 1.0, %v4218_v36 }
 0x437   : > { %3520 = vst [vmem:[%s5374_s20] sm:$0xff] %v3510_v18  ;;  %v3501_v43 = vmul.f32 %v4212_v59, %v3491_v63  ;;  %v3400_v5 = vadd.f32 %v3399_v3, %v3327_v56  ;;  %v3931_v6 = vpop.f32.mrf.mxu0  ;;  %v3062_v1 = vpop.permute.xlu0 %3061 }
 0x438   : > { %v3972_v7 = vpop.f32.mrf.mxu1  ;;  %v3330_v8 = vadd.f32 %v3930_v2, %v3042_v0  ;;  %4231 = vrcp.f32 %v3467_v26  ;;  %v3067_v10 = vpop.permute.xlu1 %3066 }
 0x439   : > { %v3511_v49 = vadd.f32 %v3501_v43, %v3395_v52  ;;  %v3492_v12 = vsub.f32 %v5345_v39, %v3400_v5  ;;  %v3932_v15 = vpop.f32.mrf.mxu0  ;;  %v4222_v39 = vpop.eup %4221 }
 0x43a   : > { %v3933_v16 = vadd.f32 %v3932_v15, %v3931_v6  ;;  %v3402_v58 = vpop.f32.mrf.mxu1  ;;  %v4224_v37 = vpop.eup %4223  ;;  %v3468_v57 = vadd.f32 1.0, %v4222_v39 }
 0x43b   : > { %3521 = vst [vmem:[%s5374_s20 + $0x8] sm:$0xff] %v3511_v49  ;;  %v3502_v24 = vmul.f32 %v4216_v9, %v3492_v12  ;;  %v3403_v61 = vadd.f32 %v3402_v58, %v3330_v8  ;;  %v3934_v25 = vpop.f32.mrf.mxu0 }
 0x43c   : > { %v3973_v11 = vpop.f32.mrf.mxu1  ;;  %v3335_v31 = vadd.f32 %v3933_v16, %v3047_v19  ;;  %4233 = vrcp.f32 %v3468_v57 }
 0x43d   : > { %v3512_v60 = vadd.f32 %v3502_v24, %v3400_v5  ;;  %v3493_v27 = vsub.f32 %v5348_v47, %v3403_v61  ;;  %v3935_v28 = vpop.f32.mrf.mxu0  ;;  %v4226_v47 = vpop.eup %4225 }
 0x43e   : > { %v3936_v29 = vadd.f32 %v3935_v28, %v3934_v25  ;;  %v3407_v32 = vpop.f32.mrf.mxu1  ;;  %v3469_v55 = vadd.f32 1.0, %v4226_v47  ;;  %v4228_v18 = vpop.eup %4227 }
 0x43f   : > { %3522 = vst [vmem:[%s5374_s20 + $0x10] sm:$0xff] %v3512_v60  ;;  %v3503_v13 = vmul.f32 %v4220_v17, %v3493_v27  ;;  %v3408_v44 = vadd.f32 %v3407_v32, %v3335_v31  ;;  %v3937_v34 = vpop.f32.mrf.mxu0  ;;  %v3072_v11 = vpop.permute.xlu0 %3071 }
 0x440   : > { %v3976_v21 = vpop.f32.mrf.mxu1  ;;  %v3338_v23 = vadd.f32 %v3936_v29, %v3052_v33  ;;  %4235 = vrcp.f32 %v3469_v55  ;;  %v4230_v8 = vpop.eup %4229 }
 0x441   : > { %v3513_v38 = vadd.f32 %v3503_v13, %v3403_v61  ;;  %v3494_v40 = vsub.f32 %v5351_v35, %v3408_v44  ;;  %v3938_v41 = vpop.f32.mrf.mxu0 }
 0x442   : > { %v3939_v42 = vadd.f32 %v3938_v41, %v3937_v34  ;;  %v3410_v45 = vpop.f32.mrf.mxu1 }
 0x443   : > { %3523 = vst [vmem:[%s5374_s20 + $0x18] sm:$0xff] %v3513_v38  ;;  %v3504_v50 = vmul.f32 %v4224_v37, %v3494_v40  ;;  %v3411_v22 = vadd.f32 %v3410_v45, %v3338_v23  ;;  %v3940_v51 = vpop.f32.mrf.mxu0 }
 0x444   : > { %v3977_v52 = vpop.f32.mrf.mxu1  ;;  %v3343_v53 = vadd.f32 %v3939_v42, %v3057_v48 }
 0x445   : > { %v3514_v56 = vadd.f32 %v3504_v50, %v3408_v44  ;;  %v3495_v59 = vsub.f32 %v5354_v62, %v3411_v22  ;;  %v3941_v54 = vpop.f32.mrf.mxu0  ;;  %v4232_v61 = vpop.eup %4231 }
 0x446   : > { %v3942_v35 = vadd.f32 %v3941_v54, %v3940_v51  ;;  %v3415_v63 = vpop.f32.mrf.mxu1 }
 0x447   : > { %3524 = vst [vmem:[%s5374_s20 + $0x20] sm:$0xff] %v3514_v56  ;;  %v3505_v20 = vmul.f32 %v4228_v18, %v3495_v59  ;;  %v3416_v2 = vadd.f32 %v3415_v63, %v3343_v53  ;;  %v3943_v3 = vpop.f32.mrf.mxu0 }
 0x448   : > { %v3980_v0 = vpop.f32.mrf.mxu1  ;;  %v3346_v43 = vadd.f32 %v3942_v35, %v3062_v1 }
 0x449   : > { %v3515_v5 = vadd.f32 %v3505_v20, %v3411_v22  ;;  %v3496_v6 = vsub.f32 %v5357_v4, %v3416_v2  ;;  %v3944_v7 = vpop.f32.mrf.mxu0  ;;  %v4234_v39 = vpop.eup %4233 }
 0x44a   : > { %v3945_v9 = vadd.f32 %v3944_v7, %v3943_v3  ;;  %v3418_v62 = vpop.f32.mrf.mxu1 }
 0x44b   : > { %3525 = vst [vmem:[%s5374_s20 + $0x28] sm:$0xff] %v3515_v5  ;;  %v3506_v49 = vmul.f32 %v4230_v8, %v3496_v6  ;;  %v3419_v12 = vadd.f32 %v3418_v62, %v3346_v43  ;;  %v3946_v15 = vpop.f32.mrf.mxu0 }
 0x44c   : > { %v3981_v36 = vpop.f32.mrf.mxu1  ;;  %v3351_v16 = vadd.f32 %v3945_v9, %v3067_v10 }
 0x44d   : > { %v3516_v58 = vadd.f32 %v3506_v49, %v3416_v2  ;;  %v3497_v19 = vsub.f32 %v5360_v14, %v3419_v12  ;;  %v3947_v24 = vpop.f32.mrf.mxu0  ;;  %v4236_v34 = vpop.eup %4235 }
 0x44e   : > { %v3948_v25 = vadd.f32 %v3947_v24, %v3946_v15  ;;  %v3423_v4 = vpop.f32.mrf.mxu1 }
 0x44f   : > { %3526 = vst [vmem:[%s5374_s20 + $0x30] sm:$0xff] %v3516_v58  ;;  %v3507_v31 = vmul.f32 %v4232_v61, %v3497_v19  ;;  %v3424_v17 = vadd.f32 %v3423_v4, %v3351_v16 }
 0x450   : > { %v3984_v26 = vpop.f32.mrf.mxu1  ;;  %v3354_v60 = vadd.f32 %v3948_v25, %v3072_v11 }
 0x451   : > { %v3517_v27 = vadd.f32 %v3507_v31, %v3419_v12  ;;  %v3498_v28 = vsub.f32 %v5363_v46, %v3424_v17 }
 0x452   : > { %v3426_v29 = vpop.f32.mrf.mxu1 }
 0x453   : > { %3527 = vst [vmem:[%s5374_s20 + $0x38] sm:$0xff] %v3517_v27  ;;  %v3508_v32 = vmul.f32 %v4234_v39, %v3498_v28  ;;  %v3427_v14 = vadd.f32 %v3426_v29, %v3354_v60 }
 0x454   : > { %v3985_v33 = vpop.f32.mrf.mxu1 }
 0x455   : > { %v3518_v13 = vadd.f32 %v3508_v32, %v3424_v17  ;;  %v3499_v44 = vsub.f32 %v5366_v30, %v3427_v14 }
 0x457   : > { %3528 = vst [vmem:[%s5374_s20 + $0x40] sm:$0xff] %v3518_v13  ;;  %v3509_v21 = vmul.f32 %v4236_v34, %v3499_v44 }
 0x459   : > { %v3519_v23 = vadd.f32 %v3509_v21, %v3427_v14 }
 0x45b   : > { %3529 = vst [vmem:[%s5374_s20 + $0x48] sm:$0xff] %v3519_v23 }
 0x45c PF: > { %s18_s29 = sadd.s32 1, %s4259_s29   ;;  %s5417_s27 = smov %s4255_s28 }
 0x45d   : > { %p15_p5 = scmp.ge.s32.totalorder %s18_s29, 4   ;;  %s5418_s28 = smov %s5420_s30 }
 0x45f   :  { %17 = sbr.rel (!%p15_p5) target bundleno = 2 (0x2), region = 93 }

</bundles_post_ra>
